<compile_context>
chip_gen: v6e
topology: v6e:2x2x1
jax: 0.10.0
libtpu: 0.0.40
codegen_flags: <defaults>
</compile_context>

<pallas_src>
import functools
import math

import jax
import jax.numpy as jnp
from jax.experimental import pallas as pl
from jax.experimental.pallas import tpu as pltpu


_STACK_KEYS = ("wq", "bq", "wk", "bk", "wv", "bv", "wo", "bo", "ln_g", "ln_b",
               "w1", "b1", "w2", "b2", "ffn_ln_g", "ffn_ln_b")
_N_STACK = len(_STACK_KEYS)


# ----------------------------------------------------------------------------
# Sinusoidal position-encoding table (standard "Attention Is All You Need")
# ----------------------------------------------------------------------------
def sinusoid_pos_table(n_position, d_hid):
    pos = jnp.arange(n_position, dtype=jnp.float32)[:, None]          # (P, 1)
    i = jnp.arange(d_hid, dtype=jnp.float32)[None, :]                  # (1, D)
    angle = pos / jnp.power(10000.0, 2.0 * jnp.floor(i / 2.0) / d_hid)
    even = (jnp.arange(d_hid) % 2) == 0
    return jnp.where(even[None, :], jnp.sin(angle), jnp.cos(angle))    # (P, D)


# ----------------------------------------------------------------------------
# In-kernel building blocks (traced inside the pallas_call body)
# ----------------------------------------------------------------------------
def _layernorm(x, g, b, eps):
    mean = jnp.mean(x, axis=-1, keepdims=True)
    var = jnp.mean(jnp.square(x - mean), axis=-1, keepdims=True)
    return (x - mean) * jax.lax.rsqrt(var + eps) * g + b


def _mha(xq, xkv, wq, bq, wk, bk, wv, bv, wo, bo, g, beta,
         *, B, Sq, Sk, H, dk, dv, eps):
    """Multi-head cross-attention + residual + post-LayerNorm.

    xq  : (B*Sq, Dq)  f32 queries stream (batch folded into rows)
    xkv : (B*Sk, Dkv) f32 key/value stream
    Weights are bf16; the 1/sqrt(dk) scale is pre-folded into wq/bq.
    """
    xq_b = xq.astype(jnp.bfloat16)
    xkv_b = xkv.astype(jnp.bfloat16)

    # One folded-batch MXU matmul per projection, bf16 in / f32 out.
    Q = jnp.dot(xq_b, wq, preferred_element_type=jnp.float32) + bq     # (B*Sq, H*dk)
    K = jnp.dot(xkv_b, wk, preferred_element_type=jnp.float32) + bk    # (B*Sk, H*dk)
    V = jnp.dot(xkv_b, wv, preferred_element_type=jnp.float32) + bv    # (B*Sk, H*dv)

    # Cheap leading-dim split only (lane dim untouched); heads stay contiguous
    # in the lane dim and are selected with H static lane slices below.
    Q3 = Q.reshape(B, Sq, H * dk).astype(jnp.bfloat16)
    K3 = K.reshape(B, Sk, H * dk).astype(jnp.bfloat16)
    V3 = V.reshape(B, Sk, H * dv).astype(jnp.bfloat16)

    ctx_heads = []
    for h in range(H):
        qh = Q3[:, :, h * dk:(h + 1) * dk]                  # (B, Sq, dk) bf16
        kh = K3[:, :, h * dk:(h + 1) * dk]                  # (B, Sk, dk) bf16
        vh = V3[:, :, h * dv:(h + 1) * dv]                  # (B, Sk, dv) bf16

        s = jnp.einsum('bqd,bkd->bqk', qh, kh,
                       preferred_element_type=jnp.float32)  # (B, Sq, Sk) f32
        s = s - jnp.max(s, axis=-1, keepdims=True)
        p = jnp.exp(s)
        p = p / jnp.sum(p, axis=-1, keepdims=True)           # exact softmax (f32)

        ctx_heads.append(
            jnp.einsum('bqk,bkd->bqd', p.astype(jnp.bfloat16), vh,
                       preferred_element_type=jnp.float32))  # (B, Sq, dv) f32

    ctx = jnp.concatenate(ctx_heads, axis=-1).reshape(B * Sq, H * dv)

    out = jnp.dot(ctx.astype(jnp.bfloat16), wo,
                  preferred_element_type=jnp.float32) + bo
    return _layernorm(xq + out, g, beta, eps)


def _ffn(x, w1, b1, w2, b2, g, beta, eps):
    h = jnp.dot(x.astype(jnp.bfloat16), w1,
                preferred_element_type=jnp.float32) + b1
    h = jnp.maximum(h, 0.0)
    f = jnp.dot(h.astype(jnp.bfloat16), w2,
                preferred_element_type=jnp.float32) + b2
    return _layernorm(x + f, g, beta, eps)


# ----------------------------------------------------------------------------
# Encoder kernel: one grid step == one encoder layer (weights streamed per l)
# ----------------------------------------------------------------------------
def _encoder_kernel(*refs, n_head, d_k, d_v, B, S1, S2, eps):
    (x1_ref, x2_ref, pe1_ref, pe2_ref,
     ln1g_ref, ln1b_ref, ln2g_ref, ln2b_ref) = refs[:8]
    s1 = refs[8:8 + _N_STACK]                 # stream-1 per-layer weight refs
    s2 = refs[8 + _N_STACK:8 + 2 * _N_STACK]  # stream-2 per-layer weight refs
    o1_ref, o2_ref = refs[-2], refs[-1]       # resident across the layer axis

    layer = pl.program_id(0)

    # Layer 0 only: position encoding (broadcast over batch), dropout (id),
    # LayerNorm, nan -> 0.  Result is seeded into the resident output blocks,
    # which act as the carried activations for every subsequent layer.
    @pl.when(layer == 0)
    def _init():
        def prep(x_ref, pe_ref, g_ref, b_ref, S):
            x = x_ref[...].reshape(B, S, -1) + pe_ref[...][None, :, :]
            x = x.reshape(B * S, -1)
            x = _layernorm(x, g_ref[...], b_ref[...], eps)
            return jnp.where(jnp.isnan(x), 0.0, x)
        o1_ref[...] = prep(x1_ref, pe1_ref, ln1g_ref, ln1b_ref, S1)
        o2_ref[...] = prep(x2_ref, pe2_ref, ln2g_ref, ln2b_ref, S2)

    (wq1, bq1, wk1, bk1, wv1, bv1, wo1, bo1, g1, be1,
     w1a, b1a, w2a, b2a, fg1, fb1) = s1
    (wq2, bq2, wk2, bk2, wv2, bv2, wo2, bo2, g2, be2,
     w1b, b1b, w2b, b2b, fg2, fb2) = s2

    t1 = o1_ref[...]
    t2 = o2_ref[...]

    # stream 1: queries from stream1, keys/values from stream2
    a1 = _mha(t1, t2, wq1[...], bq1[...], wk1[...], bk1[...], wv1[...], bv1[...],
              wo1[...], bo1[...], g1[...], be1[...],
              B=B, Sq=S1, Sk=S2, H=n_head, dk=d_k, dv=d_v, eps=eps)
    n1 = _ffn(a1, w1a[...], b1a[...], w2a[...], b2a[...], fg1[...], fb1[...], eps)

    # stream 2: queries from stream2, keys/values from stream1
    a2 = _mha(t2, t1, wq2[...], bq2[...], wk2[...], bk2[...], wv2[...], bv2[...],
              wo2[...], bo2[...], g2[...], be2[...],
              B=B, Sq=S2, Sk=S1, H=n_head, dk=d_k, dv=d_v, eps=eps)
    n2 = _ffn(a2, w1b[...], b1b[...], w2b[...], b2b[...], fg2[...], fb2[...], eps)

    o1_ref[...] = n1
    o2_ref[...] = n2


# ----------------------------------------------------------------------------
# Host wrapper: grid over layers; weights streamed, activations resident
# ----------------------------------------------------------------------------
def encoder_forward(params, seq1, seq2, *, n_head, d_k, d_v, eps=1e-6):
    B, S1, D1 = seq1.shape
    _, S2, D2 = seq2.shape
    L = params["stack1"]["wq"].shape[0]

    x1 = seq1.reshape(B * S1, D1)
    x2 = seq2.reshape(B * S2, D2)
    pe1 = params["pe1"][:S1]                      # (S1, D1) — broadcast in-kernel
    pe2 = params["pe2"][:S2]                      # (S2, D2)

    inputs = [x1, x2, pe1, pe2,
              params["ln1_g"], params["ln1_b"],
              params["ln2_g"], params["ln2_b"]]
    inputs += [params["stack1"][k] for k in _STACK_KEYS]
    inputs += [params["stack2"][k] for k in _STACK_KEYS]

    def resident_spec(a):
        nd = a.ndim
        return pl.BlockSpec(a.shape, lambda l, _nd=nd: (0,) * _nd)

    def layer_spec(a):
        # Stacked (L, r, c) weights: stream one layer slice per grid step;
        # leading dim squeezed so the kernel sees (r, c).
        return pl.BlockSpec((None,) + a.shape[1:], lambda l: (l, 0, 0))

    in_specs = [resident_spec(a) for a in inputs[:8]]
    in_specs += [layer_spec(a) for a in inputs[8:]]

    out_specs = (pl.BlockSpec((B * S1, D1), lambda l: (0, 0)),
                 pl.BlockSpec((B * S2, D2), lambda l: (0, 0)))

    kernel = functools.partial(_encoder_kernel, n_head=n_head, d_k=d_k, d_v=d_v,
                               B=B, S1=S1, S2=S2, eps=eps)

    o1, o2 = pl.pallas_call(
        kernel,
        grid=(L,),
        out_shape=(jax.ShapeDtypeStruct((B * S1, D1), jnp.float32),
                   jax.ShapeDtypeStruct((B * S2, D2), jnp.float32)),
        in_specs=in_specs,
        out_specs=out_specs,
        compiler_params=pltpu.CompilerParams(
            dimension_semantics=("arbitrary",)),
    )(*inputs)

    return o1.reshape(B, S1, D1), o2.reshape(B, S2, D2)


# ----------------------------------------------------------------------------
# Parameter construction (deterministic, synthetic)
# ----------------------------------------------------------------------------
def make_stack_params(key, n_layers, d_q, d_kv, d_inner, n_head, d_k, d_v):
    Hk, Hv = n_head * d_k, n_head * d_v
    ks = jax.random.split(key, 6)
    s = 0.02
    q_scale = 1.0 / math.sqrt(d_k)   # folded into wq / bq (free at param time)
    bf = jnp.bfloat16
    return {
        "wq": (s * q_scale * jax.random.normal(ks[0], (n_layers, d_q, Hk),
                                               jnp.float32)).astype(bf),
        "bq": q_scale * jnp.zeros((n_layers, 1, Hk), jnp.float32),
        "wk": (s * jax.random.normal(ks[1], (n_layers, d_kv, Hk),
                                     jnp.float32)).astype(bf),
        "bk": jnp.zeros((n_layers, 1, Hk), jnp.float32),
        "wv": (s * jax.random.normal(ks[2], (n_layers, d_kv, Hv),
                                     jnp.float32)).astype(bf),
        "bv": jnp.zeros((n_layers, 1, Hv), jnp.float32),
        "wo": (s * jax.random.normal(ks[3], (n_layers, Hv, d_q),
                                     jnp.float32)).astype(bf),
        "bo": jnp.zeros((n_layers, 1, d_q), jnp.float32),
        "ln_g": jnp.ones((n_layers, 1, d_q), jnp.float32),
        "ln_b": jnp.zeros((n_layers, 1, d_q), jnp.float32),
        "w1": (s * jax.random.normal(ks[4], (n_layers, d_q, d_inner),
                                     jnp.float32)).astype(bf),
        "b1": jnp.zeros((n_layers, 1, d_inner), jnp.float32),
        "w2": (s * jax.random.normal(ks[5], (n_layers, d_inner, d_q),
                                     jnp.float32)).astype(bf),
        "b2": jnp.zeros((n_layers, 1, d_q), jnp.float32),
        "ffn_ln_g": jnp.ones((n_layers, 1, d_q), jnp.float32),
        "ffn_ln_b": jnp.zeros((n_layers, 1, d_q), jnp.float32),
    }


def make_encoder_params(key, d_emb_1, d_emb_2, n_layers, d_inner, n_head,
                        d_k, d_v, n_position=2048):
    k1, k2 = jax.random.split(key)
    return {
        "pe1": sinusoid_pos_table(n_position, d_emb_1),
        "pe2": sinusoid_pos_table(n_position, d_emb_2),
        "ln1_g": jnp.ones((1, d_emb_1), jnp.float32),
        "ln1_b": jnp.zeros((1, d_emb_1), jnp.float32),
        "ln2_g": jnp.ones((1, d_emb_2), jnp.float32),
        "ln2_b": jnp.zeros((1, d_emb_2), jnp.float32),
        "stack1": make_stack_params(k1, n_layers, d_emb_1, d_emb_2,
                                    d_inner, n_head, d_k, d_v),
        "stack2": make_stack_params(k2, n_layers, d_emb_2, d_emb_1,
                                    d_inner, n_head, d_k, d_v),
    }


# ----------------------------------------------------------------------------
if __name__ == "__main__":
    B, S = 2, 8
    D_EMB_1, D_EMB_2 = 32, 64
    N_LAYERS, D_INNER, N_HEAD = 2, 64, 4
    D_K = D_V = 16

    root = jax.random.PRNGKey(0)
    k_param, k_seq1, k_seq2 = jax.random.split(root, 3)

    params = make_encoder_params(k_param, D_EMB_1, D_EMB_2, N_LAYERS,
                                 D_INNER, N_HEAD, D_K, D_V, n_position=2048)

    seq1 = jax.random.normal(k_seq1, (B, S, D_EMB_1), jnp.float32)
    seq2 = jax.random.normal(k_seq2, (B, S, D_EMB_2), jnp.float32)

    out1, out2 = encoder_forward(params, seq1, seq2,
                                 n_head=N_HEAD, d_k=D_K, d_v=D_V)
    out1 = jax.block_until_ready(out1)
    out2 = jax.block_until_ready(out2)

    assert out1.shape == (B, S, D_EMB_1) and out2.shape == (B, S, D_EMB_2)
    assert bool(jnp.all(jnp.isfinite(out1))) and bool(jnp.all(jnp.isfinite(out2)))
    print("KERNEL_OK")
</pallas_src>

<mosaic_0001>
module attributes {stable_mosaic.version = 11 : i64} {
  func.func @_encoder_kernel(%arg0: i32, %arg1: memref<16x32xf32, #tpu.memory_space<vmem>>, %arg2: memref<16x64xf32, #tpu.memory_space<vmem>>, %arg3: memref<8x32xf32, #tpu.memory_space<vmem>>, %arg4: memref<8x64xf32, #tpu.memory_space<vmem>>, %arg5: memref<1x32xf32, #tpu.memory_space<vmem>>, %arg6: memref<1x32xf32, #tpu.memory_space<vmem>>, %arg7: memref<1x64xf32, #tpu.memory_space<vmem>>, %arg8: memref<1x64xf32, #tpu.memory_space<vmem>>, %arg9: memref<1x32x64xbf16, #tpu.memory_space<vmem>>, %arg10: memref<1x1x64xf32, #tpu.memory_space<vmem>>, %arg11: memref<1x64x64xbf16, #tpu.memory_space<vmem>>, %arg12: memref<1x1x64xf32, #tpu.memory_space<vmem>>, %arg13: memref<1x64x64xbf16, #tpu.memory_space<vmem>>, %arg14: memref<1x1x64xf32, #tpu.memory_space<vmem>>, %arg15: memref<1x64x32xbf16, #tpu.memory_space<vmem>>, %arg16: memref<1x1x32xf32, #tpu.memory_space<vmem>>, %arg17: memref<1x1x32xf32, #tpu.memory_space<vmem>>, %arg18: memref<1x1x32xf32, #tpu.memory_space<vmem>>, %arg19: memref<1x32x64xbf16, #tpu.memory_space<vmem>>, %arg20: memref<1x1x64xf32, #tpu.memory_space<vmem>>, %arg21: memref<1x64x32xbf16, #tpu.memory_space<vmem>>, %arg22: memref<1x1x32xf32, #tpu.memory_space<vmem>>, %arg23: memref<1x1x32xf32, #tpu.memory_space<vmem>>, %arg24: memref<1x1x32xf32, #tpu.memory_space<vmem>>, %arg25: memref<1x64x64xbf16, #tpu.memory_space<vmem>>, %arg26: memref<1x1x64xf32, #tpu.memory_space<vmem>>, %arg27: memref<1x32x64xbf16, #tpu.memory_space<vmem>>, %arg28: memref<1x1x64xf32, #tpu.memory_space<vmem>>, %arg29: memref<1x32x64xbf16, #tpu.memory_space<vmem>>, %arg30: memref<1x1x64xf32, #tpu.memory_space<vmem>>, %arg31: memref<1x64x64xbf16, #tpu.memory_space<vmem>>, %arg32: memref<1x1x64xf32, #tpu.memory_space<vmem>>, %arg33: memref<1x1x64xf32, #tpu.memory_space<vmem>>, %arg34: memref<1x1x64xf32, #tpu.memory_space<vmem>>, %arg35: memref<1x64x64xbf16, #tpu.memory_space<vmem>>, %arg36: memref<1x1x64xf32, #tpu.memory_space<vmem>>, %arg37: memref<1x64x64xbf16, #tpu.memory_space<vmem>>, %arg38: memref<1x1x64xf32, #tpu.memory_space<vmem>>, %arg39: memref<1x1x64xf32, #tpu.memory_space<vmem>>, %arg40: memref<1x1x64xf32, #tpu.memory_space<vmem>>, %arg41: memref<16x32xf32, #tpu.memory_space<vmem>>, %arg42: memref<16x64xf32, #tpu.memory_space<vmem>>) attributes {dimension_semantics = [#tpu.dimension_semantics<arbitrary>], iteration_bounds = array<i64: 2>, scalar_prefetch = 0 : i64, scratch_operands = 0 : i64, tpu.core_type = #tpu.core_type<tc>, window_params = [{pipeline_mode = #tpu.pipeline_mode<synchronous>, transform_indices = @transform_0, window_bounds = array<i64: 16, 32>}, {pipeline_mode = #tpu.pipeline_mode<synchronous>, transform_indices = @transform_1, window_bounds = array<i64: 16, 64>}, {pipeline_mode = #tpu.pipeline_mode<synchronous>, transform_indices = @transform_2, window_bounds = array<i64: 8, 32>}, {pipeline_mode = #tpu.pipeline_mode<synchronous>, transform_indices = @transform_3, window_bounds = array<i64: 8, 64>}, {pipeline_mode = #tpu.pipeline_mode<synchronous>, transform_indices = @transform_4, window_bounds = array<i64: 1, 32>}, {pipeline_mode = #tpu.pipeline_mode<synchronous>, transform_indices = @transform_5, window_bounds = array<i64: 1, 32>}, {pipeline_mode = #tpu.pipeline_mode<synchronous>, transform_indices = @transform_6, window_bounds = array<i64: 1, 64>}, {pipeline_mode = #tpu.pipeline_mode<synchronous>, transform_indices = @transform_7, window_bounds = array<i64: 1, 64>}, {transform_indices = @transform_8, window_bounds = array<i64: 1, 32, 64>}, {transform_indices = @transform_9, window_bounds = array<i64: 1, 1, 64>}, {transform_indices = @transform_10, window_bounds = array<i64: 1, 64, 64>}, {transform_indices = @transform_11, window_bounds = array<i64: 1, 1, 64>}, {transform_indices = @transform_12, window_bounds = array<i64: 1, 64, 64>}, {transform_indices = @transform_13, window_bounds = array<i64: 1, 1, 64>}, {transform_indices = @transform_14, window_bounds = array<i64: 1, 64, 32>}, {transform_indices = @transform_15, window_bounds = array<i64: 1, 1, 32>}, {transform_indices = @transform_16, window_bounds = array<i64: 1, 1, 32>}, {transform_indices = @transform_17, window_bounds = array<i64: 1, 1, 32>}, {transform_indices = @transform_18, window_bounds = array<i64: 1, 32, 64>}, {transform_indices = @transform_19, window_bounds = array<i64: 1, 1, 64>}, {transform_indices = @transform_20, window_bounds = array<i64: 1, 64, 32>}, {transform_indices = @transform_21, window_bounds = array<i64: 1, 1, 32>}, {transform_indices = @transform_22, window_bounds = array<i64: 1, 1, 32>}, {transform_indices = @transform_23, window_bounds = array<i64: 1, 1, 32>}, {transform_indices = @transform_24, window_bounds = array<i64: 1, 64, 64>}, {transform_indices = @transform_25, window_bounds = array<i64: 1, 1, 64>}, {transform_indices = @transform_26, window_bounds = array<i64: 1, 32, 64>}, {transform_indices = @transform_27, window_bounds = array<i64: 1, 1, 64>}, {transform_indices = @transform_28, window_bounds = array<i64: 1, 32, 64>}, {transform_indices = @transform_29, window_bounds = array<i64: 1, 1, 64>}, {transform_indices = @transform_30, window_bounds = array<i64: 1, 64, 64>}, {transform_indices = @transform_31, window_bounds = array<i64: 1, 1, 64>}, {transform_indices = @transform_32, window_bounds = array<i64: 1, 1, 64>}, {transform_indices = @transform_33, window_bounds = array<i64: 1, 1, 64>}, {transform_indices = @transform_34, window_bounds = array<i64: 1, 64, 64>}, {transform_indices = @transform_35, window_bounds = array<i64: 1, 1, 64>}, {transform_indices = @transform_36, window_bounds = array<i64: 1, 64, 64>}, {transform_indices = @transform_37, window_bounds = array<i64: 1, 1, 64>}, {transform_indices = @transform_38, window_bounds = array<i64: 1, 1, 64>}, {transform_indices = @transform_39, window_bounds = array<i64: 1, 1, 64>}, {pipeline_mode = #tpu.pipeline_mode<synchronous>, transform_indices = @transform_40, window_bounds = array<i64: 16, 32>}, {pipeline_mode = #tpu.pipeline_mode<synchronous>, transform_indices = @transform_41, window_bounds = array<i64: 16, 64>}]} {
    %c0_i32 = arith.constant 0 : i32
    %0 = arith.cmpi eq, %arg0, %c0_i32 : i32
    %1 = arith.extui %0 : i1 to i32
    %c0_i32_0 = arith.constant 0 : i32
    %2 = arith.cmpi ne, %1, %c0_i32_0 : i32
    scf.if %2 {
      %c0_169 = arith.constant 0 : index
      %c0_170 = arith.constant 0 : index
      %349 = vector.load %arg1[%c0_169, %c0_170] : memref<16x32xf32, #tpu.memory_space<vmem>>, vector<16x32xf32>
      %350 = vector.shape_cast %349 : vector<16x32xf32> to vector<2x8x32xf32>
      %c0_171 = arith.constant 0 : index
      %c0_172 = arith.constant 0 : index
      %351 = vector.load %arg3[%c0_171, %c0_172] : memref<8x32xf32, #tpu.memory_space<vmem>>, vector<8x32xf32>
      %352 = vector.shape_cast %351 : vector<8x32xf32> to vector<1x8x32xf32>
      %353 = vector.broadcast %352 : vector<1x8x32xf32> to vector<2x8x32xf32>
      %354 = arith.addf %350, %353 : vector<2x8x32xf32>
      %355 = vector.shape_cast %354 : vector<2x8x32xf32> to vector<16x32xf32>
      %c0_173 = arith.constant 0 : index
      %c0_174 = arith.constant 0 : index
      %356 = vector.load %arg5[%c0_173, %c0_174] : memref<1x32xf32, #tpu.memory_space<vmem>>, vector<1x32xf32>
      %c0_175 = arith.constant 0 : index
      %c0_176 = arith.constant 0 : index
      %357 = vector.load %arg6[%c0_175, %c0_176] : memref<1x32xf32, #tpu.memory_space<vmem>>, vector<1x32xf32>
      %cst_177 = arith.constant dense<0.000000e+00> : vector<16xf32>
      %358 = vector.multi_reduction <add>, %355, %cst_177 [1] : vector<16x32xf32> to vector<16xf32>
      %359 = vector.shape_cast %358 : vector<16xf32> to vector<16x1xf32>
      %cst_178 = arith.constant 3.200000e+01 : f32
      %360 = vector.broadcast %cst_178 : f32 to vector<16x1xf32>
      %361 = arith.divf %359, %360 : vector<16x1xf32>
      %362 = vector.broadcast %361 : vector<16x1xf32> to vector<16x32xf32>
      %363 = arith.subf %355, %362 : vector<16x32xf32>
      %364 = arith.mulf %363, %363 : vector<16x32xf32>
      %cst_179 = arith.constant dense<0.000000e+00> : vector<16xf32>
      %365 = vector.multi_reduction <add>, %364, %cst_179 [1] : vector<16x32xf32> to vector<16xf32>
      %366 = vector.shape_cast %365 : vector<16xf32> to vector<16x1xf32>
      %cst_180 = arith.constant 3.200000e+01 : f32
      %367 = vector.broadcast %cst_180 : f32 to vector<16x1xf32>
      %368 = arith.divf %366, %367 : vector<16x1xf32>
      %369 = vector.broadcast %361 : vector<16x1xf32> to vector<16x32xf32>
      %370 = arith.subf %355, %369 : vector<16x32xf32>
      %cst_181 = arith.constant 9.99999997E-7 : f32
      %371 = vector.broadcast %cst_181 : f32 to vector<16x1xf32>
      %372 = arith.addf %368, %371 : vector<16x1xf32>
      %373 = math.rsqrt %372 : vector<16x1xf32>
      %374 = vector.broadcast %373 : vector<16x1xf32> to vector<16x32xf32>
      %375 = arith.mulf %370, %374 : vector<16x32xf32>
      %376 = vector.broadcast %356 : vector<1x32xf32> to vector<16x32xf32>
      %377 = arith.mulf %375, %376 : vector<16x32xf32>
      %378 = vector.broadcast %357 : vector<1x32xf32> to vector<16x32xf32>
      %379 = arith.addf %377, %378 : vector<16x32xf32>
      %380 = arith.cmpf one, %379, %379 : vector<16x32xf32>
      %cst_182 = arith.constant 0.000000e+00 : f32
      %381 = vector.broadcast %cst_182 : f32 to vector<16x32xf32>
      %382 = arith.select %380, %381, %379 : vector<16x32xi1>, vector<16x32xf32>
      %c0_183 = arith.constant 0 : index
      %c0_184 = arith.constant 0 : index
      %383 = vector.load %arg41[%c0_183, %c0_184] : memref<16x32xf32, #tpu.memory_space<vmem>>, vector<16x32xf32>
      tpu.vector_store %arg41[%c0_183, %c0_184], %382 {strides = array<i32>} : memref<16x32xf32, #tpu.memory_space<vmem>>, vector<16x32xf32>,
      %c0_185 = arith.constant 0 : index
      %c0_186 = arith.constant 0 : index
      %384 = vector.load %arg2[%c0_185, %c0_186] : memref<16x64xf32, #tpu.memory_space<vmem>>, vector<16x64xf32>
      %385 = vector.shape_cast %384 : vector<16x64xf32> to vector<2x8x64xf32>
      %c0_187 = arith.constant 0 : index
      %c0_188 = arith.constant 0 : index
      %386 = vector.load %arg4[%c0_187, %c0_188] : memref<8x64xf32, #tpu.memory_space<vmem>>, vector<8x64xf32>
      %387 = vector.shape_cast %386 : vector<8x64xf32> to vector<1x8x64xf32>
      %388 = vector.broadcast %387 : vector<1x8x64xf32> to vector<2x8x64xf32>
      %389 = arith.addf %385, %388 : vector<2x8x64xf32>
      %390 = vector.shape_cast %389 : vector<2x8x64xf32> to vector<16x64xf32>
      %c0_189 = arith.constant 0 : index
      %c0_190 = arith.constant 0 : index
      %391 = vector.load %arg7[%c0_189, %c0_190] : memref<1x64xf32, #tpu.memory_space<vmem>>, vector<1x64xf32>
      %c0_191 = arith.constant 0 : index
      %c0_192 = arith.constant 0 : index
      %392 = vector.load %arg8[%c0_191, %c0_192] : memref<1x64xf32, #tpu.memory_space<vmem>>, vector<1x64xf32>
      %cst_193 = arith.constant dense<0.000000e+00> : vector<16xf32>
      %393 = vector.multi_reduction <add>, %390, %cst_193 [1] : vector<16x64xf32> to vector<16xf32>
      %394 = vector.shape_cast %393 : vector<16xf32> to vector<16x1xf32>
      %cst_194 = arith.constant 6.400000e+01 : f32
      %395 = vector.broadcast %cst_194 : f32 to vector<16x1xf32>
      %396 = arith.divf %394, %395 : vector<16x1xf32>
      %397 = vector.broadcast %396 : vector<16x1xf32> to vector<16x64xf32>
      %398 = arith.subf %390, %397 : vector<16x64xf32>
      %399 = arith.mulf %398, %398 : vector<16x64xf32>
      %cst_195 = arith.constant dense<0.000000e+00> : vector<16xf32>
      %400 = vector.multi_reduction <add>, %399, %cst_195 [1] : vector<16x64xf32> to vector<16xf32>
      %401 = vector.shape_cast %400 : vector<16xf32> to vector<16x1xf32>
      %cst_196 = arith.constant 6.400000e+01 : f32
      %402 = vector.broadcast %cst_196 : f32 to vector<16x1xf32>
      %403 = arith.divf %401, %402 : vector<16x1xf32>
      %404 = vector.broadcast %396 : vector<16x1xf32> to vector<16x64xf32>
      %405 = arith.subf %390, %404 : vector<16x64xf32>
      %cst_197 = arith.constant 9.99999997E-7 : f32
      %406 = vector.broadcast %cst_197 : f32 to vector<16x1xf32>
      %407 = arith.addf %403, %406 : vector<16x1xf32>
      %408 = math.rsqrt %407 : vector<16x1xf32>
      %409 = vector.broadcast %408 : vector<16x1xf32> to vector<16x64xf32>
      %410 = arith.mulf %405, %409 : vector<16x64xf32>
      %411 = vector.broadcast %391 : vector<1x64xf32> to vector<16x64xf32>
      %412 = arith.mulf %410, %411 : vector<16x64xf32>
      %413 = vector.broadcast %392 : vector<1x64xf32> to vector<16x64xf32>
      %414 = arith.addf %412, %413 : vector<16x64xf32>
      %415 = arith.cmpf one, %414, %414 : vector<16x64xf32>
      %cst_198 = arith.constant 0.000000e+00 : f32
      %416 = vector.broadcast %cst_198 : f32 to vector<16x64xf32>
      %417 = arith.select %415, %416, %414 : vector<16x64xi1>, vector<16x64xf32>
      %c0_199 = arith.constant 0 : index
      %c0_200 = arith.constant 0 : index
      %418 = vector.load %arg42[%c0_199, %c0_200] : memref<16x64xf32, #tpu.memory_space<vmem>>, vector<16x64xf32>
      tpu.vector_store %arg42[%c0_199, %c0_200], %417 {strides = array<i32>} : memref<16x64xf32, #tpu.memory_space<vmem>>, vector<16x64xf32>,
    } else {
    }
    %c0 = arith.constant 0 : index
    %c0_1 = arith.constant 0 : index
    %3 = vector.load %arg41[%c0, %c0_1] : memref<16x32xf32, #tpu.memory_space<vmem>>, vector<16x32xf32>
    %c0_2 = arith.constant 0 : index
    %c0_3 = arith.constant 0 : index
    %4 = vector.load %arg42[%c0_2, %c0_3] : memref<16x64xf32, #tpu.memory_space<vmem>>, vector<16x64xf32>
    %c0_4 = arith.constant 0 : index
    %c0_5 = arith.constant 0 : index
    %c0_6 = arith.constant 0 : index
    %5 = vector.load %arg9[%c0_4, %c0_5, %c0_6] : memref<1x32x64xbf16, #tpu.memory_space<vmem>>, vector<1x32x64xbf16>
    %6 = vector.shape_cast %5 : vector<1x32x64xbf16> to vector<32x64xbf16>
    %c0_7 = arith.constant 0 : index
    %c0_8 = arith.constant 0 : index
    %c0_9 = arith.constant 0 : index
    %7 = vector.load %arg10[%c0_7, %c0_8, %c0_9] : memref<1x1x64xf32, #tpu.memory_space<vmem>>, vector<1x1x64xf32>
    %8 = vector.shape_cast %7 : vector<1x1x64xf32> to vector<1x64xf32>
    %c0_10 = arith.constant 0 : index
    %c0_11 = arith.constant 0 : index
    %c0_12 = arith.constant 0 : index
    %9 = vector.load %arg11[%c0_10, %c0_11, %c0_12] : memref<1x64x64xbf16, #tpu.memory_space<vmem>>, vector<1x64x64xbf16>
    %10 = vector.shape_cast %9 : vector<1x64x64xbf16> to vector<64x64xbf16>
    %c0_13 = arith.constant 0 : index
    %c0_14 = arith.constant 0 : index
    %c0_15 = arith.constant 0 : index
    %11 = vector.load %arg12[%c0_13, %c0_14, %c0_15] : memref<1x1x64xf32, #tpu.memory_space<vmem>>, vector<1x1x64xf32>
    %12 = vector.shape_cast %11 : vector<1x1x64xf32> to vector<1x64xf32>
    %c0_16 = arith.constant 0 : index
    %c0_17 = arith.constant 0 : index
    %c0_18 = arith.constant 0 : index
    %13 = vector.load %arg13[%c0_16, %c0_17, %c0_18] : memref<1x64x64xbf16, #tpu.memory_space<vmem>>, vector<1x64x64xbf16>
    %14 = vector.shape_cast %13 : vector<1x64x64xbf16> to vector<64x64xbf16>
    %c0_19 = arith.constant 0 : index
    %c0_20 = arith.constant 0 : index
    %c0_21 = arith.constant 0 : index
    %15 = vector.load %arg14[%c0_19, %c0_20, %c0_21] : memref<1x1x64xf32, #tpu.memory_space<vmem>>, vector<1x1x64xf32>
    %16 = vector.shape_cast %15 : vector<1x1x64xf32> to vector<1x64xf32>
    %c0_22 = arith.constant 0 : index
    %c0_23 = arith.constant 0 : index
    %c0_24 = arith.constant 0 : index
    %17 = vector.load %arg15[%c0_22, %c0_23, %c0_24] : memref<1x64x32xbf16, #tpu.memory_space<vmem>>, vector<1x64x32xbf16>
    %18 = vector.shape_cast %17 : vector<1x64x32xbf16> to vector<64x32xbf16>
    %c0_25 = arith.constant 0 : index
    %c0_26 = arith.constant 0 : index
    %c0_27 = arith.constant 0 : index
    %19 = vector.load %arg16[%c0_25, %c0_26, %c0_27] : memref<1x1x32xf32, #tpu.memory_space<vmem>>, vector<1x1x32xf32>
    %20 = vector.shape_cast %19 : vector<1x1x32xf32> to vector<1x32xf32>
    %c0_28 = arith.constant 0 : index
    %c0_29 = arith.constant 0 : index
    %c0_30 = arith.constant 0 : index
    %21 = vector.load %arg17[%c0_28, %c0_29, %c0_30] : memref<1x1x32xf32, #tpu.memory_space<vmem>>, vector<1x1x32xf32>
    %22 = vector.shape_cast %21 : vector<1x1x32xf32> to vector<1x32xf32>
    %c0_31 = arith.constant 0 : index
    %c0_32 = arith.constant 0 : index
    %c0_33 = arith.constant 0 : index
    %23 = vector.load %arg18[%c0_31, %c0_32, %c0_33] : memref<1x1x32xf32, #tpu.memory_space<vmem>>, vector<1x1x32xf32>
    %24 = vector.shape_cast %23 : vector<1x1x32xf32> to vector<1x32xf32>
    %25 = arith.truncf %3 : vector<16x32xf32> to vector<16x32xbf16>
    %26 = arith.truncf %4 : vector<16x64xf32> to vector<16x64xbf16>
    %cst = arith.constant dense<0.000000e+00> : vector<16x64xf32>
    %27 = tpu.matmul %25, %6, %cst {dimension_numbers = #tpu.dot_dimension_numbers<[1], [0], [0], [1], [0, 0, 1, 1], [], []>} : vector<16x32xbf16>, vector<32x64xbf16>, vector<16x64xf32> -> vector<16x64xf32>
    %28 = vector.broadcast %8 : vector<1x64xf32> to vector<16x64xf32>
    %29 = arith.addf %27, %28 : vector<16x64xf32>
    %cst_34 = arith.constant dense<0.000000e+00> : vector<16x64xf32>
    %30 = tpu.matmul %26, %10, %cst_34 {dimension_numbers = #tpu.dot_dimension_numbers<[1], [0], [0], [1], [0, 0, 1, 1], [], []>} : vector<16x64xbf16>, vector<64x64xbf16>, vector<16x64xf32> -> vector<16x64xf32>
    %31 = vector.broadcast %12 : vector<1x64xf32> to vector<16x64xf32>
    %32 = arith.addf %30, %31 : vector<16x64xf32>
    %cst_35 = arith.constant dense<0.000000e+00> : vector<16x64xf32>
    %33 = tpu.matmul %26, %14, %cst_35 {dimension_numbers = #tpu.dot_dimension_numbers<[1], [0], [0], [1], [0, 0, 1, 1], [], []>} : vector<16x64xbf16>, vector<64x64xbf16>, vector<16x64xf32> -> vector<16x64xf32>
    %34 = vector.broadcast %16 : vector<1x64xf32> to vector<16x64xf32>
    %35 = arith.addf %33, %34 : vector<16x64xf32>
    %36 = vector.shape_cast %29 : vector<16x64xf32> to vector<2x8x64xf32>
    %37 = arith.truncf %36 : vector<2x8x64xf32> to vector<2x8x64xbf16>
    %38 = vector.shape_cast %32 : vector<16x64xf32> to vector<2x8x64xf32>
    %39 = arith.truncf %38 : vector<2x8x64xf32> to vector<2x8x64xbf16>
    %40 = vector.shape_cast %35 : vector<16x64xf32> to vector<2x8x64xf32>
    %41 = arith.truncf %40 : vector<2x8x64xf32> to vector<2x8x64xbf16>
    %42 = vector.extract_strided_slice %37 {offsets = [0, 0, 0], sizes = [2, 8, 16], strides = [1, 1, 1]} : vector<2x8x64xbf16> to vector<2x8x16xbf16>
    %43 = vector.extract_strided_slice %39 {offsets = [0, 0, 0], sizes = [2, 8, 16], strides = [1, 1, 1]} : vector<2x8x64xbf16> to vector<2x8x16xbf16>
    %44 = vector.extract_strided_slice %41 {offsets = [0, 0, 0], sizes = [2, 8, 16], strides = [1, 1, 1]} : vector<2x8x64xbf16> to vector<2x8x16xbf16>
    "tpu.trace_start"() <{level = 10 : i32, message = "bqd,bkd->bqk"}> : () -> ()
    %cst_36 = arith.constant dense<0.000000e+00> : vector<2x8x8xf32>
    %45 = tpu.matmul %42, %43, %cst_36 {dimension_numbers = #tpu.dot_dimension_numbers<[2], [2], [1], [1], [0, 0, 0, 1, 1, 1], [0], [0]>} : vector<2x8x16xbf16>, vector<2x8x16xbf16>, vector<2x8x8xf32> -> vector<2x8x8xf32>
    "tpu.trace_stop"() : () -> ()
    %cst_37 = arith.constant dense<0xFF800000> : vector<2x8xf32>
    %46 = vector.multi_reduction <maximumf>, %45, %cst_37 [2] : vector<2x8x8xf32> to vector<2x8xf32>
    %47 = vector.shape_cast %46 : vector<2x8xf32> to vector<2x8x1xf32>
    %48 = vector.broadcast %47 : vector<2x8x1xf32> to vector<2x8x8xf32>
    %49 = arith.subf %45, %48 : vector<2x8x8xf32>
    %50 = math.exp %49 : vector<2x8x8xf32>
    %cst_38 = arith.constant dense<0.000000e+00> : vector<2x8xf32>
    %51 = vector.multi_reduction <add>, %50, %cst_38 [2] : vector<2x8x8xf32> to vector<2x8xf32>
    %52 = vector.shape_cast %51 : vector<2x8xf32> to vector<2x8x1xf32>
    %53 = vector.broadcast %52 : vector<2x8x1xf32> to vector<2x8x8xf32>
    %54 = arith.divf %50, %53 : vector<2x8x8xf32>
    %55 = arith.truncf %54 : vector<2x8x8xf32> to vector<2x8x8xbf16>
    "tpu.trace_start"() <{level = 10 : i32, message = "bqk,bkd->bqd"}> : () -> ()
    %cst_39 = arith.constant dense<0.000000e+00> : vector<2x8x16xf32>
    %56 = tpu.matmul %55, %44, %cst_39 {dimension_numbers = #tpu.dot_dimension_numbers<[2], [1], [1], [2], [0, 0, 0, 1, 1, 2], [0], [0]>} : vector<2x8x8xbf16>, vector<2x8x16xbf16>, vector<2x8x16xf32> -> vector<2x8x16xf32>
    "tpu.trace_stop"() : () -> ()
    %57 = vector.extract_strided_slice %37 {offsets = [0, 0, 16], sizes = [2, 8, 16], strides = [1, 1, 1]} : vector<2x8x64xbf16> to vector<2x8x16xbf16>
    %58 = vector.extract_strided_slice %39 {offsets = [0, 0, 16], sizes = [2, 8, 16], strides = [1, 1, 1]} : vector<2x8x64xbf16> to vector<2x8x16xbf16>
    %59 = vector.extract_strided_slice %41 {offsets = [0, 0, 16], sizes = [2, 8, 16], strides = [1, 1, 1]} : vector<2x8x64xbf16> to vector<2x8x16xbf16>
    "tpu.trace_start"() <{level = 10 : i32, message = "bqd,bkd->bqk"}> : () -> ()
    %cst_40 = arith.constant dense<0.000000e+00> : vector<2x8x8xf32>
    %60 = tpu.matmul %57, %58, %cst_40 {dimension_numbers = #tpu.dot_dimension_numbers<[2], [2], [1], [1], [0, 0, 0, 1, 1, 1], [0], [0]>} : vector<2x8x16xbf16>, vector<2x8x16xbf16>, vector<2x8x8xf32> -> vector<2x8x8xf32>
    "tpu.trace_stop"() : () -> ()
    %cst_41 = arith.constant dense<0xFF800000> : vector<2x8xf32>
    %61 = vector.multi_reduction <maximumf>, %60, %cst_41 [2] : vector<2x8x8xf32> to vector<2x8xf32>
    %62 = vector.shape_cast %61 : vector<2x8xf32> to vector<2x8x1xf32>
    %63 = vector.broadcast %62 : vector<2x8x1xf32> to vector<2x8x8xf32>
    %64 = arith.subf %60, %63 : vector<2x8x8xf32>
    %65 = math.exp %64 : vector<2x8x8xf32>
    %cst_42 = arith.constant dense<0.000000e+00> : vector<2x8xf32>
    %66 = vector.multi_reduction <add>, %65, %cst_42 [2] : vector<2x8x8xf32> to vector<2x8xf32>
    %67 = vector.shape_cast %66 : vector<2x8xf32> to vector<2x8x1xf32>
    %68 = vector.broadcast %67 : vector<2x8x1xf32> to vector<2x8x8xf32>
    %69 = arith.divf %65, %68 : vector<2x8x8xf32>
    %70 = arith.truncf %69 : vector<2x8x8xf32> to vector<2x8x8xbf16>
    "tpu.trace_start"() <{level = 10 : i32, message = "bqk,bkd->bqd"}> : () -> ()
    %cst_43 = arith.constant dense<0.000000e+00> : vector<2x8x16xf32>
    %71 = tpu.matmul %70, %59, %cst_43 {dimension_numbers = #tpu.dot_dimension_numbers<[2], [1], [1], [2], [0, 0, 0, 1, 1, 2], [0], [0]>} : vector<2x8x8xbf16>, vector<2x8x16xbf16>, vector<2x8x16xf32> -> vector<2x8x16xf32>
    "tpu.trace_stop"() : () -> ()
    %72 = vector.extract_strided_slice %37 {offsets = [0, 0, 32], sizes = [2, 8, 16], strides = [1, 1, 1]} : vector<2x8x64xbf16> to vector<2x8x16xbf16>
    %73 = vector.extract_strided_slice %39 {offsets = [0, 0, 32], sizes = [2, 8, 16], strides = [1, 1, 1]} : vector<2x8x64xbf16> to vector<2x8x16xbf16>
    %74 = vector.extract_strided_slice %41 {offsets = [0, 0, 32], sizes = [2, 8, 16], strides = [1, 1, 1]} : vector<2x8x64xbf16> to vector<2x8x16xbf16>
    "tpu.trace_start"() <{level = 10 : i32, message = "bqd,bkd->bqk"}> : () -> ()
    %cst_44 = arith.constant dense<0.000000e+00> : vector<2x8x8xf32>
    %75 = tpu.matmul %72, %73, %cst_44 {dimension_numbers = #tpu.dot_dimension_numbers<[2], [2], [1], [1], [0, 0, 0, 1, 1, 1], [0], [0]>} : vector<2x8x16xbf16>, vector<2x8x16xbf16>, vector<2x8x8xf32> -> vector<2x8x8xf32>
    "tpu.trace_stop"() : () -> ()
    %cst_45 = arith.constant dense<0xFF800000> : vector<2x8xf32>
    %76 = vector.multi_reduction <maximumf>, %75, %cst_45 [2] : vector<2x8x8xf32> to vector<2x8xf32>
    %77 = vector.shape_cast %76 : vector<2x8xf32> to vector<2x8x1xf32>
    %78 = vector.broadcast %77 : vector<2x8x1xf32> to vector<2x8x8xf32>
    %79 = arith.subf %75, %78 : vector<2x8x8xf32>
    %80 = math.exp %79 : vector<2x8x8xf32>
    %cst_46 = arith.constant dense<0.000000e+00> : vector<2x8xf32>
    %81 = vector.multi_reduction <add>, %80, %cst_46 [2] : vector<2x8x8xf32> to vector<2x8xf32>
    %82 = vector.shape_cast %81 : vector<2x8xf32> to vector<2x8x1xf32>
    %83 = vector.broadcast %82 : vector<2x8x1xf32> to vector<2x8x8xf32>
    %84 = arith.divf %80, %83 : vector<2x8x8xf32>
    %85 = arith.truncf %84 : vector<2x8x8xf32> to vector<2x8x8xbf16>
    "tpu.trace_start"() <{level = 10 : i32, message = "bqk,bkd->bqd"}> : () -> ()
    %cst_47 = arith.constant dense<0.000000e+00> : vector<2x8x16xf32>
    %86 = tpu.matmul %85, %74, %cst_47 {dimension_numbers = #tpu.dot_dimension_numbers<[2], [1], [1], [2], [0, 0, 0, 1, 1, 2], [0], [0]>} : vector<2x8x8xbf16>, vector<2x8x16xbf16>, vector<2x8x16xf32> -> vector<2x8x16xf32>
    "tpu.trace_stop"() : () -> ()
    %87 = vector.extract_strided_slice %37 {offsets = [0, 0, 48], sizes = [2, 8, 16], strides = [1, 1, 1]} : vector<2x8x64xbf16> to vector<2x8x16xbf16>
    %88 = vector.extract_strided_slice %39 {offsets = [0, 0, 48], sizes = [2, 8, 16], strides = [1, 1, 1]} : vector<2x8x64xbf16> to vector<2x8x16xbf16>
    %89 = vector.extract_strided_slice %41 {offsets = [0, 0, 48], sizes = [2, 8, 16], strides = [1, 1, 1]} : vector<2x8x64xbf16> to vector<2x8x16xbf16>
    "tpu.trace_start"() <{level = 10 : i32, message = "bqd,bkd->bqk"}> : () -> ()
    %cst_48 = arith.constant dense<0.000000e+00> : vector<2x8x8xf32>
    %90 = tpu.matmul %87, %88, %cst_48 {dimension_numbers = #tpu.dot_dimension_numbers<[2], [2], [1], [1], [0, 0, 0, 1, 1, 1], [0], [0]>} : vector<2x8x16xbf16>, vector<2x8x16xbf16>, vector<2x8x8xf32> -> vector<2x8x8xf32>
    "tpu.trace_stop"() : () -> ()
    %cst_49 = arith.constant dense<0xFF800000> : vector<2x8xf32>
    %91 = vector.multi_reduction <maximumf>, %90, %cst_49 [2] : vector<2x8x8xf32> to vector<2x8xf32>
    %92 = vector.shape_cast %91 : vector<2x8xf32> to vector<2x8x1xf32>
    %93 = vector.broadcast %92 : vector<2x8x1xf32> to vector<2x8x8xf32>
    %94 = arith.subf %90, %93 : vector<2x8x8xf32>
    %95 = math.exp %94 : vector<2x8x8xf32>
    %cst_50 = arith.constant dense<0.000000e+00> : vector<2x8xf32>
    %96 = vector.multi_reduction <add>, %95, %cst_50 [2] : vector<2x8x8xf32> to vector<2x8xf32>
    %97 = vector.shape_cast %96 : vector<2x8xf32> to vector<2x8x1xf32>
    %98 = vector.broadcast %97 : vector<2x8x1xf32> to vector<2x8x8xf32>
    %99 = arith.divf %95, %98 : vector<2x8x8xf32>
    %100 = arith.truncf %99 : vector<2x8x8xf32> to vector<2x8x8xbf16>
    "tpu.trace_start"() <{level = 10 : i32, message = "bqk,bkd->bqd"}> : () -> ()
    %cst_51 = arith.constant dense<0.000000e+00> : vector<2x8x16xf32>
    %101 = tpu.matmul %100, %89, %cst_51 {dimension_numbers = #tpu.dot_dimension_numbers<[2], [1], [1], [2], [0, 0, 0, 1, 1, 2], [0], [0]>} : vector<2x8x8xbf16>, vector<2x8x16xbf16>, vector<2x8x16xf32> -> vector<2x8x16xf32>
    "tpu.trace_stop"() : () -> ()
    %102 = tpu.concatenate %56, %71, %86, %101 in 2 : vector<2x8x16xf32>, vector<2x8x16xf32>, vector<2x8x16xf32>, vector<2x8x16xf32> -> vector<2x8x64xf32>
    %103 = vector.shape_cast %102 : vector<2x8x64xf32> to vector<16x64xf32>
    %104 = arith.truncf %103 : vector<16x64xf32> to vector<16x64xbf16>
    %cst_52 = arith.constant dense<0.000000e+00> : vector<16x32xf32>
    %105 = tpu.matmul %104, %18, %cst_52 {dimension_numbers = #tpu.dot_dimension_numbers<[1], [0], [0], [1], [0, 0, 1, 1], [], []>} : vector<16x64xbf16>, vector<64x32xbf16>, vector<16x32xf32> -> vector<16x32xf32>
    %106 = vector.broadcast %20 : vector<1x32xf32> to vector<16x32xf32>
    %107 = arith.addf %105, %106 : vector<16x32xf32>
    %108 = arith.addf %3, %107 : vector<16x32xf32>
    %cst_53 = arith.constant dense<0.000000e+00> : vector<16xf32>
    %109 = vector.multi_reduction <add>, %108, %cst_53 [1] : vector<16x32xf32> to vector<16xf32>
    %110 = vector.shape_cast %109 : vector<16xf32> to vector<16x1xf32>
    %cst_54 = arith.constant 3.200000e+01 : f32
    %111 = vector.broadcast %cst_54 : f32 to vector<16x1xf32>
    %112 = arith.divf %110, %111 : vector<16x1xf32>
    %113 = vector.broadcast %112 : vector<16x1xf32> to vector<16x32xf32>
    %114 = arith.subf %108, %113 : vector<16x32xf32>
    %115 = arith.mulf %114, %114 : vector<16x32xf32>
    %cst_55 = arith.constant dense<0.000000e+00> : vector<16xf32>
    %116 = vector.multi_reduction <add>, %115, %cst_55 [1] : vector<16x32xf32> to vector<16xf32>
    %117 = vector.shape_cast %116 : vector<16xf32> to vector<16x1xf32>
    %cst_56 = arith.constant 3.200000e+01 : f32
    %118 = vector.broadcast %cst_56 : f32 to vector<16x1xf32>
    %119 = arith.divf %117, %118 : vector<16x1xf32>
    %120 = vector.broadcast %112 : vector<16x1xf32> to vector<16x32xf32>
    %121 = arith.subf %108, %120 : vector<16x32xf32>
    %cst_57 = arith.constant 9.99999997E-7 : f32
    %122 = vector.broadcast %cst_57 : f32 to vector<16x1xf32>
    %123 = arith.addf %119, %122 : vector<16x1xf32>
    %124 = math.rsqrt %123 : vector<16x1xf32>
    %125 = vector.broadcast %124 : vector<16x1xf32> to vector<16x32xf32>
    %126 = arith.mulf %121, %125 : vector<16x32xf32>
    %127 = vector.broadcast %22 : vector<1x32xf32> to vector<16x32xf32>
    %128 = arith.mulf %126, %127 : vector<16x32xf32>
    %129 = vector.broadcast %24 : vector<1x32xf32> to vector<16x32xf32>
    %130 = arith.addf %128, %129 : vector<16x32xf32>
    %c0_58 = arith.constant 0 : index
    %c0_59 = arith.constant 0 : index
    %c0_60 = arith.constant 0 : index
    %131 = vector.load %arg19[%c0_58, %c0_59, %c0_60] : memref<1x32x64xbf16, #tpu.memory_space<vmem>>, vector<1x32x64xbf16>
    %132 = vector.shape_cast %131 : vector<1x32x64xbf16> to vector<32x64xbf16>
    %c0_61 = arith.constant 0 : index
    %c0_62 = arith.constant 0 : index
    %c0_63 = arith.constant 0 : index
    %133 = vector.load %arg20[%c0_61, %c0_62, %c0_63] : memref<1x1x64xf32, #tpu.memory_space<vmem>>, vector<1x1x64xf32>
    %134 = vector.shape_cast %133 : vector<1x1x64xf32> to vector<1x64xf32>
    %c0_64 = arith.constant 0 : index
    %c0_65 = arith.constant 0 : index
    %c0_66 = arith.constant 0 : index
    %135 = vector.load %arg21[%c0_64, %c0_65, %c0_66] : memref<1x64x32xbf16, #tpu.memory_space<vmem>>, vector<1x64x32xbf16>
    %136 = vector.shape_cast %135 : vector<1x64x32xbf16> to vector<64x32xbf16>
    %c0_67 = arith.constant 0 : index
    %c0_68 = arith.constant 0 : index
    %c0_69 = arith.constant 0 : index
    %137 = vector.load %arg22[%c0_67, %c0_68, %c0_69] : memref<1x1x32xf32, #tpu.memory_space<vmem>>, vector<1x1x32xf32>
    %138 = vector.shape_cast %137 : vector<1x1x32xf32> to vector<1x32xf32>
    %c0_70 = arith.constant 0 : index
    %c0_71 = arith.constant 0 : index
    %c0_72 = arith.constant 0 : index
    %139 = vector.load %arg23[%c0_70, %c0_71, %c0_72] : memref<1x1x32xf32, #tpu.memory_space<vmem>>, vector<1x1x32xf32>
    %140 = vector.shape_cast %139 : vector<1x1x32xf32> to vector<1x32xf32>
    %c0_73 = arith.constant 0 : index
    %c0_74 = arith.constant 0 : index
    %c0_75 = arith.constant 0 : index
    %141 = vector.load %arg24[%c0_73, %c0_74, %c0_75] : memref<1x1x32xf32, #tpu.memory_space<vmem>>, vector<1x1x32xf32>
    %142 = vector.shape_cast %141 : vector<1x1x32xf32> to vector<1x32xf32>
    %143 = arith.truncf %130 : vector<16x32xf32> to vector<16x32xbf16>
    %cst_76 = arith.constant dense<0.000000e+00> : vector<16x64xf32>
    %144 = tpu.matmul %143, %132, %cst_76 {dimension_numbers = #tpu.dot_dimension_numbers<[1], [0], [0], [1], [0, 0, 1, 1], [], []>} : vector<16x32xbf16>, vector<32x64xbf16>, vector<16x64xf32> -> vector<16x64xf32>
    %145 = vector.broadcast %134 : vector<1x64xf32> to vector<16x64xf32>
    %146 = arith.addf %144, %145 : vector<16x64xf32>
    %cst_77 = arith.constant 0.000000e+00 : f32
    %147 = vector.broadcast %cst_77 : f32 to vector<16x64xf32>
    %148 = arith.maximumf %146, %147 : vector<16x64xf32>
    %149 = arith.truncf %148 : vector<16x64xf32> to vector<16x64xbf16>
    %cst_78 = arith.constant dense<0.000000e+00> : vector<16x32xf32>
    %150 = tpu.matmul %149, %136, %cst_78 {dimension_numbers = #tpu.dot_dimension_numbers<[1], [0], [0], [1], [0, 0, 1, 1], [], []>} : vector<16x64xbf16>, vector<64x32xbf16>, vector<16x32xf32> -> vector<16x32xf32>
    %151 = vector.broadcast %138 : vector<1x32xf32> to vector<16x32xf32>
    %152 = arith.addf %150, %151 : vector<16x32xf32>
    %153 = arith.addf %130, %152 : vector<16x32xf32>
    %cst_79 = arith.constant dense<0.000000e+00> : vector<16xf32>
    %154 = vector.multi_reduction <add>, %153, %cst_79 [1] : vector<16x32xf32> to vector<16xf32>
    %155 = vector.shape_cast %154 : vector<16xf32> to vector<16x1xf32>
    %cst_80 = arith.constant 3.200000e+01 : f32
    %156 = vector.broadcast %cst_80 : f32 to vector<16x1xf32>
    %157 = arith.divf %155, %156 : vector<16x1xf32>
    %158 = vector.broadcast %157 : vector<16x1xf32> to vector<16x32xf32>
    %159 = arith.subf %153, %158 : vector<16x32xf32>
    %160 = arith.mulf %159, %159 : vector<16x32xf32>
    %cst_81 = arith.constant dense<0.000000e+00> : vector<16xf32>
    %161 = vector.multi_reduction <add>, %160, %cst_81 [1] : vector<16x32xf32> to vector<16xf32>
    %162 = vector.shape_cast %161 : vector<16xf32> to vector<16x1xf32>
    %cst_82 = arith.constant 3.200000e+01 : f32
    %163 = vector.broadcast %cst_82 : f32 to vector<16x1xf32>
    %164 = arith.divf %162, %163 : vector<16x1xf32>
    %165 = vector.broadcast %157 : vector<16x1xf32> to vector<16x32xf32>
    %166 = arith.subf %153, %165 : vector<16x32xf32>
    %cst_83 = arith.constant 9.99999997E-7 : f32
    %167 = vector.broadcast %cst_83 : f32 to vector<16x1xf32>
    %168 = arith.addf %164, %167 : vector<16x1xf32>
    %169 = math.rsqrt %168 : vector<16x1xf32>
    %170 = vector.broadcast %169 : vector<16x1xf32> to vector<16x32xf32>
    %171 = arith.mulf %166, %170 : vector<16x32xf32>
    %172 = vector.broadcast %140 : vector<1x32xf32> to vector<16x32xf32>
    %173 = arith.mulf %171, %172 : vector<16x32xf32>
    %174 = vector.broadcast %142 : vector<1x32xf32> to vector<16x32xf32>
    %175 = arith.addf %173, %174 : vector<16x32xf32>
    %c0_84 = arith.constant 0 : index
    %c0_85 = arith.constant 0 : index
    %c0_86 = arith.constant 0 : index
    %176 = vector.load %arg25[%c0_84, %c0_85, %c0_86] : memref<1x64x64xbf16, #tpu.memory_space<vmem>>, vector<1x64x64xbf16>
    %177 = vector.shape_cast %176 : vector<1x64x64xbf16> to vector<64x64xbf16>
    %c0_87 = arith.constant 0 : index
    %c0_88 = arith.constant 0 : index
    %c0_89 = arith.constant 0 : index
    %178 = vector.load %arg26[%c0_87, %c0_88, %c0_89] : memref<1x1x64xf32, #tpu.memory_space<vmem>>, vector<1x1x64xf32>
    %179 = vector.shape_cast %178 : vector<1x1x64xf32> to vector<1x64xf32>
    %c0_90 = arith.constant 0 : index
    %c0_91 = arith.constant 0 : index
    %c0_92 = arith.constant 0 : index
    %180 = vector.load %arg27[%c0_90, %c0_91, %c0_92] : memref<1x32x64xbf16, #tpu.memory_space<vmem>>, vector<1x32x64xbf16>
    %181 = vector.shape_cast %180 : vector<1x32x64xbf16> to vector<32x64xbf16>
    %c0_93 = arith.constant 0 : index
    %c0_94 = arith.constant 0 : index
    %c0_95 = arith.constant 0 : index
    %182 = vector.load %arg28[%c0_93, %c0_94, %c0_95] : memref<1x1x64xf32, #tpu.memory_space<vmem>>, vector<1x1x64xf32>
    %183 = vector.shape_cast %182 : vector<1x1x64xf32> to vector<1x64xf32>
    %c0_96 = arith.constant 0 : index
    %c0_97 = arith.constant 0 : index
    %c0_98 = arith.constant 0 : index
    %184 = vector.load %arg29[%c0_96, %c0_97, %c0_98] : memref<1x32x64xbf16, #tpu.memory_space<vmem>>, vector<1x32x64xbf16>
    %185 = vector.shape_cast %184 : vector<1x32x64xbf16> to vector<32x64xbf16>
    %c0_99 = arith.constant 0 : index
    %c0_100 = arith.constant 0 : index
    %c0_101 = arith.constant 0 : index
    %186 = vector.load %arg30[%c0_99, %c0_100, %c0_101] : memref<1x1x64xf32, #tpu.memory_space<vmem>>, vector<1x1x64xf32>
    %187 = vector.shape_cast %186 : vector<1x1x64xf32> to vector<1x64xf32>
    %c0_102 = arith.constant 0 : index
    %c0_103 = arith.constant 0 : index
    %c0_104 = arith.constant 0 : index
    %188 = vector.load %arg31[%c0_102, %c0_103, %c0_104] : memref<1x64x64xbf16, #tpu.memory_space<vmem>>, vector<1x64x64xbf16>
    %189 = vector.shape_cast %188 : vector<1x64x64xbf16> to vector<64x64xbf16>
    %c0_105 = arith.constant 0 : index
    %c0_106 = arith.constant 0 : index
    %c0_107 = arith.constant 0 : index
    %190 = vector.load %arg32[%c0_105, %c0_106, %c0_107] : memref<1x1x64xf32, #tpu.memory_space<vmem>>, vector<1x1x64xf32>
    %191 = vector.shape_cast %190 : vector<1x1x64xf32> to vector<1x64xf32>
    %c0_108 = arith.constant 0 : index
    %c0_109 = arith.constant 0 : index
    %c0_110 = arith.constant 0 : index
    %192 = vector.load %arg33[%c0_108, %c0_109, %c0_110] : memref<1x1x64xf32, #tpu.memory_space<vmem>>, vector<1x1x64xf32>
    %193 = vector.shape_cast %192 : vector<1x1x64xf32> to vector<1x64xf32>
    %c0_111 = arith.constant 0 : index
    %c0_112 = arith.constant 0 : index
    %c0_113 = arith.constant 0 : index
    %194 = vector.load %arg34[%c0_111, %c0_112, %c0_113] : memref<1x1x64xf32, #tpu.memory_space<vmem>>, vector<1x1x64xf32>
    %195 = vector.shape_cast %194 : vector<1x1x64xf32> to vector<1x64xf32>
    %196 = arith.truncf %4 : vector<16x64xf32> to vector<16x64xbf16>
    %197 = arith.truncf %3 : vector<16x32xf32> to vector<16x32xbf16>
    %cst_114 = arith.constant dense<0.000000e+00> : vector<16x64xf32>
    %198 = tpu.matmul %196, %177, %cst_114 {dimension_numbers = #tpu.dot_dimension_numbers<[1], [0], [0], [1], [0, 0, 1, 1], [], []>} : vector<16x64xbf16>, vector<64x64xbf16>, vector<16x64xf32> -> vector<16x64xf32>
    %199 = vector.broadcast %179 : vector<1x64xf32> to vector<16x64xf32>
    %200 = arith.addf %198, %199 : vector<16x64xf32>
    %cst_115 = arith.constant dense<0.000000e+00> : vector<16x64xf32>
    %201 = tpu.matmul %197, %181, %cst_115 {dimension_numbers = #tpu.dot_dimension_numbers<[1], [0], [0], [1], [0, 0, 1, 1], [], []>} : vector<16x32xbf16>, vector<32x64xbf16>, vector<16x64xf32> -> vector<16x64xf32>
    %202 = vector.broadcast %183 : vector<1x64xf32> to vector<16x64xf32>
    %203 = arith.addf %201, %202 : vector<16x64xf32>
    %cst_116 = arith.constant dense<0.000000e+00> : vector<16x64xf32>
    %204 = tpu.matmul %197, %185, %cst_116 {dimension_numbers = #tpu.dot_dimension_numbers<[1], [0], [0], [1], [0, 0, 1, 1], [], []>} : vector<16x32xbf16>, vector<32x64xbf16>, vector<16x64xf32> -> vector<16x64xf32>
    %205 = vector.broadcast %187 : vector<1x64xf32> to vector<16x64xf32>
    %206 = arith.addf %204, %205 : vector<16x64xf32>
    %207 = vector.shape_cast %200 : vector<16x64xf32> to vector<2x8x64xf32>
    %208 = arith.truncf %207 : vector<2x8x64xf32> to vector<2x8x64xbf16>
    %209 = vector.shape_cast %203 : vector<16x64xf32> to vector<2x8x64xf32>
    %210 = arith.truncf %209 : vector<2x8x64xf32> to vector<2x8x64xbf16>
    %211 = vector.shape_cast %206 : vector<16x64xf32> to vector<2x8x64xf32>
    %212 = arith.truncf %211 : vector<2x8x64xf32> to vector<2x8x64xbf16>
    %213 = vector.extract_strided_slice %208 {offsets = [0, 0, 0], sizes = [2, 8, 16], strides = [1, 1, 1]} : vector<2x8x64xbf16> to vector<2x8x16xbf16>
    %214 = vector.extract_strided_slice %210 {offsets = [0, 0, 0], sizes = [2, 8, 16], strides = [1, 1, 1]} : vector<2x8x64xbf16> to vector<2x8x16xbf16>
    %215 = vector.extract_strided_slice %212 {offsets = [0, 0, 0], sizes = [2, 8, 16], strides = [1, 1, 1]} : vector<2x8x64xbf16> to vector<2x8x16xbf16>
    "tpu.trace_start"() <{level = 10 : i32, message = "bqd,bkd->bqk"}> : () -> ()
    %cst_117 = arith.constant dense<0.000000e+00> : vector<2x8x8xf32>
    %216 = tpu.matmul %213, %214, %cst_117 {dimension_numbers = #tpu.dot_dimension_numbers<[2], [2], [1], [1], [0, 0, 0, 1, 1, 1], [0], [0]>} : vector<2x8x16xbf16>, vector<2x8x16xbf16>, vector<2x8x8xf32> -> vector<2x8x8xf32>
    "tpu.trace_stop"() : () -> ()
    %cst_118 = arith.constant dense<0xFF800000> : vector<2x8xf32>
    %217 = vector.multi_reduction <maximumf>, %216, %cst_118 [2] : vector<2x8x8xf32> to vector<2x8xf32>
    %218 = vector.shape_cast %217 : vector<2x8xf32> to vector<2x8x1xf32>
    %219 = vector.broadcast %218 : vector<2x8x1xf32> to vector<2x8x8xf32>
    %220 = arith.subf %216, %219 : vector<2x8x8xf32>
    %221 = math.exp %220 : vector<2x8x8xf32>
    %cst_119 = arith.constant dense<0.000000e+00> : vector<2x8xf32>
    %222 = vector.multi_reduction <add>, %221, %cst_119 [2] : vector<2x8x8xf32> to vector<2x8xf32>
    %223 = vector.shape_cast %222 : vector<2x8xf32> to vector<2x8x1xf32>
    %224 = vector.broadcast %223 : vector<2x8x1xf32> to vector<2x8x8xf32>
    %225 = arith.divf %221, %224 : vector<2x8x8xf32>
    %226 = arith.truncf %225 : vector<2x8x8xf32> to vector<2x8x8xbf16>
    "tpu.trace_start"() <{level = 10 : i32, message = "bqk,bkd->bqd"}> : () -> ()
    %cst_120 = arith.constant dense<0.000000e+00> : vector<2x8x16xf32>
    %227 = tpu.matmul %226, %215, %cst_120 {dimension_numbers = #tpu.dot_dimension_numbers<[2], [1], [1], [2], [0, 0, 0, 1, 1, 2], [0], [0]>} : vector<2x8x8xbf16>, vector<2x8x16xbf16>, vector<2x8x16xf32> -> vector<2x8x16xf32>
    "tpu.trace_stop"() : () -> ()
    %228 = vector.extract_strided_slice %208 {offsets = [0, 0, 16], sizes = [2, 8, 16], strides = [1, 1, 1]} : vector<2x8x64xbf16> to vector<2x8x16xbf16>
    %229 = vector.extract_strided_slice %210 {offsets = [0, 0, 16], sizes = [2, 8, 16], strides = [1, 1, 1]} : vector<2x8x64xbf16> to vector<2x8x16xbf16>
    %230 = vector.extract_strided_slice %212 {offsets = [0, 0, 16], sizes = [2, 8, 16], strides = [1, 1, 1]} : vector<2x8x64xbf16> to vector<2x8x16xbf16>
    "tpu.trace_start"() <{level = 10 : i32, message = "bqd,bkd->bqk"}> : () -> ()
    %cst_121 = arith.constant dense<0.000000e+00> : vector<2x8x8xf32>
    %231 = tpu.matmul %228, %229, %cst_121 {dimension_numbers = #tpu.dot_dimension_numbers<[2], [2], [1], [1], [0, 0, 0, 1, 1, 1], [0], [0]>} : vector<2x8x16xbf16>, vector<2x8x16xbf16>, vector<2x8x8xf32> -> vector<2x8x8xf32>
    "tpu.trace_stop"() : () -> ()
    %cst_122 = arith.constant dense<0xFF800000> : vector<2x8xf32>
    %232 = vector.multi_reduction <maximumf>, %231, %cst_122 [2] : vector<2x8x8xf32> to vector<2x8xf32>
    %233 = vector.shape_cast %232 : vector<2x8xf32> to vector<2x8x1xf32>
    %234 = vector.broadcast %233 : vector<2x8x1xf32> to vector<2x8x8xf32>
    %235 = arith.subf %231, %234 : vector<2x8x8xf32>
    %236 = math.exp %235 : vector<2x8x8xf32>
    %cst_123 = arith.constant dense<0.000000e+00> : vector<2x8xf32>
    %237 = vector.multi_reduction <add>, %236, %cst_123 [2] : vector<2x8x8xf32> to vector<2x8xf32>
    %238 = vector.shape_cast %237 : vector<2x8xf32> to vector<2x8x1xf32>
    %239 = vector.broadcast %238 : vector<2x8x1xf32> to vector<2x8x8xf32>
    %240 = arith.divf %236, %239 : vector<2x8x8xf32>
    %241 = arith.truncf %240 : vector<2x8x8xf32> to vector<2x8x8xbf16>
    "tpu.trace_start"() <{level = 10 : i32, message = "bqk,bkd->bqd"}> : () -> ()
    %cst_124 = arith.constant dense<0.000000e+00> : vector<2x8x16xf32>
    %242 = tpu.matmul %241, %230, %cst_124 {dimension_numbers = #tpu.dot_dimension_numbers<[2], [1], [1], [2], [0, 0, 0, 1, 1, 2], [0], [0]>} : vector<2x8x8xbf16>, vector<2x8x16xbf16>, vector<2x8x16xf32> -> vector<2x8x16xf32>
    "tpu.trace_stop"() : () -> ()
    %243 = vector.extract_strided_slice %208 {offsets = [0, 0, 32], sizes = [2, 8, 16], strides = [1, 1, 1]} : vector<2x8x64xbf16> to vector<2x8x16xbf16>
    %244 = vector.extract_strided_slice %210 {offsets = [0, 0, 32], sizes = [2, 8, 16], strides = [1, 1, 1]} : vector<2x8x64xbf16> to vector<2x8x16xbf16>
    %245 = vector.extract_strided_slice %212 {offsets = [0, 0, 32], sizes = [2, 8, 16], strides = [1, 1, 1]} : vector<2x8x64xbf16> to vector<2x8x16xbf16>
    "tpu.trace_start"() <{level = 10 : i32, message = "bqd,bkd->bqk"}> : () -> ()
    %cst_125 = arith.constant dense<0.000000e+00> : vector<2x8x8xf32>
    %246 = tpu.matmul %243, %244, %cst_125 {dimension_numbers = #tpu.dot_dimension_numbers<[2], [2], [1], [1], [0, 0, 0, 1, 1, 1], [0], [0]>} : vector<2x8x16xbf16>, vector<2x8x16xbf16>, vector<2x8x8xf32> -> vector<2x8x8xf32>
    "tpu.trace_stop"() : () -> ()
    %cst_126 = arith.constant dense<0xFF800000> : vector<2x8xf32>
    %247 = vector.multi_reduction <maximumf>, %246, %cst_126 [2] : vector<2x8x8xf32> to vector<2x8xf32>
    %248 = vector.shape_cast %247 : vector<2x8xf32> to vector<2x8x1xf32>
    %249 = vector.broadcast %248 : vector<2x8x1xf32> to vector<2x8x8xf32>
    %250 = arith.subf %246, %249 : vector<2x8x8xf32>
    %251 = math.exp %250 : vector<2x8x8xf32>
    %cst_127 = arith.constant dense<0.000000e+00> : vector<2x8xf32>
    %252 = vector.multi_reduction <add>, %251, %cst_127 [2] : vector<2x8x8xf32> to vector<2x8xf32>
    %253 = vector.shape_cast %252 : vector<2x8xf32> to vector<2x8x1xf32>
    %254 = vector.broadcast %253 : vector<2x8x1xf32> to vector<2x8x8xf32>
    %255 = arith.divf %251, %254 : vector<2x8x8xf32>
    %256 = arith.truncf %255 : vector<2x8x8xf32> to vector<2x8x8xbf16>
    "tpu.trace_start"() <{level = 10 : i32, message = "bqk,bkd->bqd"}> : () -> ()
    %cst_128 = arith.constant dense<0.000000e+00> : vector<2x8x16xf32>
    %257 = tpu.matmul %256, %245, %cst_128 {dimension_numbers = #tpu.dot_dimension_numbers<[2], [1], [1], [2], [0, 0, 0, 1, 1, 2], [0], [0]>} : vector<2x8x8xbf16>, vector<2x8x16xbf16>, vector<2x8x16xf32> -> vector<2x8x16xf32>
    "tpu.trace_stop"() : () -> ()
    %258 = vector.extract_strided_slice %208 {offsets = [0, 0, 48], sizes = [2, 8, 16], strides = [1, 1, 1]} : vector<2x8x64xbf16> to vector<2x8x16xbf16>
    %259 = vector.extract_strided_slice %210 {offsets = [0, 0, 48], sizes = [2, 8, 16], strides = [1, 1, 1]} : vector<2x8x64xbf16> to vector<2x8x16xbf16>
    %260 = vector.extract_strided_slice %212 {offsets = [0, 0, 48], sizes = [2, 8, 16], strides = [1, 1, 1]} : vector<2x8x64xbf16> to vector<2x8x16xbf16>
    "tpu.trace_start"() <{level = 10 : i32, message = "bqd,bkd->bqk"}> : () -> ()
    %cst_129 = arith.constant dense<0.000000e+00> : vector<2x8x8xf32>
    %261 = tpu.matmul %258, %259, %cst_129 {dimension_numbers = #tpu.dot_dimension_numbers<[2], [2], [1], [1], [0, 0, 0, 1, 1, 1], [0], [0]>} : vector<2x8x16xbf16>, vector<2x8x16xbf16>, vector<2x8x8xf32> -> vector<2x8x8xf32>
    "tpu.trace_stop"() : () -> ()
    %cst_130 = arith.constant dense<0xFF800000> : vector<2x8xf32>
    %262 = vector.multi_reduction <maximumf>, %261, %cst_130 [2] : vector<2x8x8xf32> to vector<2x8xf32>
    %263 = vector.shape_cast %262 : vector<2x8xf32> to vector<2x8x1xf32>
    %264 = vector.broadcast %263 : vector<2x8x1xf32> to vector<2x8x8xf32>
    %265 = arith.subf %261, %264 : vector<2x8x8xf32>
    %266 = math.exp %265 : vector<2x8x8xf32>
    %cst_131 = arith.constant dense<0.000000e+00> : vector<2x8xf32>
    %267 = vector.multi_reduction <add>, %266, %cst_131 [2] : vector<2x8x8xf32> to vector<2x8xf32>
    %268 = vector.shape_cast %267 : vector<2x8xf32> to vector<2x8x1xf32>
    %269 = vector.broadcast %268 : vector<2x8x1xf32> to vector<2x8x8xf32>
    %270 = arith.divf %266, %269 : vector<2x8x8xf32>
    %271 = arith.truncf %270 : vector<2x8x8xf32> to vector<2x8x8xbf16>
    "tpu.trace_start"() <{level = 10 : i32, message = "bqk,bkd->bqd"}> : () -> ()
    %cst_132 = arith.constant dense<0.000000e+00> : vector<2x8x16xf32>
    %272 = tpu.matmul %271, %260, %cst_132 {dimension_numbers = #tpu.dot_dimension_numbers<[2], [1], [1], [2], [0, 0, 0, 1, 1, 2], [0], [0]>} : vector<2x8x8xbf16>, vector<2x8x16xbf16>, vector<2x8x16xf32> -> vector<2x8x16xf32>
    "tpu.trace_stop"() : () -> ()
    %273 = tpu.concatenate %227, %242, %257, %272 in 2 : vector<2x8x16xf32>, vector<2x8x16xf32>, vector<2x8x16xf32>, vector<2x8x16xf32> -> vector<2x8x64xf32>
    %274 = vector.shape_cast %273 : vector<2x8x64xf32> to vector<16x64xf32>
    %275 = arith.truncf %274 : vector<16x64xf32> to vector<16x64xbf16>
    %cst_133 = arith.constant dense<0.000000e+00> : vector<16x64xf32>
    %276 = tpu.matmul %275, %189, %cst_133 {dimension_numbers = #tpu.dot_dimension_numbers<[1], [0], [0], [1], [0, 0, 1, 1], [], []>} : vector<16x64xbf16>, vector<64x64xbf16>, vector<16x64xf32> -> vector<16x64xf32>
    %277 = vector.broadcast %191 : vector<1x64xf32> to vector<16x64xf32>
    %278 = arith.addf %276, %277 : vector<16x64xf32>
    %279 = arith.addf %4, %278 : vector<16x64xf32>
    %cst_134 = arith.constant dense<0.000000e+00> : vector<16xf32>
    %280 = vector.multi_reduction <add>, %279, %cst_134 [1] : vector<16x64xf32> to vector<16xf32>
    %281 = vector.shape_cast %280 : vector<16xf32> to vector<16x1xf32>
    %cst_135 = arith.constant 6.400000e+01 : f32
    %282 = vector.broadcast %cst_135 : f32 to vector<16x1xf32>
    %283 = arith.divf %281, %282 : vector<16x1xf32>
    %284 = vector.broadcast %283 : vector<16x1xf32> to vector<16x64xf32>
    %285 = arith.subf %279, %284 : vector<16x64xf32>
    %286 = arith.mulf %285, %285 : vector<16x64xf32>
    %cst_136 = arith.constant dense<0.000000e+00> : vector<16xf32>
    %287 = vector.multi_reduction <add>, %286, %cst_136 [1] : vector<16x64xf32> to vector<16xf32>
    %288 = vector.shape_cast %287 : vector<16xf32> to vector<16x1xf32>
    %cst_137 = arith.constant 6.400000e+01 : f32
    %289 = vector.broadcast %cst_137 : f32 to vector<16x1xf32>
    %290 = arith.divf %288, %289 : vector<16x1xf32>
    %291 = vector.broadcast %283 : vector<16x1xf32> to vector<16x64xf32>
    %292 = arith.subf %279, %291 : vector<16x64xf32>
    %cst_138 = arith.constant 9.99999997E-7 : f32
    %293 = vector.broadcast %cst_138 : f32 to vector<16x1xf32>
    %294 = arith.addf %290, %293 : vector<16x1xf32>
    %295 = math.rsqrt %294 : vector<16x1xf32>
    %296 = vector.broadcast %295 : vector<16x1xf32> to vector<16x64xf32>
    %297 = arith.mulf %292, %296 : vector<16x64xf32>
    %298 = vector.broadcast %193 : vector<1x64xf32> to vector<16x64xf32>
    %299 = arith.mulf %297, %298 : vector<16x64xf32>
    %300 = vector.broadcast %195 : vector<1x64xf32> to vector<16x64xf32>
    %301 = arith.addf %299, %300 : vector<16x64xf32>
    %c0_139 = arith.constant 0 : index
    %c0_140 = arith.constant 0 : index
    %c0_141 = arith.constant 0 : index
    %302 = vector.load %arg35[%c0_139, %c0_140, %c0_141] : memref<1x64x64xbf16, #tpu.memory_space<vmem>>, vector<1x64x64xbf16>
    %303 = vector.shape_cast %302 : vector<1x64x64xbf16> to vector<64x64xbf16>
    %c0_142 = arith.constant 0 : index
    %c0_143 = arith.constant 0 : index
    %c0_144 = arith.constant 0 : index
    %304 = vector.load %arg36[%c0_142, %c0_143, %c0_144] : memref<1x1x64xf32, #tpu.memory_space<vmem>>, vector<1x1x64xf32>
    %305 = vector.shape_cast %304 : vector<1x1x64xf32> to vector<1x64xf32>
    %c0_145 = arith.constant 0 : index
    %c0_146 = arith.constant 0 : index
    %c0_147 = arith.constant 0 : index
    %306 = vector.load %arg37[%c0_145, %c0_146, %c0_147] : memref<1x64x64xbf16, #tpu.memory_space<vmem>>, vector<1x64x64xbf16>
    %307 = vector.shape_cast %306 : vector<1x64x64xbf16> to vector<64x64xbf16>
    %c0_148 = arith.constant 0 : index
    %c0_149 = arith.constant 0 : index
    %c0_150 = arith.constant 0 : index
    %308 = vector.load %arg38[%c0_148, %c0_149, %c0_150] : memref<1x1x64xf32, #tpu.memory_space<vmem>>, vector<1x1x64xf32>
    %309 = vector.shape_cast %308 : vector<1x1x64xf32> to vector<1x64xf32>
    %c0_151 = arith.constant 0 : index
    %c0_152 = arith.constant 0 : index
    %c0_153 = arith.constant 0 : index
    %310 = vector.load %arg39[%c0_151, %c0_152, %c0_153] : memref<1x1x64xf32, #tpu.memory_space<vmem>>, vector<1x1x64xf32>
    %311 = vector.shape_cast %310 : vector<1x1x64xf32> to vector<1x64xf32>
    %c0_154 = arith.constant 0 : index
    %c0_155 = arith.constant 0 : index
    %c0_156 = arith.constant 0 : index
    %312 = vector.load %arg40[%c0_154, %c0_155, %c0_156] : memref<1x1x64xf32, #tpu.memory_space<vmem>>, vector<1x1x64xf32>
    %313 = vector.shape_cast %312 : vector<1x1x64xf32> to vector<1x64xf32>
    %314 = arith.truncf %301 : vector<16x64xf32> to vector<16x64xbf16>
    %cst_157 = arith.constant dense<0.000000e+00> : vector<16x64xf32>
    %315 = tpu.matmul %314, %303, %cst_157 {dimension_numbers = #tpu.dot_dimension_numbers<[1], [0], [0], [1], [0, 0, 1, 1], [], []>} : vector<16x64xbf16>, vector<64x64xbf16>, vector<16x64xf32> -> vector<16x64xf32>
    %316 = vector.broadcast %305 : vector<1x64xf32> to vector<16x64xf32>
    %317 = arith.addf %315, %316 : vector<16x64xf32>
    %cst_158 = arith.constant 0.000000e+00 : f32
    %318 = vector.broadcast %cst_158 : f32 to vector<16x64xf32>
    %319 = arith.maximumf %317, %318 : vector<16x64xf32>
    %320 = arith.truncf %319 : vector<16x64xf32> to vector<16x64xbf16>
    %cst_159 = arith.constant dense<0.000000e+00> : vector<16x64xf32>
    %321 = tpu.matmul %320, %307, %cst_159 {dimension_numbers = #tpu.dot_dimension_numbers<[1], [0], [0], [1], [0, 0, 1, 1], [], []>} : vector<16x64xbf16>, vector<64x64xbf16>, vector<16x64xf32> -> vector<16x64xf32>
    %322 = vector.broadcast %309 : vector<1x64xf32> to vector<16x64xf32>
    %323 = arith.addf %321, %322 : vector<16x64xf32>
    %324 = arith.addf %301, %323 : vector<16x64xf32>
    %cst_160 = arith.constant dense<0.000000e+00> : vector<16xf32>
    %325 = vector.multi_reduction <add>, %324, %cst_160 [1] : vector<16x64xf32> to vector<16xf32>
    %326 = vector.shape_cast %325 : vector<16xf32> to vector<16x1xf32>
    %cst_161 = arith.constant 6.400000e+01 : f32
    %327 = vector.broadcast %cst_161 : f32 to vector<16x1xf32>
    %328 = arith.divf %326, %327 : vector<16x1xf32>
    %329 = vector.broadcast %328 : vector<16x1xf32> to vector<16x64xf32>
    %330 = arith.subf %324, %329 : vector<16x64xf32>
    %331 = arith.mulf %330, %330 : vector<16x64xf32>
    %cst_162 = arith.constant dense<0.000000e+00> : vector<16xf32>
    %332 = vector.multi_reduction <add>, %331, %cst_162 [1] : vector<16x64xf32> to vector<16xf32>
    %333 = vector.shape_cast %332 : vector<16xf32> to vector<16x1xf32>
    %cst_163 = arith.constant 6.400000e+01 : f32
    %334 = vector.broadcast %cst_163 : f32 to vector<16x1xf32>
    %335 = arith.divf %333, %334 : vector<16x1xf32>
    %336 = vector.broadcast %328 : vector<16x1xf32> to vector<16x64xf32>
    %337 = arith.subf %324, %336 : vector<16x64xf32>
    %cst_164 = arith.constant 9.99999997E-7 : f32
    %338 = vector.broadcast %cst_164 : f32 to vector<16x1xf32>
    %339 = arith.addf %335, %338 : vector<16x1xf32>
    %340 = math.rsqrt %339 : vector<16x1xf32>
    %341 = vector.broadcast %340 : vector<16x1xf32> to vector<16x64xf32>
    %342 = arith.mulf %337, %341 : vector<16x64xf32>
    %343 = vector.broadcast %311 : vector<1x64xf32> to vector<16x64xf32>
    %344 = arith.mulf %342, %343 : vector<16x64xf32>
    %345 = vector.broadcast %313 : vector<1x64xf32> to vector<16x64xf32>
    %346 = arith.addf %344, %345 : vector<16x64xf32>
    %c0_165 = arith.constant 0 : index
    %c0_166 = arith.constant 0 : index
    %347 = vector.load %arg41[%c0_165, %c0_166] : memref<16x32xf32, #tpu.memory_space<vmem>>, vector<16x32xf32>
    tpu.vector_store %arg41[%c0_165, %c0_166], %175 {strides = array<i32>} : memref<16x32xf32, #tpu.memory_space<vmem>>, vector<16x32xf32>,
    %c0_167 = arith.constant 0 : index
    %c0_168 = arith.constant 0 : index
    %348 = vector.load %arg42[%c0_167, %c0_168] : memref<16x64xf32, #tpu.memory_space<vmem>>, vector<16x64xf32>
    tpu.vector_store %arg42[%c0_167, %c0_168], %346 {strides = array<i32>} : memref<16x64xf32, #tpu.memory_space<vmem>>, vector<16x64xf32>,
    return
  }
  func.func @transform_0(%arg0: i32) -> (i32, i32) {
    %c0_i32 = arith.constant 0 : i32
    %c0_i32_0 = arith.constant 0 : i32
    %c0_i32_1 = arith.constant 0 : i32
    return %c0_i32, %c0_i32_0 : i32, i32
  }
  func.func @transform_1(%arg0: i32) -> (i32, i32) {
    %c0_i32 = arith.constant 0 : i32
    %c0_i32_0 = arith.constant 0 : i32
    %c0_i32_1 = arith.constant 0 : i32
    return %c0_i32, %c0_i32_0 : i32, i32
  }
  func.func @transform_2(%arg0: i32) -> (i32, i32) {
    %c0_i32 = arith.constant 0 : i32
    %c0_i32_0 = arith.constant 0 : i32
    %c0_i32_1 = arith.constant 0 : i32
    return %c0_i32, %c0_i32_0 : i32, i32
  }
  func.func @transform_3(%arg0: i32) -> (i32, i32) {
    %c0_i32 = arith.constant 0 : i32
    %c0_i32_0 = arith.constant 0 : i32
    %c0_i32_1 = arith.constant 0 : i32
    return %c0_i32, %c0_i32_0 : i32, i32
  }
  func.func @transform_4(%arg0: i32) -> (i32, i32) {
    %c0_i32 = arith.constant 0 : i32
    %c0_i32_0 = arith.constant 0 : i32
    %c0_i32_1 = arith.constant 0 : i32
    return %c0_i32, %c0_i32_0 : i32, i32
  }
  func.func @transform_5(%arg0: i32) -> (i32, i32) {
    %c0_i32 = arith.constant 0 : i32
    %c0_i32_0 = arith.constant 0 : i32
    %c0_i32_1 = arith.constant 0 : i32
    return %c0_i32, %c0_i32_0 : i32, i32
  }
  func.func @transform_6(%arg0: i32) -> (i32, i32) {
    %c0_i32 = arith.constant 0 : i32
    %c0_i32_0 = arith.constant 0 : i32
    %c0_i32_1 = arith.constant 0 : i32
    return %c0_i32, %c0_i32_0 : i32, i32
  }
  func.func @transform_7(%arg0: i32) -> (i32, i32) {
    %c0_i32 = arith.constant 0 : i32
    %c0_i32_0 = arith.constant 0 : i32
    %c0_i32_1 = arith.constant 0 : i32
    return %c0_i32, %c0_i32_0 : i32, i32
  }
  func.func @transform_8(%arg0: i32) -> (i32, i32, i32) {
    %c0_i32 = arith.constant 0 : i32
    %c0_i32_0 = arith.constant 0 : i32
    %c0_i32_1 = arith.constant 0 : i32
    return %arg0, %c0_i32, %c0_i32_0 : i32, i32, i32
  }
  func.func @transform_9(%arg0: i32) -> (i32, i32, i32) {
    %c0_i32 = arith.constant 0 : i32
    %c0_i32_0 = arith.constant 0 : i32
    %c0_i32_1 = arith.constant 0 : i32
    return %arg0, %c0_i32, %c0_i32_0 : i32, i32, i32
  }
  func.func @transform_10(%arg0: i32) -> (i32, i32, i32) {
    %c0_i32 = arith.constant 0 : i32
    %c0_i32_0 = arith.constant 0 : i32
    %c0_i32_1 = arith.constant 0 : i32
    return %arg0, %c0_i32, %c0_i32_0 : i32, i32, i32
  }
  func.func @transform_11(%arg0: i32) -> (i32, i32, i32) {
    %c0_i32 = arith.constant 0 : i32
    %c0_i32_0 = arith.constant 0 : i32
    %c0_i32_1 = arith.constant 0 : i32
    return %arg0, %c0_i32, %c0_i32_0 : i32, i32, i32
  }
  func.func @transform_12(%arg0: i32) -> (i32, i32, i32) {
    %c0_i32 = arith.constant 0 : i32
    %c0_i32_0 = arith.constant 0 : i32
    %c0_i32_1 = arith.constant 0 : i32
    return %arg0, %c0_i32, %c0_i32_0 : i32, i32, i32
  }
  func.func @transform_13(%arg0: i32) -> (i32, i32, i32) {
    %c0_i32 = arith.constant 0 : i32
    %c0_i32_0 = arith.constant 0 : i32
    %c0_i32_1 = arith.constant 0 : i32
    return %arg0, %c0_i32, %c0_i32_0 : i32, i32, i32
  }
  func.func @transform_14(%arg0: i32) -> (i32, i32, i32) {
    %c0_i32 = arith.constant 0 : i32
    %c0_i32_0 = arith.constant 0 : i32
    %c0_i32_1 = arith.constant 0 : i32
    return %arg0, %c0_i32, %c0_i32_0 : i32, i32, i32
  }
  func.func @transform_15(%arg0: i32) -> (i32, i32, i32) {
    %c0_i32 = arith.constant 0 : i32
    %c0_i32_0 = arith.constant 0 : i32
    %c0_i32_1 = arith.constant 0 : i32
    return %arg0, %c0_i32, %c0_i32_0 : i32, i32, i32
  }
  func.func @transform_16(%arg0: i32) -> (i32, i32, i32) {
    %c0_i32 = arith.constant 0 : i32
    %c0_i32_0 = arith.constant 0 : i32
    %c0_i32_1 = arith.constant 0 : i32
    return %arg0, %c0_i32, %c0_i32_0 : i32, i32, i32
  }
  func.func @transform_17(%arg0: i32) -> (i32, i32, i32) {
    %c0_i32 = arith.constant 0 : i32
    %c0_i32_0 = arith.constant 0 : i32
    %c0_i32_1 = arith.constant 0 : i32
    return %arg0, %c0_i32, %c0_i32_0 : i32, i32, i32
  }
  func.func @transform_18(%arg0: i32) -> (i32, i32, i32) {
    %c0_i32 = arith.constant 0 : i32
    %c0_i32_0 = arith.constant 0 : i32
    %c0_i32_1 = arith.constant 0 : i32
    return %arg0, %c0_i32, %c0_i32_0 : i32, i32, i32
  }
  func.func @transform_19(%arg0: i32) -> (i32, i32, i32) {
    %c0_i32 = arith.constant 0 : i32
    %c0_i32_0 = arith.constant 0 : i32
    %c0_i32_1 = arith.constant 0 : i32
    return %arg0, %c0_i32, %c0_i32_0 : i32, i32, i32
  }
  func.func @transform_20(%arg0: i32) -> (i32, i32, i32) {
    %c0_i32 = arith.constant 0 : i32
    %c0_i32_0 = arith.constant 0 : i32
    %c0_i32_1 = arith.constant 0 : i32
    return %arg0, %c0_i32, %c0_i32_0 : i32, i32, i32
  }
  func.func @transform_21(%arg0: i32) -> (i32, i32, i32) {
    %c0_i32 = arith.constant 0 : i32
    %c0_i32_0 = arith.constant 0 : i32
    %c0_i32_1 = arith.constant 0 : i32
    return %arg0, %c0_i32, %c0_i32_0 : i32, i32, i32
  }
  func.func @transform_22(%arg0: i32) -> (i32, i32, i32) {
    %c0_i32 = arith.constant 0 : i32
    %c0_i32_0 = arith.constant 0 : i32
    %c0_i32_1 = arith.constant 0 : i32
    return %arg0, %c0_i32, %c0_i32_0 : i32, i32, i32
  }
  func.func @transform_23(%arg0: i32) -> (i32, i32, i32) {
    %c0_i32 = arith.constant 0 : i32
    %c0_i32_0 = arith.constant 0 : i32
    %c0_i32_1 = arith.constant 0 : i32
    return %arg0, %c0_i32, %c0_i32_0 : i32, i32, i32
  }
  func.func @transform_24(%arg0: i32) -> (i32, i32, i32) {
    %c0_i32 = arith.constant 0 : i32
    %c0_i32_0 = arith.constant 0 : i32
    %c0_i32_1 = arith.constant 0 : i32
    return %arg0, %c0_i32, %c0_i32_0 : i32, i32, i32
  }
  func.func @transform_25(%arg0: i32) -> (i32, i32, i32) {
    %c0_i32 = arith.constant 0 : i32
    %c0_i32_0 = arith.constant 0 : i32
    %c0_i32_1 = arith.constant 0 : i32
    return %arg0, %c0_i32, %c0_i32_0 : i32, i32, i32
  }
  func.func @transform_26(%arg0: i32) -> (i32, i32, i32) {
    %c0_i32 = arith.constant 0 : i32
    %c0_i32_0 = arith.constant 0 : i32
    %c0_i32_1 = arith.constant 0 : i32
    return %arg0, %c0_i32, %c0_i32_0 : i32, i32, i32
  }
  func.func @transform_27(%arg0: i32) -> (i32, i32, i32) {
    %c0_i32 = arith.constant 0 : i32
    %c0_i32_0 = arith.constant 0 : i32
    %c0_i32_1 = arith.constant 0 : i32
    return %arg0, %c0_i32, %c0_i32_0 : i32, i32, i32
  }
  func.func @transform_28(%arg0: i32) -> (i32, i32, i32) {
    %c0_i32 = arith.constant 0 : i32
    %c0_i32_0 = arith.constant 0 : i32
    %c0_i32_1 = arith.constant 0 : i32
    return %arg0, %c0_i32, %c0_i32_0 : i32, i32, i32
  }
  func.func @transform_29(%arg0: i32) -> (i32, i32, i32) {
    %c0_i32 = arith.constant 0 : i32
    %c0_i32_0 = arith.constant 0 : i32
    %c0_i32_1 = arith.constant 0 : i32
    return %arg0, %c0_i32, %c0_i32_0 : i32, i32, i32
  }
  func.func @transform_30(%arg0: i32) -> (i32, i32, i32) {
    %c0_i32 = arith.constant 0 : i32
    %c0_i32_0 = arith.constant 0 : i32
    %c0_i32_1 = arith.constant 0 : i32
    return %arg0, %c0_i32, %c0_i32_0 : i32, i32, i32
  }
  func.func @transform_31(%arg0: i32) -> (i32, i32, i32) {
    %c0_i32 = arith.constant 0 : i32
    %c0_i32_0 = arith.constant 0 : i32
    %c0_i32_1 = arith.constant 0 : i32
    return %arg0, %c0_i32, %c0_i32_0 : i32, i32, i32
  }
  func.func @transform_32(%arg0: i32) -> (i32, i32, i32) {
    %c0_i32 = arith.constant 0 : i32
    %c0_i32_0 = arith.constant 0 : i32
    %c0_i32_1 = arith.constant 0 : i32
    return %arg0, %c0_i32, %c0_i32_0 : i32, i32, i32
  }
  func.func @transform_33(%arg0: i32) -> (i32, i32, i32) {
    %c0_i32 = arith.constant 0 : i32
    %c0_i32_0 = arith.constant 0 : i32
    %c0_i32_1 = arith.constant 0 : i32
    return %arg0, %c0_i32, %c0_i32_0 : i32, i32, i32
  }
  func.func @transform_34(%arg0: i32) -> (i32, i32, i32) {
    %c0_i32 = arith.constant 0 : i32
    %c0_i32_0 = arith.constant 0 : i32
    %c0_i32_1 = arith.constant 0 : i32
    return %arg0, %c0_i32, %c0_i32_0 : i32, i32, i32
  }
  func.func @transform_35(%arg0: i32) -> (i32, i32, i32) {
    %c0_i32 = arith.constant 0 : i32
    %c0_i32_0 = arith.constant 0 : i32
    %c0_i32_1 = arith.constant 0 : i32
    return %arg0, %c0_i32, %c0_i32_0 : i32, i32, i32
  }
  func.func @transform_36(%arg0: i32) -> (i32, i32, i32) {
    %c0_i32 = arith.constant 0 : i32
    %c0_i32_0 = arith.constant 0 : i32
    %c0_i32_1 = arith.constant 0 : i32
    return %arg0, %c0_i32, %c0_i32_0 : i32, i32, i32
  }
  func.func @transform_37(%arg0: i32) -> (i32, i32, i32) {
    %c0_i32 = arith.constant 0 : i32
    %c0_i32_0 = arith.constant 0 : i32
    %c0_i32_1 = arith.constant 0 : i32
    return %arg0, %c0_i32, %c0_i32_0 : i32, i32, i32
  }
  func.func @transform_38(%arg0: i32) -> (i32, i32, i32) {
    %c0_i32 = arith.constant 0 : i32
    %c0_i32_0 = arith.constant 0 : i32
    %c0_i32_1 = arith.constant 0 : i32
    return %arg0, %c0_i32, %c0_i32_0 : i32, i32, i32
  }
  func.func @transform_39(%arg0: i32) -> (i32, i32, i32) {
    %c0_i32 = arith.constant 0 : i32
    %c0_i32_0 = arith.constant 0 : i32
    %c0_i32_1 = arith.constant 0 : i32
    return %arg0, %c0_i32, %c0_i32_0 : i32, i32, i32
  }
  func.func @transform_40(%arg0: i32) -> (i32, i32) {
    %c0_i32 = arith.constant 0 : i32
    %c0_i32_0 = arith.constant 0 : i32
    %c0_i32_1 = arith.constant 0 : i32
    return %c0_i32, %c0_i32_0 : i32, i32
  }
  func.func @transform_41(%arg0: i32) -> (i32, i32) {
    %c0_i32 = arith.constant 0 : i32
    %c0_i32_0 = arith.constant 0 : i32
    %c0_i32_1 = arith.constant 0 : i32
    return %c0_i32, %c0_i32_0 : i32, i32
  }
}

</mosaic_0001>

<bundles_post_ra>
// kernel: tpu_custom_call.1
= control target key start
LH: loop header
LB: loop body
LE: loop exit
PB: predicated region body
PF: predicated region fallthrough
CT: control target
= control target key end

     0   :  { %s8026_s6 = smov 1   ;;  %s8027_s10 = smov 2   ;;  %s9686_s0 = inlined_call_operand.smem [shape: u32[42], index: -1, kind: input, shape index: {}] }
   0x1   :  { %s8122_s5 = sld [smem:[%s9686_s0]]   ;;  %s8028_s14 = smov 3  }
   0x2   :  { %s8127_s9 = sld [smem:[%s9686_s0 + %s8026_s6]]   ;;  %s8029_s18 = smov 4  }
   0x3   :  { %s8132_s13 = sld [smem:[%s9686_s0 + %s8027_s10]]   ;;  %s8030_s22 = smov 5  }
   0x4   :  { %s8137_s17 = sld [smem:[%s9686_s0 + %s8028_s14]]   ;;  %s8031_s26 = smov 6  }
   0x5   :  { %s8142_s21 = sld [smem:[%s9686_s0 + %s8029_s18]]   ;;  %s8032_s30 = smov 7  }
   0x6   :  { %s8147_s25 = sld [smem:[%s9686_s0 + %s8030_s22]]   ;;  %s8033_s4 = smov 8  }
   0x7   :  { %9749 = sst [smem:[#allocation71_spill]] %s8122_s5  ;;  %s8034_s10 = smov 9  }
   0x8   :  { %9750 = sst [smem:[#allocation72_spill]] %s8127_s9  ;;  %s8035_s15 = smov 10  }
   0x9   :  { %9751 = sst [smem:[#allocation73_spill]] %s8132_s13  ;;  %s8036_s20 = smov 11  }
   0xa   :  { %9752 = sst [smem:[#allocation74_spill]] %s8137_s17  ;;  %s8038_s1 = smov 13  }
   0xb   :  { %9753 = sst [smem:[#allocation75_spill]] %s8142_s21  ;;  %s8039_s7 = smov 14  }
   0xc   :  { %9754 = sst [smem:[#allocation76_spill]] %s8147_s25  ;;  %s8041_s22 = smov 16  }
   0xd   :  { %s8152_s29 = sld [smem:[%s9686_s0 + %s8031_s26]]   ;;  %s8037_s26 = smov 12  }
   0xe   :  { %s8157_s3 = sld [smem:[%s9686_s0 + %s8032_s30]]   ;;  %s8042_s28 = smov 17  }
   0xf   :  { %s8162_s8 = sld [smem:[%s9686_s0 + %s8033_s4]]  }
  0x10   :  { %s8167_s14 = sld [smem:[%s9686_s0 + %s8034_s10]]  }
  0x11   :  { %s8172_s19 = sld [smem:[%s9686_s0 + %s8035_s15]]   ;;  %s8040_s15 = smov 15  }
  0x12   :  { %s8177_s24 = sld [smem:[%s9686_s0 + %s8036_s20]]  }
  0x13   :  { %s8182_s30 = sld [smem:[%s9686_s0 + %s8037_s26]]  }
  0x14   :  { %9755 = sst [smem:[#allocation77_spill]] %s8157_s3 }
  0x15   :  { %9756 = sst [smem:[#allocation78_spill]] %s8162_s8 }
  0x16   :  { %9757 = sst [smem:[#allocation79_spill]] %s8167_s14 }
  0x17   :  { %9758 = sst [smem:[#allocation80_spill]] %s8172_s19 }
  0x18   :  { %s8187_s6 = sld [smem:[%s9686_s0 + %s8038_s1]]  }
  0x19   :  { %9759 = sst [smem:[#allocation81_spill]] %s8182_s30 }
  0x1a   :  { %s8192_s12 = sld [smem:[%s9686_s0 + %s8039_s7]]   ;;  %s8043_s7 = smov 18  }
  0x1b   :  { %s8197_s20 = sld [smem:[%s9686_s0 + %s8040_s15]]   ;;  %s8044_s15 = smov 19  }
  0x1c   :  { %s8202_s27 = sld [smem:[%s9686_s0 + %s8041_s22]]   ;;  %s8045_s22 = smov 20  }
  0x1d   :  { %s8207_s4 = sld [smem:[%s9686_s0 + %s8042_s28]]   ;;  %s8046_s28 = smov 21  }
  0x1e   :  { %9760 = sst [smem:[#allocation82_spill]] %s8187_s6 }
  0x1f   :  { %s8212_s21 = sld [smem:[%s9686_s0 + %s8043_s7]]   ;;  %s8047_s7 = smov 22  }
  0x20   :  { %9761 = sst [smem:[#allocation83_spill]] %s8192_s12 }
  0x21   :  { %9762 = sst [smem:[#allocation84_spill]] %s8197_s20 }
  0x22   :  { %9763 = sst [smem:[#allocation85_spill]] %s8202_s27 }
  0x23   :  { %9764 = sst [smem:[#allocation86_spill]] %s8207_s4 }
  0x24   :  { %s8217_s12 = sld [smem:[%s9686_s0 + %s8044_s15]]   ;;  %s8048_s15 = smov 23  }
  0x25   :  { %9765 = sst [smem:[#allocation87_spill]] %s8212_s21 }
  0x26   :  { %s8222_s30 = sld [smem:[%s9686_s0 + %s8045_s22]]   ;;  %s8049_s22 = smov 24  }
  0x27   :  { %s8227_s19 = sld [smem:[%s9686_s0 + %s8046_s28]]   ;;  %s8050_s28 = smov 25  }
  0x28   :  { %s8232_s21 = sld [smem:[%s9686_s0 + %s8047_s7]]   ;;  %s8051_s7 = smov 26  }
  0x29   :  { %s8237_s27 = sld [smem:[%s9686_s0 + %s8048_s15]]   ;;  %s8052_s15 = smov 27  }
  0x2a   :  { %9766 = sst [smem:[#allocation88_spill]] %s8217_s12 }
  0x2b   :  { %s8252_s6 = sld [smem:[%s9686_s0 + %s8051_s7]]   ;;  %s8055_s7 = smov 30  }
  0x2c   :  { %9767 = sst [smem:[#allocation89_spill]] %s8222_s30 }
  0x2d   :  { %9768 = sst [smem:[#allocation90_spill]] %s8227_s19 }
  0x2e   :  { %9769 = sst [smem:[#allocation91_spill]] %s8232_s21 }
  0x2f   :  { %9770 = sst [smem:[#allocation92_spill]] %s8237_s27 }
  0x30   :  { %s8242_s30 = sld [smem:[%s9686_s0 + %s8049_s22]]   ;;  %s8053_s22 = smov 28  }
  0x31   :  { %s8247_s19 = sld [smem:[%s9686_s0 + %s8050_s28]]   ;;  %s8054_s28 = smov 29  }
  0x32   :  { %9773 = sst [smem:[#allocation95_spill]] %s8252_s6 }
  0x33   :  { %s8257_s27 = sld [smem:[%s9686_s0 + %s8052_s15]]   ;;  %s8056_s15 = smov 31  }
  0x34   :  { %s8267_s14 = sld [smem:[%s9686_s0 + %s8054_s28]]   ;;  %s8058_s28 = smov 33  }
  0x35   :  { %s8272_s6 = sld [smem:[%s9686_s0 + %s8055_s7]]   ;;  %s8059_s7 = smov 34  }
  0x36   :  { %9771 = sst [smem:[#allocation93_spill]] %s8242_s30 }
  0x37   :  { %9772 = sst [smem:[#allocation94_spill]] %s8247_s19 }
  0x38   :  { %s8262_s30 = sld [smem:[%s9686_s0 + %s8053_s22]]   ;;  %s8057_s22 = smov 32  }
  0x39   :  { %9774 = sst [smem:[#allocation96_spill]] %s8257_s27 }
  0x3a   :  { %9776 = sst [smem:[#allocation98_spill]] %s8267_s14 }
  0x3b   :  { %9777 = sst [smem:[#allocation99_spill]] %s8272_s6 }
  0x3c   :  { %s8277_s27 = sld [smem:[%s9686_s0 + %s8056_s15]]   ;;  %s8060_s15 = smov 35  }
  0x3d   :  { %s8287_s14 = sld [smem:[%s9686_s0 + %s8058_s28]]   ;;  %s8062_s28 = smov 37  }
  0x3e   :  { %9775 = sst [smem:[#allocation97_spill]] %s8262_s30 }
  0x3f   :  { %s8282_s30 = sld [smem:[%s9686_s0 + %s8057_s22]]   ;;  %s8061_s22 = smov 36  }
  0x40   :  { %s8292_s6 = sld [smem:[%s9686_s0 + %s8059_s7]]   ;;  %s8063_s7 = smov 38  }
  0x42   :  { %9778 = sst [smem:[#allocation100_spill]] %s8277_s27 }
  0x43   :  { %9780 = sst [smem:[#allocation102_spill]] %s8287_s14 }
  0x44   :  { %s8297_s27 = sld [smem:[%s9686_s0 + %s8060_s15]]   ;;  %s8064_s15 = smov 39  }
  0x45   :  { %9779 = sst [smem:[#allocation101_spill]] %s8282_s30 }
  0x46   :  { %9781 = sst [smem:[#allocation103_spill]] %s8292_s6 }
  0x47   :  { %s8302_s30 = sld [smem:[%s9686_s0 + %s8061_s22]]   ;;  %s8065_s22 = smov 40  }
  0x48   :  { %s8307_s14 = sld [smem:[%s9686_s0 + %s8062_s28]]   ;;  %s8066_s28 = smov 41  }
  0x49   :  { %s8312_s6 = sld [smem:[%s9686_s0 + %s8063_s7]]  }
  0x4a   :  { %9782 = sst [smem:[#allocation104_spill]] %s8297_s27 }
  0x4b   :  { %s8317_s27 = sld [smem:[%s9686_s0 + %s8064_s15]]  }
  0x4d   :  { %9783 = sst [smem:[#allocation105_spill]] %s8302_s30 }
  0x4e   :  { %9784 = sst [smem:[#allocation106_spill]] %s8307_s14 }
  0x4f   :  { %s8322_s30 = sld [smem:[%s9686_s0 + %s8065_s22]]  }
  0x50   :  { %s8327_s14 = sld [smem:[%s9686_s0 + %s8066_s28]]  }
  0x51   :  { %9785 = sst [smem:[#allocation107_spill]] %s8317_s27 }
  0x55   :  { %9786 = sst [smem:[#allocation108_spill]] %s8322_s30 }
  0x56   :  { %9787 = sst [smem:[#allocation109_spill]] %s8327_s14 }
  0x57   :  { %89 = vsyncpa [#allocation3], 0 }
  0x58   :  { %90 = vsyncpa [#allocation6], 0 }
  0x59   :  { %91 = vsyncpa [#allocation9], 0 }
  0x5a   :  { %92 = vsyncpa [#allocation12], 0 }
  0x5b   :  { %93 = vsyncpa [#allocation15], 0 }
  0x5c   :  { %95 = vsyncpa [#allocation15 + $0x1], 0 }
  0x5d   :  { %96 = vsyncpa [#allocation18], 0 }
  0x5e   :  { %98 = vsyncpa [#allocation18 + $0x1], 0 }
  0x5f   :  { %99 = vsyncpa [#allocation21], 0 }
  0x60   :  { %101 = vsyncpa [#allocation21 + $0x1], 0 }
  0x61   :  { %102 = vsyncpa [#allocation24], 0 }
  0x62   :  { %104 = vsyncpa [#allocation24 + $0x1], 0 }
  0x63   :  { %105 = vsyncpa [#allocation27], 0 }
  0x64   :  { %107 = vsyncpa [#allocation27 + $0x1], 0 }
  0x65   :  { %108 = vsyncpa [#allocation30], 0 }
  0x66   :  { %110 = vsyncpa [#allocation30 + $0x1], 0 }
  0x67   :  { %111 = vsyncpa [#allocation33], 0 }
  0x68   :  { %113 = vsyncpa [#allocation33 + $0x1], 0 }
  0x69   :  { %114 = vsyncpa [#allocation36], 0 }
  0x6a   :  { %116 = vsyncpa [#allocation36 + $0x1], 0 }
  0x6b   :  { %117 = vsyncpa [#allocation39], 0 }
  0x6c   :  { %119 = vsyncpa [#allocation39 + $0x1], 0 }
  0x6d   :  { %120 = vsyncpa [#allocation42], 0 }
  0x6e   :  { %122 = vsyncpa [#allocation42 + $0x1], 0 }
  0x6f   :  { %123 = vsyncpa [#allocation45], 0 }
  0x70   :  { %125 = vsyncpa [#allocation45 + $0x1], 0 }
  0x71   :  { %126 = vsyncpa [#allocation48], 0 }
  0x72   :  { %128 = vsyncpa [#allocation48 + $0x1], 0 }
  0x73   :  { %129 = vsyncpa [#allocation4], 0 }
  0x74   :  { %130 = vsyncpa [#allocation52], 0  ;;  %s8329_s0 = smov 0   ;;  %s8331_s7 = smov 0  }
  0x75   :  { %s8333_s10 = smov 0   ;;  %s8335_s11 = smov 0  }
  0x76 LB: > { %s9788_s21 = sld [smem:[#allocation91_spill]]  ;;  %s8348_s15 = sadd.s32 4294967295, %s8024_s11   ;;  %s8016_s7 = sphi %s8331_s7, %s9894_s7   ;;  %s8012_s0 = sphi %s8329_s0, %s9893_s0   ;;  %s8024_s11 = sphi %s8335_s11, %s9891_s11   ;;  %s8020_s10 = sphi %s8333_s10, %s9895_s10  }
  0x77   : > { %s9789_s20 = sld [smem:[#allocation84_spill]]  ;;  %s8351_s16 = sadd.s32 1, %s8024_s11  }
  0x78   : > { %s9790_s19 = sld [smem:[#allocation94_spill]]  ;;  %s308_s18 = ssub.s32 %s8024_s11, %s8351_s16 }
  0x79   : > { %s9791_s12 = sld [smem:[#allocation88_spill]]  ;;  %s311_s22 = sadd.s32 1, %s8020_s10 }
  0x7a   : > { %s9792_s4 = sld [smem:[#allocation86_spill]]  ;;  %p309_p0 = scmp.eq.s32.totalorder %s308_s18, 0 }
  0x7b   : > { %s9793_s8 = sld [smem:[#allocation78_spill]]  ;;  %p318_p1 = scmp.ne.s32.totalorder %s8020_s10, %s8016_s7 }
  0x7c   : > { %9794 = sst [smem:[#allocation110_spill]] %s8351_s16  ;;  %p319_p2 = scmp.eq.s32.totalorder %s8024_s11, 0 }
  0x7d   : > { %p324_p3 = scmp.ne.s32.totalorder %s8016_s7, %s8012_s0  ;;  %p9706_p5 = scmp.eq.s32.totalorder %s8348_s15, 0 }
  0x7e   : > { %s8361_s23 = scalar_select %p309_p0, %s8020_s10, %s311_s22  }
  0x7f   : > { %p8363_p4 = por %p319_p2, %p318_p1  ;;  %p6054_p6 = scmp.ge.s32.totalorder %s8024_s11, 1 }
  0x80   : > { %9795 = sst [smem:[#allocation111_spill]] %s8361_s23  ;;  %p1183_p7 = scmp.lt.s32.totalorder %s8024_s11, 3 }
  0x81   : > { %s9796_s26 = scalar_select %p8363_p4, 1, 0 }
  0x82   : > { %p8372_p8 = por %p9706_p5, %p324_p3  ;;  %p8377_p10 = pnand %p6054_p6, %p1183_p7 }
  0x83   : > { %s8067_s2 = smov [#allocation5]   ;;  %s8068_s22 = smov [#allocation8]  }
  0x84   : > { %s9797_s28 = scalar_select %p8372_p8, 1, 0 }
  0x85   : > { %s9798_s1 = scalar_select %p8377_p10, 1, 0 }
  0x86   : > { %p6772_p11 = pneg %p8377_p10  ;;  %s1208_s0 = sshll.u32 %s8067_s2, 4  ;;  %s1209_s0 = int_to_ptr.vmem [resolvable:$true] %s1208_s0 }
  0x87   : > { %s1233_s23 = sshll.u32 %s8068_s22, 4  ;;  %s8069_s16 = smov [#allocation11]   ;;  %s1234_s23 = int_to_ptr.vmem [resolvable:$true] %s1233_s23 }
  0x88   : > { %p8385_p12 = pnand %p6772_p11, %p9706_p5  ;;  %s1258_s14 = sshll.u32 %s8069_s16, 4  ;;  %s1259_s14 = int_to_ptr.vmem [resolvable:$true] %s1258_s14 }
  0x89   : > { %s7079_s27 = scalar_lea.vmem %s1209_s0, 256  ;;  %p7087_p3 = scmp.lt.s32.totalorder %s1209_s0, %s1209_s0 }
  0x8a   : > { %p8391_p13 = pneg %p8385_p12  ;;  %p7080_p0 = scmp.ne.s32.totalorder %s1209_s0, %s7079_s27 }
  0x8b   : > { %p7088_p6 = scmp.lt.s32.totalorder %s7079_s27, %s7079_s27 }
  0x8c   : > { %p7082_p1 = pnand %p7080_p0, %p8391_p13 }
  0x8d   : > { %p7089_p7 = por %p7088_p6, %p7087_p3 }
  0x8e   : > { %p7083_p2 = pneg %p7082_p1 }
  0x90   : > { %p7090_p11 = pnand %p7089_p7, %p7083_p2 }
  0x92   : > { %7093 = shalt.err (!%p7090_p11)
}
  0x93   : > { %s9710_s2 = smov 128   ;;  %s9801_s9 = sld [smem:[#allocation72_spill]] }
  0x94   : > { %s9711_s16 = smov 8   ;;  %s7105_s22 = scalar_lea.vmem %s1234_s23, 128 }
  0x95   : > { %p7106_p9 = scmp.ne.s32.totalorder %s1234_s23, %s7105_s22  ;;  %p7113_p5 = scmp.lt.s32.totalorder %s1234_s23, %s1234_s23 }
  0x96   : > { %p7114_p8 = scmp.lt.s32.totalorder %s7105_s22, %s7105_s22 }
  0x97   : > { %p7108_p0 = pnand %p7106_p9, %p8391_p13 }
  0x98   : > { %p7115_p3 = por %p7114_p8, %p7113_p5 }
  0x99   : > { %6778 = dma.hbm_to_vmem [thread:$0]  (!%p8385_p12), %s9801_s9, 256, %s1209_s0, [#allocation6], %s9710_s2, %s9710_s2, %s9711_s16  }
  0x9a   : > { %p7109_p1 = pneg %p7108_p0 }
  0x9c   : > { %p7116_p2 = pnand %p7115_p3, %p7109_p1 }
  0x9e   : > { %7119 = shalt.err (!%p7116_p2)
}
  0x9f   : > { %s9802_s17 = sld [smem:[#allocation74_spill]]  ;;  %s7131_s27 = scalar_lea.vmem %s1259_s14, 16 }
  0xa0   : > { %p7132_p6 = scmp.ne.s32.totalorder %s1259_s14, %s7131_s27  ;;  %s7138_s0 = scalar_lea.vmem %s1259_s14, 32 }
  0xa1   : > { %p7139_p10 = scmp.lt.s32.totalorder %s1259_s14, %s1259_s14  ;;  %p7140_p9 = scmp.lt.s32.totalorder %s7138_s0, %s7131_s27 }
  0xa2   : > { %p7134_p7 = pnand %p7132_p6, %p8391_p13 }
  0xa3   : > { %p7141_p0 = por %p7140_p9, %p7139_p10 }
  0xa4   : > { %p7135_p11 = pneg %p7134_p7 }
  0xa5   : > { %6784 = dma.hbm_to_vmem [thread:$0]  (!%p8385_p12), %s9802_s17, 128, %s1234_s23, [#allocation9]  }
  0xa6   : > { %p7142_p4 = pnand %p7141_p0, %p7135_p11 }
  0xa8   : > { %7145 = shalt.err (!%p7142_p4)
}
  0xa9   : > { %6790 = dma.hbm_to_vmem [thread:$0]  (!%p8385_p12), %s8152_s29, 16, %s1259_s14, [#allocation12]  }
  0xaa   : > { %s8072_s22 = smov [#allocation2]   ;;  %s8073_s23 = smov [#allocation7]  }
  0xab   : > { %s1195_s2 = sshll.u32 %s8072_s22, 4  ;;  %s1222_s16 = sshll.u32 %s8073_s23, 4  ;;  %s1196_s2 = int_to_ptr.vmem [resolvable:$true] %s1195_s2  ;;  %s1223_s16 = int_to_ptr.vmem [resolvable:$true] %s1222_s16 }
  0xac   : > { %s7157_s9 = scalar_lea.vmem %s1196_s2, 256  ;;  %p7165_p3 = scmp.lt.s32.totalorder %s1196_s2, %s1196_s2 }
  0xad   : > { %p7158_p5 = scmp.ne.s32.totalorder %s1196_s2, %s7157_s9  ;;  %p7166_p2 = scmp.lt.s32.totalorder %s7157_s9, %s7157_s9 }
  0xaf   : > { %p7160_p8 = pnand %p7158_p5, %p8391_p13  ;;  %p7167_p10 = por %p7166_p2, %p7165_p3 }
  0xb1   : > { %p7161_p1 = pneg %p7160_p8 }
  0xb3   : > { %p7168_p6 = pnand %p7167_p10, %p7161_p1 }
  0xb5   : > { %7171 = shalt.err (!%p7168_p6)
}
  0xb6   : > { %s9803_s27 = smov 8   ;;  %s9804_s0 = smov 128  }
  0xb7   : > { %s9805_s5 = sld [smem:[#allocation71_spill]]  ;;  %s7183_s14 = scalar_lea.vmem %s1223_s16, 128 }
  0xb8   : > { %p7184_p4 = scmp.ne.s32.totalorder %s1223_s16, %s7183_s14  ;;  %p7191_p9 = scmp.lt.s32.totalorder %s1223_s16, %s1223_s16 }
  0xb9   : > { %p7192_p0 = scmp.lt.s32.totalorder %s7183_s14, %s7183_s14 }
  0xba   : > { %p7186_p7 = pnand %p7184_p4, %p8391_p13 }
  0xbb   : > { %p7193_p5 = por %p7192_p0, %p7191_p9 }
  0xbc   : > { %p7187_p11 = pneg %p7186_p7 }
  0xbd   : > { %6775 = dma.hbm_to_vmem [thread:$0]  (!%p8385_p12), %s9805_s5, 256, %s1196_s2, [#allocation3], %s9804_s0, %s9804_s0, %s9803_s27  }
  0xbe   : > { %p7194_p8 = pnand %p7193_p5, %p7187_p11 }
  0xc0   : > { %7197 = shalt.err (!%p7194_p8)
}
  0xc1   : > { %s9806_s13 = sld [smem:[#allocation73_spill]]  ;;  %s8074_s9 = smov [#allocation10]  }
  0xc2   : > { %s1247_s22 = sshll.u32 %s8074_s9, 4  ;;  %s8075_s2 = smov [#allocation13]   ;;  %s1248_s22 = int_to_ptr.vmem [resolvable:$true] %s1247_s22 }
  0xc3   : > { %s1269_s23 = sshll.u32 %s8075_s2, 4  ;;  %s7209_s27 = scalar_lea.vmem %s1248_s22, 16  ;;  %s1270_s23 = int_to_ptr.vmem [resolvable:$true] %s1269_s23 }
  0xc4   : > { %p7210_p1 = scmp.ne.s32.totalorder %s1248_s22, %s7209_s27  ;;  %s7216_s0 = scalar_lea.vmem %s1248_s22, 32 }
  0xc5   : > { %p7217_p10 = scmp.lt.s32.totalorder %s1248_s22, %s1248_s22  ;;  %p7218_p6 = scmp.lt.s32.totalorder %s7216_s0, %s7209_s27 }
  0xc6   : > { %p7212_p3 = pnand %p7210_p1, %p8391_p13 }
  0xc7   : > { %6781 = dma.hbm_to_vmem [thread:$0]  (!%p8385_p12), %s9806_s13, 128, %s1223_s16, [#allocation6]  }
  0xc8   : > { %p7213_p2 = pneg %p7212_p3  ;;  %p7219_p4 = por %p7218_p6, %p7217_p10 }
  0xca   : > { %p7220_p7 = pnand %p7219_p4, %p7213_p2 }
  0xcc   : > { %7223 = shalt.err (!%p7220_p7)
}
  0xcd   : > { %s9807_s25 = sld [smem:[#allocation76_spill]]  ;;  %s7235_s16 = scalar_lea.vmem %s1270_s23, 16 }
  0xce   : > { %p7236_p11 = scmp.ne.s32.totalorder %s1270_s23, %s7235_s16  ;;  %s7242_s14 = scalar_lea.vmem %s1270_s23, 32 }
  0xcf   : > { %p7243_p5 = scmp.lt.s32.totalorder %s1270_s23, %s1270_s23  ;;  %p7244_p8 = scmp.lt.s32.totalorder %s7242_s14, %s7235_s16 }
  0xd0   : > { %p7238_p9 = pnand %p7236_p11, %p8391_p13 }
  0xd1   : > { %p7245_p1 = por %p7244_p8, %p7243_p5 }
  0xd2   : > { %p7239_p0 = pneg %p7238_p9 }
  0xd3   : > { %6787 = dma.hbm_to_vmem [thread:$0]  (!%p8385_p12), %s9807_s25, 16, %s1248_s22, [#allocation9]  }
  0xd4   : > { %p7246_p3 = pnand %p7245_p1, %p7239_p0 }
  0xd6   : > { %7249 = shalt.err (!%p7246_p3)
}
  0xd7   : > { %s9808_s3 = sld [smem:[#allocation77_spill]]  ;;  %p6062_p2 = scmp.ge.s32.totalorder %s8024_s11, 2 }
  0xd8   : > { %s8438_s30 = sand.u32 (!%p6062_p2), 1, %s8024_s11   ;;  %s8441_s9 = sand.u32 (!%p6062_p2), 1, %s8020_s10  }
  0xd9   : > { %1276 = sbr.rel (%p6062_p2) target bundleno = 842 (0x34a), region = 48  ;;  %s8444_s18 = sshll.u32 (!%p6062_p2), %s8441_s9, 4 }
  0xda   : > { %s8447_s22 = sshll.u32 (!%p6062_p2), %s8024_s11, 8  ;;  %s8457_s0 = sshll.u32 (!%p6062_p2), %s8024_s11, 4 }
  0xdb   : > { %s8451_s2 = scalar_lea.hbm (!%p6062_p2), %s9793_s8, %s8447_s22  ;;  %p9809_p13 = scmp.ne.s32.totalorder (!%p6062_p2), %s9796_s26, 0 }
  0xdc   : > { %s7250_s14 = scalar_lea.hbm (!%p6062_p2), %s8451_s2, 256  ;;  %p7255_p4 = scmp.lt.s32.totalorder (!%p6062_p2), %s8451_s2, %s9793_s8 }
  0xdd   : > { %6793 = dma.hbm_to_vmem [thread:$0]  (!%p8385_p12), %s9808_s3, 16, %s1270_s23, [#allocation12]  }
  0xde   : > { %s1284_s23 = scalar_lea.vmem [#allocation14], %s8444_s18  ;;  %p7251_p12 = scmp.ne.s32.totalorder %s8451_s2, %s7250_s14 }
  0xdf   : > { %s1291_s27 = sshll.u32 %s1284_s23, 4  ;;  %s7254_s3 = scalar_lea.hbm %s9793_s8, 512  ;;  %s8454_s27 = int_to_ptr.vmem [resolvable:$true] %s1291_s27 }
  0xe0   : > { %p7252_p10 = pnand %p7251_p12, %p9809_p13  ;;  %p7256_p7 = scmp.lt.s32.totalorder %s7254_s3, %s7250_s14 }
  0xe2   : > { %p7253_p6 = pneg %p7252_p10  ;;  %p7257_p11 = por %p7256_p7, %p7255_p4 }
  0xe4   : > { %p7258_p9 = pnand %p7257_p11, %p7253_p6 }
  0xe6   : > { %7261 = shalt.err (!%p7258_p9)
}
  0xe7   : > { %s7262_s23 = scalar_lea.vmem %s8454_s27, 256  ;;  %s8076_s16 = smov [#allocation14]  }
  0xe8   : > { %p7263_p0 = scmp.ne.s32.totalorder %s8454_s27, %s7262_s23  ;;  %s7266_s5 = sshll.u32 %s8076_s16, 4  ;;  %s7267_s5 = int_to_ptr.vmem [resolvable:$false] %s7266_s5 }
  0xe9   : > { %s7268_s13 = scalar_lea.vmem %s7267_s5, 512  ;;  %p7269_p1 = scmp.lt.s32.totalorder %s8454_s27, %s7267_s5 }
  0xea   : > { %p7264_p5 = pnand %p7263_p0, %p9809_p13  ;;  %p7270_p3 = scmp.lt.s32.totalorder %s7268_s13, %s7262_s23 }
  0xec   : > { %p7265_p8 = pneg %p7264_p5  ;;  %p7271_p2 = por %p7270_p3, %p7269_p1 }
  0xee   : > { %p7272_p12 = pnand %p7271_p2, %p7265_p8 }
  0xf0   : > { %7275 = shalt.err (!%p7272_p12)
}
  0xf1   : > { %s9713_s3 = smov 64   ;;  %s9715_s16 = smov 4  }
  0xf2   : > { %s9810_s5 = scalar_lea.sflag [#allocation15], %s8438_s30  ;;  %s8483_s13 = scalar_lea.hbm %s8177_s24, %s8457_s0 }
  0xf3   : > { %6702 = dma.hbm_to_vmem [thread:$0]  (%p9809_p13), %s8451_s2, 256, %s8454_s27, %s9810_s5, %s9713_s3, %s9713_s3, %s9715_s16  }
  0xf4   : > { %s1329_s14 = scalar_lea.vmem [#allocation17], %s8441_s9  ;;  %s9722_s8 = scalar_lea.sflag [#allocation18], %s8438_s30 }
  0xf5   : > { %s1336_s23 = sshll.u32 %s1329_s14, 4  ;;  %s7276_s17 = scalar_lea.hbm %s8483_s13, 16  ;;  %s1337_s23 = int_to_ptr.vmem [resolvable:$true] %s1336_s23 }
  0xf6   : > { %p7277_p10 = scmp.ne.s32.totalorder %s8483_s13, %s7276_s17  ;;  %s7280_s25 = scalar_lea.hbm %s8177_s24, 32 }
  0xf7   : > { %p7281_p7 = scmp.lt.s32.totalorder %s8483_s13, %s8177_s24  ;;  %p7282_p11 = scmp.lt.s32.totalorder %s7280_s25, %s7276_s17 }
  0xf8   : > { %p7278_p6 = pnand %p7277_p10, %p9809_p13 }
  0xf9   : > { %p7283_p9 = por %p7282_p11, %p7281_p7 }
  0xfa   : > { %p7279_p4 = pneg %p7278_p6 }
  0xfc   : > { %p7284_p0 = pnand %p7283_p9, %p7279_p4 }
  0xfe   : > { %7287 = shalt.err (!%p7284_p0)
}
  0xff   : > { %s7288_s2 = scalar_lea.vmem %s1337_s23, 16  ;;  %s8079_s27 = smov [#allocation17]  }
 0x100   : > { %p7289_p5 = scmp.ne.s32.totalorder %s1337_s23, %s7288_s2  ;;  %s7292_s5 = sshll.u32 %s8079_s27, 4  ;;  %s7293_s5 = int_to_ptr.vmem [resolvable:$false] %s7292_s5 }
 0x101   : > { %s7294_s14 = scalar_lea.vmem %s7293_s5, 32  ;;  %p7295_p3 = scmp.lt.s32.totalorder %s1337_s23, %s7293_s5 }
 0x102   : > { %p7290_p8 = pnand %p7289_p5, %p9809_p13  ;;  %p7296_p2 = scmp.lt.s32.totalorder %s7294_s14, %s7288_s2 }
 0x104   : > { %p7291_p1 = pneg %p7290_p8  ;;  %p7297_p12 = por %p7296_p2, %p7295_p3 }
 0x106   : > { %p7298_p10 = pnand %p7297_p12, %p7291_p1 }
 0x108   : > { %7301 = shalt.err (!%p7298_p10)
}
 0x109   : > { %6704 = dma.hbm_to_vmem [thread:$0]  (%p9809_p13), %s8483_s13, 16, %s1337_s23, %s9722_s8  }
 0x10a   : > { %s8503_s17 = scalar_lea.hbm %s9789_s20, %s8457_s0  ;;  %s1379_s25 = scalar_lea.vmem [#allocation20], %s8441_s9 }
 0x10b   : > { %s1386_s2 = sshll.u32 %s1379_s25, 4  ;;  %s9720_s27 = scalar_lea.sflag [#allocation21], %s8438_s30  ;;  %s1387_s2 = int_to_ptr.vmem [resolvable:$true] %s1386_s2 }
 0x10c   : > { %s7302_s5 = scalar_lea.hbm %s8503_s17, 16  ;;  %s7306_s14 = scalar_lea.hbm %s9789_s20, 32 }
 0x10d   : > { %p7303_p6 = scmp.ne.s32.totalorder %s8503_s17, %s7302_s5  ;;  %p7307_p11 = scmp.lt.s32.totalorder %s8503_s17, %s9789_s20 }
 0x10e   : > { %p7308_p9 = scmp.lt.s32.totalorder %s7306_s14, %s7302_s5 }
 0x10f   : > { %p7304_p4 = pnand %p7303_p6, %p9809_p13 }
 0x110   : > { %p7309_p0 = por %p7308_p9, %p7307_p11 }
 0x111   : > { %p7305_p7 = pneg %p7304_p4 }
 0x113   : > { %p7310_p5 = pnand %p7309_p0, %p7305_p7 }
 0x115   : > { %7313 = shalt.err (!%p7310_p5)
}
 0x116   : > { %s7314_s13 = scalar_lea.vmem %s1387_s2, 16  ;;  %s8080_s23 = smov [#allocation20]  }
 0x117   : > { %p7315_p8 = scmp.ne.s32.totalorder %s1387_s2, %s7314_s13  ;;  %s7318_s25 = sshll.u32 %s8080_s23, 4  ;;  %s7319_s25 = int_to_ptr.vmem [resolvable:$false] %s7318_s25 }
 0x118   : > { %s7320_s3 = scalar_lea.vmem %s7319_s25, 32  ;;  %p7321_p2 = scmp.lt.s32.totalorder %s1387_s2, %s7319_s25 }
 0x119   : > { %p7316_p1 = pnand %p7315_p8, %p9809_p13  ;;  %p7322_p12 = scmp.lt.s32.totalorder %s7320_s3, %s7314_s13 }
 0x11b   : > { %p7317_p3 = pneg %p7316_p1  ;;  %p7323_p10 = por %p7322_p12, %p7321_p2 }
 0x11d   : > { %p7324_p6 = pnand %p7323_p10, %p7317_p3 }
 0x11f   : > { %7327 = shalt.err (!%p7324_p6)
}
 0x120   : > { %6706 = dma.hbm_to_vmem [thread:$0]  (%p9809_p13), %s8503_s17, 16, %s1387_s2, %s9720_s27  }
 0x121   : > { %s8523_s5 = scalar_lea.hbm %s9792_s4, %s8457_s0  ;;  %s1413_s3 = scalar_lea.vmem [#allocation23], %s8441_s9 }
 0x122   : > { %s1420_s14 = sshll.u32 %s1413_s3, 4  ;;  %s9717_s13 = scalar_lea.sflag [#allocation24], %s8438_s30  ;;  %s1421_s14 = int_to_ptr.vmem [resolvable:$true] %s1420_s14 }
 0x123   : > { %s7328_s23 = scalar_lea.hbm %s8523_s5, 16  ;;  %s7332_s25 = scalar_lea.hbm %s9792_s4, 32 }
 0x124   : > { %p7329_p4 = scmp.ne.s32.totalorder %s8523_s5, %s7328_s23  ;;  %p7333_p9 = scmp.lt.s32.totalorder %s8523_s5, %s9792_s4 }
 0x125   : > { %p7334_p0 = scmp.lt.s32.totalorder %s7332_s25, %s7328_s23 }
 0x126   : > { %p7330_p7 = pnand %p7329_p4, %p9809_p13 }
 0x127   : > { %p7335_p5 = por %p7334_p0, %p7333_p9 }
 0x128   : > { %p7331_p11 = pneg %p7330_p7 }
 0x12a   : > { %p7336_p8 = pnand %p7335_p5, %p7331_p11 }
 0x12c   : > { %7339 = shalt.err (!%p7336_p8)
}
 0x12d   : > { %s7340_s17 = scalar_lea.vmem %s1421_s14, 16  ;;  %s8081_s2 = smov [#allocation23]  }
 0x12e   : > { %p7341_p1 = scmp.ne.s32.totalorder %s1421_s14, %s7340_s17  ;;  %s7344_s3 = sshll.u32 %s8081_s2, 4  ;;  %s7345_s3 = int_to_ptr.vmem [resolvable:$false] %s7344_s3 }
 0x12f   : > { %s7346_s16 = scalar_lea.vmem %s7345_s3, 32  ;;  %p7347_p12 = scmp.lt.s32.totalorder %s1421_s14, %s7345_s3 }
 0x130   : > { %p7342_p3 = pnand %p7341_p1, %p9809_p13  ;;  %p7348_p10 = scmp.lt.s32.totalorder %s7346_s16, %s7340_s17 }
 0x132   : > { %p7343_p2 = pneg %p7342_p3  ;;  %p7349_p6 = por %p7348_p10, %p7347_p12 }
 0x134   : > { %p7350_p4 = pnand %p7349_p6, %p7343_p2 }
 0x136   : > { %7353 = shalt.err (!%p7350_p4)
}
 0x137   : > { %6708 = dma.hbm_to_vmem [thread:$0]  (%p9809_p13), %s8523_s5, 16, %s1421_s14, %s9717_s13  }
 0x138   : > { %s8543_s23 = scalar_lea.hbm %s9791_s12, %s8457_s0  ;;  %s1451_s16 = scalar_lea.vmem [#allocation26], %s8441_s9 }
 0x139   : > { %s1458_s25 = sshll.u32 %s1451_s16, 4  ;;  %s9718_s17 = scalar_lea.sflag [#allocation27], %s8438_s30  ;;  %s1459_s25 = int_to_ptr.vmem [resolvable:$true] %s1458_s25 }
 0x13a   : > { %s7354_s2 = scalar_lea.hbm %s8543_s23, 16  ;;  %s7358_s3 = scalar_lea.hbm %s9791_s12, 32 }
 0x13b   : > { %p7355_p7 = scmp.ne.s32.totalorder %s8543_s23, %s7354_s2  ;;  %p7359_p0 = scmp.lt.s32.totalorder %s8543_s23, %s9791_s12 }
 0x13c   : > { %p7360_p5 = scmp.lt.s32.totalorder %s7358_s3, %s7354_s2 }
 0x13d   : > { %p7356_p11 = pnand %p7355_p7, %p9809_p13 }
 0x13e   : > { %p7361_p8 = por %p7360_p5, %p7359_p0 }
 0x13f   : > { %p7357_p9 = pneg %p7356_p11 }
 0x141   : > { %p7362_p1 = pnand %p7361_p8, %p7357_p9 }
 0x143   : > { %7365 = shalt.err (!%p7362_p1)
}
 0x144   : > { %s7366_s5 = scalar_lea.vmem %s1459_s25, 16  ;;  %s8082_s14 = smov [#allocation26]  }
 0x145   : > { %p7367_p3 = scmp.ne.s32.totalorder %s1459_s25, %s7366_s5  ;;  %s7370_s16 = sshll.u32 %s8082_s14, 4  ;;  %s7371_s16 = int_to_ptr.vmem [resolvable:$false] %s7370_s16 }
 0x146   : > { %s7372_s13 = scalar_lea.vmem %s7371_s16, 32  ;;  %p7373_p10 = scmp.lt.s32.totalorder %s1459_s25, %s7371_s16 }
 0x147   : > { %p7368_p2 = pnand %p7367_p3, %p9809_p13  ;;  %p7374_p6 = scmp.lt.s32.totalorder %s7372_s13, %s7366_s5 }
 0x149   : > { %p7369_p12 = pneg %p7368_p2  ;;  %p7375_p4 = por %p7374_p6, %p7373_p10 }
 0x14b   : > { %p7376_p7 = pnand %p7375_p4, %p7369_p12 }
 0x14d   : > { %7379 = shalt.err (!%p7376_p7)
}
 0x14e   : > { %6710 = dma.hbm_to_vmem [thread:$0]  (%p9809_p13), %s8543_s23, 16, %s1459_s25, %s9718_s17  }
 0x14f   : > { %s8563_s2 = scalar_lea.hbm %s9788_s21, %s8457_s0  ;;  %s1493_s13 = scalar_lea.vmem [#allocation29], %s8441_s9 }
 0x150   : > { %s1500_s3 = sshll.u32 %s1493_s13, 4  ;;  %s9719_s5 = scalar_lea.sflag [#allocation30], %s8438_s30  ;;  %s1501_s3 = int_to_ptr.vmem [resolvable:$true] %s1500_s3 }
 0x151   : > { %s7380_s14 = scalar_lea.hbm %s8563_s2, 16  ;;  %s7384_s16 = scalar_lea.hbm %s9788_s21, 32 }
 0x152   : > { %p7381_p11 = scmp.ne.s32.totalorder %s8563_s2, %s7380_s14  ;;  %p7385_p5 = scmp.lt.s32.totalorder %s8563_s2, %s9788_s21 }
 0x153   : > { %p7386_p8 = scmp.lt.s32.totalorder %s7384_s16, %s7380_s14 }
 0x154   : > { %p7382_p9 = pnand %p7381_p11, %p9809_p13 }
 0x155   : > { %p7387_p1 = por %p7386_p8, %p7385_p5 }
 0x156   : > { %p7383_p0 = pneg %p7382_p9 }
 0x158   : > { %p7388_p3 = pnand %p7387_p1, %p7383_p0 }
 0x15a   : > { %7391 = shalt.err (!%p7388_p3)
}
 0x15b   : > { %s7392_s23 = scalar_lea.vmem %s1501_s3, 16  ;;  %s8083_s25 = smov [#allocation29]  }
 0x15c   : > { %p7393_p2 = scmp.ne.s32.totalorder %s1501_s3, %s7392_s23  ;;  %s7396_s13 = sshll.u32 %s8083_s25, 4  ;;  %s7397_s13 = int_to_ptr.vmem [resolvable:$false] %s7396_s13 }
 0x15d   : > { %s7398_s17 = scalar_lea.vmem %s7397_s13, 32  ;;  %p7399_p6 = scmp.lt.s32.totalorder %s1501_s3, %s7397_s13 }
 0x15e   : > { %p7394_p12 = pnand %p7393_p2, %p9809_p13  ;;  %p7400_p4 = scmp.lt.s32.totalorder %s7398_s17, %s7392_s23 }
 0x160   : > { %p7395_p10 = pneg %p7394_p12  ;;  %p7401_p7 = por %p7400_p4, %p7399_p6 }
 0x162   : > { %p7402_p11 = pnand %p7401_p7, %p7395_p10 }
 0x164   : > { %7405 = shalt.err (!%p7402_p11)
}
 0x165   : > { %6712 = dma.hbm_to_vmem [thread:$0]  (%p9809_p13), %s8563_s2, 16, %s1501_s3, %s9719_s5  }
 0x166   : > { %s8583_s14 = scalar_lea.hbm %s9790_s19, %s8457_s0  ;;  %s1535_s17 = scalar_lea.vmem [#allocation32], %s8441_s9 }
 0x167   : > { %s1542_s16 = sshll.u32 %s1535_s17, 4  ;;  %s9721_s23 = scalar_lea.sflag [#allocation33], %s8438_s30  ;;  %s1543_s16 = int_to_ptr.vmem [resolvable:$true] %s1542_s16 }
 0x168   : > { %s7406_s25 = scalar_lea.hbm %s8583_s14, 16  ;;  %s7410_s13 = scalar_lea.hbm %s9790_s19, 32 }
 0x169   : > { %p7407_p9 = scmp.ne.s32.totalorder %s8583_s14, %s7406_s25  ;;  %p7411_p8 = scmp.lt.s32.totalorder %s8583_s14, %s9790_s19 }
 0x16a   : > { %p7412_p1 = scmp.lt.s32.totalorder %s7410_s13, %s7406_s25 }
 0x16b   : > { %p7408_p0 = pnand %p7407_p9, %p9809_p13 }
 0x16c   : > { %p7413_p3 = por %p7412_p1, %p7411_p8 }
 0x16d   : > { %p7409_p5 = pneg %p7408_p0 }
 0x16f   : > { %p7414_p2 = pnand %p7413_p3, %p7409_p5 }
 0x171   : > { %7417 = shalt.err (!%p7414_p2)
}
 0x172   : > { %s7418_s2 = scalar_lea.vmem %s1543_s16, 16  ;;  %s8084_s3 = smov [#allocation32]  }
 0x173   : > { %p7419_p12 = scmp.ne.s32.totalorder %s1543_s16, %s7418_s2  ;;  %s7422_s17 = sshll.u32 %s8084_s3, 4  ;;  %s7423_s17 = int_to_ptr.vmem [resolvable:$false] %s7422_s17 }
 0x174   : > { %s7424_s5 = scalar_lea.vmem %s7423_s17, 32  ;;  %p7425_p4 = scmp.lt.s32.totalorder %s1543_s16, %s7423_s17 }
 0x175   : > { %p7420_p10 = pnand %p7419_p12, %p9809_p13  ;;  %p7426_p7 = scmp.lt.s32.totalorder %s7424_s5, %s7418_s2 }
 0x177   : > { %p7421_p6 = pneg %p7420_p10  ;;  %p7427_p11 = por %p7426_p7, %p7425_p4 }
 0x179   : > { %p7428_p9 = pnand %p7427_p11, %p7421_p6 }
 0x17b   : > { %7431 = shalt.err (!%p7428_p9)
}
 0x17c   : > { %s9811_s25 = sld [smem:[#allocation96_spill]]  ;;  %s1573_s5 = scalar_lea.vmem [#allocation35], %s8441_s9 }
 0x17d   : > { %6714 = dma.hbm_to_vmem [thread:$0]  (%p9809_p13), %s8583_s14, 16, %s1543_s16, %s9721_s23  }
 0x17e   : > { %s1580_s2 = sshll.u32 %s1573_s5, 4  ;;  %s9723_s3 = scalar_lea.sflag [#allocation36], %s8438_s30  ;;  %s1581_s2 = int_to_ptr.vmem [resolvable:$true] %s1580_s2 }
 0x182   : > { %s8603_s13 = scalar_lea.hbm %s9811_s25, %s8457_s0  ;;  %s7436_s27 = scalar_lea.hbm %s9811_s25, 32 }
 0x183   : > { %s7432_s17 = scalar_lea.hbm %s8603_s13, 16  ;;  %p7437_p1 = scmp.lt.s32.totalorder %s8603_s13, %s9811_s25 }
 0x184   : > { %p7433_p0 = scmp.ne.s32.totalorder %s8603_s13, %s7432_s17  ;;  %p7438_p3 = scmp.lt.s32.totalorder %s7436_s27, %s7432_s17 }
 0x186   : > { %p7434_p5 = pnand %p7433_p0, %p9809_p13  ;;  %p7439_p2 = por %p7438_p3, %p7437_p1 }
 0x188   : > { %p7435_p8 = pneg %p7434_p5 }
 0x18a   : > { %p7440_p12 = pnand %p7439_p2, %p7435_p8 }
 0x18c   : > { %7443 = shalt.err (!%p7440_p12)
}
 0x18d   : > { %s7444_s14 = scalar_lea.vmem %s1581_s2, 16  ;;  %s8085_s16 = smov [#allocation35]  }
 0x18e   : > { %p7445_p10 = scmp.ne.s32.totalorder %s1581_s2, %s7444_s14  ;;  %s7448_s5 = sshll.u32 %s8085_s16, 4  ;;  %s7449_s5 = int_to_ptr.vmem [resolvable:$false] %s7448_s5 }
 0x18f   : > { %s7450_s23 = scalar_lea.vmem %s7449_s5, 32  ;;  %p7451_p7 = scmp.lt.s32.totalorder %s1581_s2, %s7449_s5 }
 0x190   : > { %p7446_p6 = pnand %p7445_p10, %p9809_p13  ;;  %p7452_p11 = scmp.lt.s32.totalorder %s7450_s23, %s7444_s14 }
 0x192   : > { %p7447_p4 = pneg %p7446_p6  ;;  %p7453_p9 = por %p7452_p11, %p7451_p7 }
 0x194   : > { %p7454_p0 = pnand %p7453_p9, %p7447_p4 }
 0x196   : > { %7457 = shalt.err (!%p7454_p0)
}
 0x197   : > { %s9812_s27 = sld [smem:[#allocation98_spill]]  ;;  %s1611_s23 = scalar_lea.vmem [#allocation38], %s8441_s9 }
 0x198   : > { %6716 = dma.hbm_to_vmem [thread:$0]  (%p9809_p13), %s8603_s13, 16, %s1581_s2, %s9723_s3  }
 0x199   : > { %s1618_s14 = sshll.u32 %s1611_s23, 4  ;;  %s9725_s16 = scalar_lea.sflag [#allocation39], %s8438_s30  ;;  %s1619_s14 = int_to_ptr.vmem [resolvable:$true] %s1618_s14 }
 0x19d   : > { %s8623_s17 = scalar_lea.hbm %s9812_s27, %s8457_s0  ;;  %s7462_s8 = scalar_lea.hbm %s9812_s27, 32 }
 0x19e   : > { %s7458_s5 = scalar_lea.hbm %s8623_s17, 16  ;;  %p7463_p3 = scmp.lt.s32.totalorder %s8623_s17, %s9812_s27 }
 0x19f   : > { %p7459_p5 = scmp.ne.s32.totalorder %s8623_s17, %s7458_s5  ;;  %p7464_p2 = scmp.lt.s32.totalorder %s7462_s8, %s7458_s5 }
 0x1a1   : > { %p7460_p8 = pnand %p7459_p5, %p9809_p13  ;;  %p7465_p12 = por %p7464_p2, %p7463_p3 }
 0x1a3   : > { %p7461_p1 = pneg %p7460_p8 }
 0x1a5   : > { %p7466_p10 = pnand %p7465_p12, %p7461_p1 }
 0x1a7   : > { %7469 = shalt.err (!%p7466_p10)
}
 0x1a8   : > { %s7470_s13 = scalar_lea.vmem %s1619_s14, 16  ;;  %s8086_s2 = smov [#allocation38]  }
 0x1a9   : > { %p7471_p6 = scmp.ne.s32.totalorder %s1619_s14, %s7470_s13  ;;  %s7474_s23 = sshll.u32 %s8086_s2, 4  ;;  %s7475_s23 = int_to_ptr.vmem [resolvable:$false] %s7474_s23 }
 0x1aa   : > { %s7476_s3 = scalar_lea.vmem %s7475_s23, 32  ;;  %p7477_p11 = scmp.lt.s32.totalorder %s1619_s14, %s7475_s23 }
 0x1ab   : > { %p7472_p4 = pnand %p7471_p6, %p9809_p13  ;;  %p7478_p9 = scmp.lt.s32.totalorder %s7476_s3, %s7470_s13 }
 0x1ad   : > { %p7473_p7 = pneg %p7472_p4  ;;  %p7479_p0 = por %p7478_p9, %p7477_p11 }
 0x1af   : > { %p7480_p5 = pnand %p7479_p0, %p7473_p7 }
 0x1b1   : > { %7483 = shalt.err (!%p7480_p5)
}
 0x1b2   : > { %s9813_s8 = sld [smem:[#allocation100_spill]]  ;;  %s1649_s3 = scalar_lea.vmem [#allocation41], %s8441_s9 }
 0x1b3   : > { %6718 = dma.hbm_to_vmem [thread:$0]  (%p9809_p13), %s8623_s17, 16, %s1619_s14, %s9725_s16  }
 0x1b4   : > { %s1656_s13 = sshll.u32 %s1649_s3, 4  ;;  %s9727_s2 = scalar_lea.sflag [#allocation42], %s8438_s30  ;;  %s1657_s13 = int_to_ptr.vmem [resolvable:$true] %s1656_s13 }
 0x1b8   : > { %s8643_s5 = scalar_lea.hbm %s9813_s8, %s8457_s0  ;;  %s7488_s4 = scalar_lea.hbm %s9813_s8, 32 }
 0x1b9   : > { %s7484_s23 = scalar_lea.hbm %s8643_s5, 16  ;;  %p7489_p2 = scmp.lt.s32.totalorder %s8643_s5, %s9813_s8 }
 0x1ba   : > { %p7485_p8 = scmp.ne.s32.totalorder %s8643_s5, %s7484_s23  ;;  %p7490_p12 = scmp.lt.s32.totalorder %s7488_s4, %s7484_s23 }
 0x1bc   : > { %p7486_p1 = pnand %p7485_p8, %p9809_p13  ;;  %p7491_p10 = por %p7490_p12, %p7489_p2 }
 0x1be   : > { %p7487_p3 = pneg %p7486_p1 }
 0x1c0   : > { %p7492_p6 = pnand %p7491_p10, %p7487_p3 }
 0x1c2   : > { %7495 = shalt.err (!%p7492_p6)
}
 0x1c3   : > { %s7496_s17 = scalar_lea.vmem %s1657_s13, 16  ;;  %s8087_s14 = smov [#allocation41]  }
 0x1c4   : > { %p7497_p4 = scmp.ne.s32.totalorder %s1657_s13, %s7496_s17  ;;  %s7500_s3 = sshll.u32 %s8087_s14, 4  ;;  %s7501_s3 = int_to_ptr.vmem [resolvable:$false] %s7500_s3 }
 0x1c5   : > { %s7502_s16 = scalar_lea.vmem %s7501_s3, 32  ;;  %p7503_p9 = scmp.lt.s32.totalorder %s1657_s13, %s7501_s3 }
 0x1c6   : > { %p7498_p7 = pnand %p7497_p4, %p9809_p13  ;;  %p7504_p0 = scmp.lt.s32.totalorder %s7502_s16, %s7496_s17 }
 0x1c8   : > { %p7499_p11 = pneg %p7498_p7  ;;  %p7505_p5 = por %p7504_p0, %p7503_p9 }
 0x1ca   : > { %p7506_p8 = pnand %p7505_p5, %p7499_p11 }
 0x1cc   : > { %7509 = shalt.err (!%p7506_p8)
}
 0x1cd   : > { %s9814_s4 = sld [smem:[#allocation102_spill]]  ;;  %s1683_s16 = scalar_lea.vmem [#allocation44], %s8441_s9 }
 0x1ce   : > { %6720 = dma.hbm_to_vmem [thread:$0]  (%p9809_p13), %s8643_s5, 16, %s1657_s13, %s9727_s2  }
 0x1cf   : > { %s1690_s17 = sshll.u32 %s1683_s16, 4  ;;  %s9729_s14 = scalar_lea.sflag [#allocation45], %s8438_s30  ;;  %s1691_s17 = int_to_ptr.vmem [resolvable:$true] %s1690_s17 }
 0x1d3   : > { %s8663_s23 = scalar_lea.hbm %s9814_s4, %s8457_s0  ;;  %s7514_s8 = scalar_lea.hbm %s9814_s4, 32 }
 0x1d4   : > { %s7510_s3 = scalar_lea.hbm %s8663_s23, 16  ;;  %p7515_p12 = scmp.lt.s32.totalorder %s8663_s23, %s9814_s4 }
 0x1d5   : > { %p7511_p1 = scmp.ne.s32.totalorder %s8663_s23, %s7510_s3  ;;  %p7516_p10 = scmp.lt.s32.totalorder %s7514_s8, %s7510_s3 }
 0x1d7   : > { %p7512_p3 = pnand %p7511_p1, %p9809_p13  ;;  %p7517_p6 = por %p7516_p10, %p7515_p12 }
 0x1d9   : > { %p7513_p2 = pneg %p7512_p3 }
 0x1db   : > { %p7518_p4 = pnand %p7517_p6, %p7513_p2 }
 0x1dd   : > { %7521 = shalt.err (!%p7518_p4)
}
 0x1de   : > { %s7522_s5 = scalar_lea.vmem %s1691_s17, 16  ;;  %s8088_s13 = smov [#allocation44]  }
 0x1df   : > { %p7523_p7 = scmp.ne.s32.totalorder %s1691_s17, %s7522_s5  ;;  %s7526_s16 = sshll.u32 %s8088_s13, 4  ;;  %s7527_s16 = int_to_ptr.vmem [resolvable:$false] %s7526_s16 }
 0x1e0   : > { %s7528_s2 = scalar_lea.vmem %s7527_s16, 32  ;;  %p7529_p0 = scmp.lt.s32.totalorder %s1691_s17, %s7527_s16 }
 0x1e1   : > { %p7524_p11 = pnand %p7523_p7, %p9809_p13  ;;  %p7530_p5 = scmp.lt.s32.totalorder %s7528_s2, %s7522_s5 }
 0x1e3   : > { %p7525_p9 = pneg %p7524_p11  ;;  %p7531_p8 = por %p7530_p5, %p7529_p0 }
 0x1e5   : > { %p7532_p1 = pnand %p7531_p8, %p7525_p9 }
 0x1e7   : > { %7535 = shalt.err (!%p7532_p1)
}
 0x1e8   : > { %s9815_s8 = sld [smem:[#allocation104_spill]]  ;;  %s1721_s2 = scalar_lea.vmem [#allocation47], %s8441_s9 }
 0x1e9   : > { %6722 = dma.hbm_to_vmem [thread:$0]  (%p9809_p13), %s8663_s23, 16, %s1691_s17, %s9729_s14  }
 0x1ea   : > { %s1728_s5 = sshll.u32 %s1721_s2, 4  ;;  %s9731_s13 = scalar_lea.sflag [#allocation48], %s8438_s30  ;;  %s1729_s5 = int_to_ptr.vmem [resolvable:$true] %s1728_s5 }
 0x1ee   : > { %s8683_s3 = scalar_lea.hbm %s9815_s8, %s8457_s0  ;;  %s7540_s4 = scalar_lea.hbm %s9815_s8, 32 }
 0x1ef   : > { %s7536_s16 = scalar_lea.hbm %s8683_s3, 16  ;;  %p7541_p10 = scmp.lt.s32.totalorder %s8683_s3, %s9815_s8 }
 0x1f0   : > { %p7537_p3 = scmp.ne.s32.totalorder %s8683_s3, %s7536_s16  ;;  %p7542_p6 = scmp.lt.s32.totalorder %s7540_s4, %s7536_s16 }
 0x1f2   : > { %p7538_p2 = pnand %p7537_p3, %p9809_p13  ;;  %p7543_p4 = por %p7542_p6, %p7541_p10 }
 0x1f4   : > { %p7539_p12 = pneg %p7538_p2 }
 0x1f6   : > { %p7544_p7 = pnand %p7543_p4, %p7539_p12 }
 0x1f8   : > { %7547 = shalt.err (!%p7544_p7)
}
 0x1f9   : > { %s7548_s23 = scalar_lea.vmem %s1729_s5, 16  ;;  %s8089_s17 = smov [#allocation47]  }
 0x1fa   : > { %p7549_p11 = scmp.ne.s32.totalorder %s1729_s5, %s7548_s23  ;;  %s7552_s2 = sshll.u32 %s8089_s17, 4  ;;  %s7553_s2 = int_to_ptr.vmem [resolvable:$false] %s7552_s2 }
 0x1fb   : > { %s7554_s14 = scalar_lea.vmem %s7553_s2, 32  ;;  %p7555_p5 = scmp.lt.s32.totalorder %s1729_s5, %s7553_s2 }
 0x1fc   : > { %p7550_p9 = pnand %p7549_p11, %p9809_p13  ;;  %p7556_p8 = scmp.lt.s32.totalorder %s7554_s14, %s7548_s23 }
 0x1fe   : > { %p7551_p0 = pneg %p7550_p9  ;;  %p7557_p1 = por %p7556_p8, %p7555_p5 }
 0x200   : > { %p7558_p3 = pnand %p7557_p1, %p7551_p0 }
 0x202   : > { %7561 = shalt.err (!%p7558_p3)
}
 0x203   : > { %s9816_s4 = sld [smem:[#allocation79_spill]]  ;;  %s1304_s17 = scalar_lea.vmem [#allocation16], %s8441_s9 }
 0x204   : > { %6724 = dma.hbm_to_vmem [thread:$0]  (%p9809_p13), %s8683_s3, 16, %s1729_s5, %s9731_s13  }
 0x205   : > { %s1311_s8 = sshll.u32 %s1304_s17, 4  ;;  %s1312_s8 = int_to_ptr.vmem [resolvable:$true] %s1311_s8 }
 0x209   : > { %s1309_s16 = scalar_lea.hbm %s9816_s4, %s8457_s0  ;;  %s7566_s23 = scalar_lea.hbm %s9816_s4, 32 }
 0x20a   : > { %s7562_s14 = scalar_lea.hbm %s1309_s16, 16  ;;  %p7567_p6 = scmp.lt.s32.totalorder %s1309_s16, %s9816_s4 }
 0x20b   : > { %p7563_p2 = scmp.ne.s32.totalorder %s1309_s16, %s7562_s14  ;;  %p7568_p4 = scmp.lt.s32.totalorder %s7566_s23, %s7562_s14 }
 0x20d   : > { %p7564_p12 = pnand %p7563_p2, %p9809_p13  ;;  %p7569_p7 = por %p7568_p4, %p7567_p6 }
 0x20f   : > { %p7565_p10 = pneg %p7564_p12 }
 0x211   : > { %p7570_p11 = pnand %p7569_p7, %p7565_p10 }
 0x213   : > { %7573 = shalt.err (!%p7570_p11)
}
 0x214   : > { %s7574_s2 = scalar_lea.vmem %s1312_s8, 16  ;;  %s8090_s3 = smov [#allocation16]  }
 0x215   : > { %p7575_p9 = scmp.ne.s32.totalorder %s1312_s8, %s7574_s2  ;;  %s7578_s5 = sshll.u32 %s8090_s3, 4  ;;  %s7579_s5 = int_to_ptr.vmem [resolvable:$false] %s7578_s5 }
 0x216   : > { %s7580_s17 = scalar_lea.vmem %s7579_s5, 32  ;;  %p7581_p8 = scmp.lt.s32.totalorder %s1312_s8, %s7579_s5 }
 0x217   : > { %p7576_p0 = pnand %p7575_p9, %p9809_p13  ;;  %p7582_p1 = scmp.lt.s32.totalorder %s7580_s17, %s7574_s2 }
 0x219   : > { %p7577_p5 = pneg %p7576_p0  ;;  %p7583_p3 = por %p7582_p1, %p7581_p8 }
 0x21b   : > { %p7584_p2 = pnand %p7583_p3, %p7577_p5 }
 0x21d   : > { %7587 = shalt.err (!%p7584_p2)
}
 0x21e   : > { %s9817_s14 = scalar_lea.sflag [#allocation15], %s8438_s30  ;;  %s9818_s23 = sld [smem:[#allocation82_spill]] }
 0x21f   : > { %6703 = dma.hbm_to_vmem [thread:$0]  (%p9809_p13), %s1309_s16, 16, %s1312_s8, %s9817_s14  }
 0x220   : > { %s1354_s3 = scalar_lea.vmem [#allocation19], %s8441_s9 }
 0x221   : > { %s1361_s4 = sshll.u32 %s1354_s3, 4  ;;  %s1362_s4 = int_to_ptr.vmem [resolvable:$true] %s1361_s4 }
 0x224   : > { %s1359_s13 = scalar_lea.hbm %s9818_s23, %s8457_s0  ;;  %s7592_s2 = scalar_lea.hbm %s9818_s23, 32 }
 0x225   : > { %s7588_s5 = scalar_lea.hbm %s1359_s13, 16  ;;  %p7593_p4 = scmp.lt.s32.totalorder %s1359_s13, %s9818_s23 }
 0x226   : > { %p7589_p12 = scmp.ne.s32.totalorder %s1359_s13, %s7588_s5  ;;  %p7594_p7 = scmp.lt.s32.totalorder %s7592_s2, %s7588_s5 }
 0x228   : > { %p7590_p10 = pnand %p7589_p12, %p9809_p13  ;;  %p7595_p11 = por %p7594_p7, %p7593_p4 }
 0x22a   : > { %p7591_p6 = pneg %p7590_p10 }
 0x22c   : > { %p7596_p9 = pnand %p7595_p11, %p7591_p6 }
 0x22e   : > { %7599 = shalt.err (!%p7596_p9)
}
 0x22f   : > { %s7600_s17 = scalar_lea.vmem %s1362_s4, 16  ;;  %s8091_s8 = smov [#allocation19]  }
 0x230   : > { %p7601_p0 = scmp.ne.s32.totalorder %s1362_s4, %s7600_s17  ;;  %s7604_s16 = sshll.u32 %s8091_s8, 4  ;;  %s7605_s16 = int_to_ptr.vmem [resolvable:$false] %s7604_s16 }
 0x231   : > { %s7606_s14 = scalar_lea.vmem %s7605_s16, 32  ;;  %p7607_p1 = scmp.lt.s32.totalorder %s1362_s4, %s7605_s16 }
 0x232   : > { %p7602_p5 = pnand %p7601_p0, %p9809_p13  ;;  %p7608_p3 = scmp.lt.s32.totalorder %s7606_s14, %s7600_s17 }
 0x234   : > { %p7603_p8 = pneg %p7602_p5  ;;  %p7609_p2 = por %p7608_p3, %p7607_p1 }
 0x236   : > { %p7610_p12 = pnand %p7609_p2, %p7603_p8 }
 0x238   : > { %7613 = shalt.err (!%p7610_p12)
}
 0x239   : > { %s9819_s3 = scalar_lea.sflag [#allocation18], %s8438_s30  ;;  %s9820_s5 = sld [smem:[#allocation85_spill]] }
 0x23a   : > { %6705 = dma.hbm_to_vmem [thread:$0]  (%p9809_p13), %s1359_s13, 16, %s1362_s4, %s9819_s3  }
 0x23b   : > { %s1396_s8 = scalar_lea.vmem [#allocation22], %s8441_s9 }
 0x23c   : > { %s1403_s12 = sshll.u32 %s1396_s8, 4  ;;  %s1404_s12 = int_to_ptr.vmem [resolvable:$true] %s1403_s12 }
 0x23f   : > { %s1401_s2 = scalar_lea.hbm %s9820_s5, %s8457_s0  ;;  %s7618_s17 = scalar_lea.hbm %s9820_s5, 32 }
 0x240   : > { %s7614_s16 = scalar_lea.hbm %s1401_s2, 16  ;;  %p7619_p7 = scmp.lt.s32.totalorder %s1401_s2, %s9820_s5 }
 0x241   : > { %p7615_p10 = scmp.ne.s32.totalorder %s1401_s2, %s7614_s16  ;;  %p7620_p11 = scmp.lt.s32.totalorder %s7618_s17, %s7614_s16 }
 0x243   : > { %p7616_p6 = pnand %p7615_p10, %p9809_p13  ;;  %p7621_p9 = por %p7620_p11, %p7619_p7 }
 0x245   : > { %p7617_p4 = pneg %p7616_p6 }
 0x247   : > { %p7622_p0 = pnand %p7621_p9, %p7617_p4 }
 0x249   : > { %7625 = shalt.err (!%p7622_p0)
}
 0x24a   : > { %s7626_s14 = scalar_lea.vmem %s1404_s12, 16  ;;  %s8092_s13 = smov [#allocation22]  }
 0x24b   : > { %p7627_p5 = scmp.ne.s32.totalorder %s1404_s12, %s7626_s14  ;;  %s7630_s4 = sshll.u32 %s8092_s13, 4  ;;  %s7631_s4 = int_to_ptr.vmem [resolvable:$false] %s7630_s4 }
 0x24c   : > { %s7632_s3 = scalar_lea.vmem %s7631_s4, 32  ;;  %p7633_p3 = scmp.lt.s32.totalorder %s1404_s12, %s7631_s4 }
 0x24d   : > { %p7628_p8 = pnand %p7627_p5, %p9809_p13  ;;  %p7634_p2 = scmp.lt.s32.totalorder %s7632_s3, %s7626_s14 }
 0x24f   : > { %p7629_p1 = pneg %p7628_p8  ;;  %p7635_p12 = por %p7634_p2, %p7633_p3 }
 0x251   : > { %p7636_p10 = pnand %p7635_p12, %p7629_p1 }
 0x253   : > { %7639 = shalt.err (!%p7636_p10)
}
 0x254   : > { %s9821_s8 = scalar_lea.sflag [#allocation21], %s8438_s30  ;;  %s9822_s16 = sld [smem:[#allocation87_spill]] }
 0x255   : > { %6707 = dma.hbm_to_vmem [thread:$0]  (%p9809_p13), %s1401_s2, 16, %s1404_s12, %s9821_s8  }
 0x256   : > { %s1431_s14 = scalar_lea.vmem [#allocation25], %s8444_s18 }
 0x257   : > { %s1438_s13 = sshll.u32 %s1431_s14, 4  ;;  %s1439_s13 = int_to_ptr.vmem [resolvable:$true] %s1438_s13 }
 0x25a   : > { %s8742_s17 = scalar_lea.hbm %s9822_s16, %s8447_s22  ;;  %s7644_s3 = scalar_lea.hbm %s9822_s16, 512 }
 0x25b   : > { %s7640_s4 = scalar_lea.hbm %s8742_s17, 256  ;;  %p7645_p11 = scmp.lt.s32.totalorder %s8742_s17, %s9822_s16 }
 0x25c   : > { %p7641_p6 = scmp.ne.s32.totalorder %s8742_s17, %s7640_s4  ;;  %p7646_p9 = scmp.lt.s32.totalorder %s7644_s3, %s7640_s4 }
 0x25e   : > { %p7642_p4 = pnand %p7641_p6, %p9809_p13  ;;  %p7647_p0 = por %p7646_p9, %p7645_p11 }
 0x260   : > { %p7643_p7 = pneg %p7642_p4 }
 0x262   : > { %p7648_p5 = pnand %p7647_p0, %p7643_p7 }
 0x264   : > { %7651 = shalt.err (!%p7648_p5)
}
 0x265   : > { %s7652_s12 = scalar_lea.vmem %s1439_s13, 256  ;;  %s8093_s2 = smov [#allocation25]  }
 0x266   : > { %p7653_p8 = scmp.ne.s32.totalorder %s1439_s13, %s7652_s12  ;;  %s7656_s8 = sshll.u32 %s8093_s2, 4  ;;  %s7657_s8 = int_to_ptr.vmem [resolvable:$false] %s7656_s8 }
 0x267   : > { %s7658_s14 = scalar_lea.vmem %s7657_s8, 512  ;;  %p7659_p2 = scmp.lt.s32.totalorder %s1439_s13, %s7657_s8 }
 0x268   : > { %p7654_p1 = pnand %p7653_p8, %p9809_p13  ;;  %p7660_p12 = scmp.lt.s32.totalorder %s7658_s14, %s7652_s12 }
 0x26a   : > { %p7655_p3 = pneg %p7654_p1  ;;  %p7661_p10 = por %p7660_p12, %p7659_p2 }
 0x26c   : > { %p7662_p6 = pnand %p7661_p10, %p7655_p3 }
 0x26e   : > { %7665 = shalt.err (!%p7662_p6)
}
 0x26f   : > { %s9823_s4 = smov 4   ;;  %s9824_s3 = smov 64  }
 0x270   : > { %s9825_s5 = scalar_lea.sflag [#allocation24], %s8438_s30  ;;  %s9826_s16 = sld [smem:[#allocation90_spill]] }
 0x271   : > { %6709 = dma.hbm_to_vmem [thread:$0]  (%p9809_p13), %s8742_s17, 256, %s1439_s13, %s9825_s5, %s9824_s3, %s9824_s3, %s9823_s4  }
 0x272   : > { %s1476_s12 = scalar_lea.vmem [#allocation28], %s8441_s9 }
 0x273   : > { %s1483_s8 = sshll.u32 %s1476_s12, 4  ;;  %s1484_s8 = int_to_ptr.vmem [resolvable:$true] %s1483_s8 }
 0x276   : > { %s1481_s2 = scalar_lea.hbm %s9826_s16, %s8457_s0  ;;  %s7670_s19 = scalar_lea.hbm %s9826_s16, 32 }
 0x277   : > { %s7666_s14 = scalar_lea.hbm %s1481_s2, 16  ;;  %p7671_p9 = scmp.lt.s32.totalorder %s1481_s2, %s9826_s16 }
 0x278   : > { %p7667_p4 = scmp.ne.s32.totalorder %s1481_s2, %s7666_s14  ;;  %p7672_p0 = scmp.lt.s32.totalorder %s7670_s19, %s7666_s14 }
 0x27a   : > { %p7668_p7 = pnand %p7667_p4, %p9809_p13  ;;  %p7673_p5 = por %p7672_p0, %p7671_p9 }
 0x27c   : > { %p7669_p11 = pneg %p7668_p7 }
 0x27e   : > { %p7674_p8 = pnand %p7673_p5, %p7669_p11 }
 0x280   : > { %7677 = shalt.err (!%p7674_p8)
}
 0x281   : > { %s7678_s20 = scalar_lea.vmem %s1484_s8, 16  ;;  %s8094_s5 = smov [#allocation28]  }
 0x282   : > { %p7679_p1 = scmp.ne.s32.totalorder %s1484_s8, %s7678_s20  ;;  %s7682_s17 = sshll.u32 %s8094_s5, 4  ;;  %s7683_s17 = int_to_ptr.vmem [resolvable:$false] %s7682_s17 }
 0x283   : > { %s7684_s13 = scalar_lea.vmem %s7683_s17, 32  ;;  %p7685_p12 = scmp.lt.s32.totalorder %s1484_s8, %s7683_s17 }
 0x284   : > { %p7680_p3 = pnand %p7679_p1, %p9809_p13  ;;  %p7686_p10 = scmp.lt.s32.totalorder %s7684_s13, %s7678_s20 }
 0x286   : > { %p7681_p2 = pneg %p7680_p3  ;;  %p7687_p6 = por %p7686_p10, %p7685_p12 }
 0x288   : > { %p7688_p4 = pnand %p7687_p6, %p7681_p2 }
 0x28a   : > { %7691 = shalt.err (!%p7688_p4)
}
 0x28b   : > { %s9827_s19 = scalar_lea.sflag [#allocation27], %s8438_s30  ;;  %s9828_s12 = sld [smem:[#allocation92_spill]] }
 0x28c   : > { %6711 = dma.hbm_to_vmem [thread:$0]  (%p9809_p13), %s1481_s2, 16, %s1484_s8, %s9827_s19  }
 0x28d   : > { %s1510_s5 = scalar_lea.vmem [#allocation31], %s8441_s9 }
 0x28e   : > { %s1517_s16 = sshll.u32 %s1510_s5, 4  ;;  %s1518_s16 = int_to_ptr.vmem [resolvable:$true] %s1517_s16 }
 0x291   : > { %s1515_s14 = scalar_lea.hbm %s9828_s12, %s8457_s0  ;;  %s7696_s20 = scalar_lea.hbm %s9828_s12, 32 }
 0x292   : > { %s7692_s17 = scalar_lea.hbm %s1515_s14, 16  ;;  %p7697_p0 = scmp.lt.s32.totalorder %s1515_s14, %s9828_s12 }
 0x293   : > { %p7693_p7 = scmp.ne.s32.totalorder %s1515_s14, %s7692_s17  ;;  %p7698_p5 = scmp.lt.s32.totalorder %s7696_s20, %s7692_s17 }
 0x295   : > { %p7694_p11 = pnand %p7693_p7, %p9809_p13  ;;  %p7699_p8 = por %p7698_p5, %p7697_p0 }
 0x297   : > { %p7695_p9 = pneg %p7694_p11 }
 0x299   : > { %p7700_p1 = pnand %p7699_p8, %p7695_p9 }
 0x29b   : > { %7703 = shalt.err (!%p7700_p1)
}
 0x29c   : > { %s7704_s13 = scalar_lea.vmem %s1518_s16, 16  ;;  %s8095_s2 = smov [#allocation31]  }
 0x29d   : > { %p7705_p3 = scmp.ne.s32.totalorder %s1518_s16, %s7704_s13  ;;  %s7708_s8 = sshll.u32 %s8095_s2, 4  ;;  %s7709_s8 = int_to_ptr.vmem [resolvable:$false] %s7708_s8 }
 0x29e   : > { %s7710_s19 = scalar_lea.vmem %s7709_s8, 32  ;;  %p7711_p10 = scmp.lt.s32.totalorder %s1518_s16, %s7709_s8 }
 0x29f   : > { %p7706_p2 = pnand %p7705_p3, %p9809_p13  ;;  %p7712_p6 = scmp.lt.s32.totalorder %s7710_s19, %s7704_s13 }
 0x2a1   : > { %p7707_p12 = pneg %p7706_p2  ;;  %p7713_p4 = por %p7712_p6, %p7711_p10 }
 0x2a3   : > { %p7714_p7 = pnand %p7713_p4, %p7707_p12 }
 0x2a5   : > { %7717 = shalt.err (!%p7714_p7)
}
 0x2a6   : > { %s9829_s5 = scalar_lea.sflag [#allocation30], %s8438_s30  ;;  %s9830_s17 = sld [smem:[#allocation95_spill]] }
 0x2a7   : > { %6713 = dma.hbm_to_vmem [thread:$0]  (%p9809_p13), %s1515_s14, 16, %s1518_s16, %s9829_s5  }
 0x2a8   : > { %s1553_s13 = scalar_lea.vmem [#allocation34], %s8444_s18 }
 0x2a9   : > { %s1560_s2 = sshll.u32 %s1553_s13, 4  ;;  %s1561_s2 = int_to_ptr.vmem [resolvable:$true] %s1560_s2 }
 0x2ac   : > { %s8790_s20 = scalar_lea.hbm %s9830_s17, %s8447_s22  ;;  %s7722_s19 = scalar_lea.hbm %s9830_s17, 512 }
 0x2ad   : > { %s7718_s8 = scalar_lea.hbm %s8790_s20, 256  ;;  %p7723_p5 = scmp.lt.s32.totalorder %s8790_s20, %s9830_s17 }
 0x2ae   : > { %p7719_p11 = scmp.ne.s32.totalorder %s8790_s20, %s7718_s8  ;;  %p7724_p8 = scmp.lt.s32.totalorder %s7722_s19, %s7718_s8 }
 0x2b0   : > { %p7720_p9 = pnand %p7719_p11, %p9809_p13  ;;  %p7725_p1 = por %p7724_p8, %p7723_p5 }
 0x2b2   : > { %p7721_p0 = pneg %p7720_p9 }
 0x2b4   : > { %p7726_p3 = pnand %p7725_p1, %p7721_p0 }
 0x2b6   : > { %7729 = shalt.err (!%p7726_p3)
}
 0x2b7   : > { %s7730_s16 = scalar_lea.vmem %s1561_s2, 256  ;;  %s8096_s14 = smov [#allocation34]  }
 0x2b8   : > { %p7731_p2 = scmp.ne.s32.totalorder %s1561_s2, %s7730_s16  ;;  %s7734_s5 = sshll.u32 %s8096_s14, 4  ;;  %s7735_s5 = int_to_ptr.vmem [resolvable:$false] %s7734_s5 }
 0x2b9   : > { %s7736_s13 = scalar_lea.vmem %s7735_s5, 512  ;;  %p7737_p6 = scmp.lt.s32.totalorder %s1561_s2, %s7735_s5 }
 0x2ba   : > { %p7732_p12 = pnand %p7731_p2, %p9809_p13  ;;  %p7738_p4 = scmp.lt.s32.totalorder %s7736_s13, %s7730_s16 }
 0x2bc   : > { %p7733_p10 = pneg %p7732_p12  ;;  %p7739_p7 = por %p7738_p4, %p7737_p6 }
 0x2be   : > { %p7740_p11 = pnand %p7739_p7, %p7733_p10 }
 0x2c0   : > { %7743 = shalt.err (!%p7740_p11)
}
 0x2c1   : > { %s9831_s8 = scalar_lea.sflag [#allocation33], %s8438_s30  ;;  %s9832_s19 = sld [smem:[#allocation97_spill]] }
 0x2c2   : > { %6715 = dma.hbm_to_vmem [thread:$0]  (%p9809_p13), %s8790_s20, 256, %s1561_s2, %s9831_s8, %s9824_s3, %s9824_s3, %s9823_s4  }
 0x2c3   : > { %s1591_s14 = scalar_lea.vmem [#allocation37], %s8444_s18  ;;  %s9741_s13 = sshll.u32 %s8441_s9, 5 }
 0x2c4   : > { %s1598_s5 = sshll.u32 %s1591_s14, 4  ;;  %s8815_s5 = int_to_ptr.vmem [resolvable:$true] %s1598_s5 }
 0x2c7   : > { %s8812_s16 = scalar_lea.hbm %s9832_s19, %s8447_s22  ;;  %s7748_s17 = scalar_lea.hbm %s9832_s19, 512 }
 0x2c8   : > { %s7744_s12 = scalar_lea.hbm %s8812_s16, 256  ;;  %p7749_p8 = scmp.lt.s32.totalorder %s8812_s16, %s9832_s19 }
 0x2c9   : > { %p7745_p9 = scmp.ne.s32.totalorder %s8812_s16, %s7744_s12  ;;  %p7750_p1 = scmp.lt.s32.totalorder %s7748_s17, %s7744_s12 }
 0x2cb   : > { %p7746_p0 = pnand %p7745_p9, %p9809_p13  ;;  %p7751_p3 = por %p7750_p1, %p7749_p8 }
 0x2cd   : > { %p7747_p5 = pneg %p7746_p0 }
 0x2cf   : > { %p7752_p2 = pnand %p7751_p3, %p7747_p5 }
 0x2d1   : > { %7755 = shalt.err (!%p7752_p2)
}
 0x2d2   : > { %s7756_s18 = scalar_lea.vmem %s8815_s5, 256  ;;  %s8097_s22 = smov [#allocation37]  }
 0x2d3   : > { %p7757_p12 = scmp.ne.s32.totalorder %s8815_s5, %s7756_s18  ;;  %s7760_s20 = sshll.u32 %s8097_s22, 4  ;;  %s7761_s20 = int_to_ptr.vmem [resolvable:$false] %s7760_s20 }
 0x2d4   : > { %s7762_s2 = scalar_lea.vmem %s7761_s20, 512  ;;  %p7763_p4 = scmp.lt.s32.totalorder %s8815_s5, %s7761_s20 }
 0x2d5   : > { %p7758_p10 = pnand %p7757_p12, %p9809_p13  ;;  %p7764_p7 = scmp.lt.s32.totalorder %s7762_s2, %s7756_s18 }
 0x2d7   : > { %p7759_p6 = pneg %p7758_p10  ;;  %p7765_p11 = por %p7764_p7, %p7763_p4 }
 0x2d9   : > { %p7766_p9 = pnand %p7765_p11, %p7759_p6 }
 0x2db   : > { %7769 = shalt.err (!%p7766_p9)
}
 0x2dc   : > { %s9833_s12 = scalar_lea.sflag [#allocation36], %s8438_s30  ;;  %s9834_s17 = sld [smem:[#allocation99_spill]] }
 0x2dd   : > { %6717 = dma.hbm_to_vmem [thread:$0]  (%p9809_p13), %s8812_s16, 256, %s8815_s5, %s9833_s12, %s9824_s3, %s9824_s3, %s9823_s4  }
 0x2de   : > { %s9742_s8 = sshll.u32 %s8024_s11, 9  ;;  %s1629_s18 = scalar_lea.vmem [#allocation40], %s9741_s13 }
 0x2df   : > { %s1636_s22 = sshll.u32 %s1629_s18, 4  ;;  %s1637_s22 = int_to_ptr.vmem [resolvable:$true] %s1636_s22 }
 0x2e2   : > { %s8843_s14 = scalar_lea.hbm %s9834_s17, %s9742_s8  ;;  %s7774_s2 = scalar_lea.hbm %s9834_s17, 1024 }
 0x2e3   : > { %s7770_s20 = scalar_lea.hbm %s8843_s14, 512  ;;  %p7775_p1 = scmp.lt.s32.totalorder %s8843_s14, %s9834_s17 }
 0x2e4   : > { %p7771_p0 = scmp.ne.s32.totalorder %s8843_s14, %s7770_s20  ;;  %p7776_p3 = scmp.lt.s32.totalorder %s7774_s2, %s7770_s20 }
 0x2e6   : > { %p7772_p5 = pnand %p7771_p0, %p9809_p13  ;;  %p7777_p2 = por %p7776_p3, %p7775_p1 }
 0x2e8   : > { %p7773_p8 = pneg %p7772_p5 }
 0x2ea   : > { %p7778_p12 = pnand %p7777_p2, %p7773_p8 }
 0x2ec   : > { %7781 = shalt.err (!%p7778_p12)
}
 0x2ed   : > { %s7782_s16 = scalar_lea.vmem %s1637_s22, 512  ;;  %s8098_s5 = smov [#allocation40]  }
 0x2ee   : > { %p7783_p10 = scmp.ne.s32.totalorder %s1637_s22, %s7782_s16  ;;  %s7786_s12 = sshll.u32 %s8098_s5, 4  ;;  %s7787_s12 = int_to_ptr.vmem [resolvable:$false] %s7786_s12 }
 0x2ef   : > { %s7788_s18 = scalar_lea.vmem %s7787_s12, 1024  ;;  %p7789_p7 = scmp.lt.s32.totalorder %s1637_s22, %s7787_s12 }
 0x2f0   : > { %p7784_p6 = pnand %p7783_p10, %p9809_p13  ;;  %p7790_p11 = scmp.lt.s32.totalorder %s7788_s18, %s7782_s16 }
 0x2f2   : > { %p7785_p4 = pneg %p7784_p6  ;;  %p7791_p9 = por %p7790_p11, %p7789_p7 }
 0x2f4   : > { %p7792_p0 = pnand %p7791_p9, %p7785_p4 }
 0x2f6   : > { %7795 = shalt.err (!%p7792_p0)
}
 0x2f7   : > { %s9835_s20 = scalar_lea.sflag [#allocation39], %s8438_s30  ;;  %s9836_s2 = sld [smem:[#allocation101_spill]] }
 0x2f8   : > { %6719 = dma.hbm_to_vmem [thread:$0]  (%p9809_p13), %s8843_s14, 512, %s1637_s22, %s9835_s20, %s9824_s3, %s9824_s3, %s9823_s4  }
 0x2f9   : > { %s1666_s16 = scalar_lea.vmem [#allocation43], %s8441_s9 }
 0x2fa   : > { %s1673_s12 = sshll.u32 %s1666_s16, 4  ;;  %s1674_s12 = int_to_ptr.vmem [resolvable:$true] %s1673_s12 }
 0x2fd   : > { %s1671_s5 = scalar_lea.hbm %s9836_s2, %s8457_s0  ;;  %s7800_s13 = scalar_lea.hbm %s9836_s2, 32 }
 0x2fe   : > { %s7796_s18 = scalar_lea.hbm %s1671_s5, 16  ;;  %p7801_p3 = scmp.lt.s32.totalorder %s1671_s5, %s9836_s2 }
 0x2ff   : > { %p7797_p5 = scmp.ne.s32.totalorder %s1671_s5, %s7796_s18  ;;  %p7802_p2 = scmp.lt.s32.totalorder %s7800_s13, %s7796_s18 }
 0x301   : > { %p7798_p8 = pnand %p7797_p5, %p9809_p13  ;;  %p7803_p12 = por %p7802_p2, %p7801_p3 }
 0x303   : > { %p7799_p1 = pneg %p7798_p8 }
 0x305   : > { %p7804_p10 = pnand %p7803_p12, %p7799_p1 }
 0x307   : > { %7807 = shalt.err (!%p7804_p10)
}
 0x308   : > { %s7808_s8 = scalar_lea.vmem %s1674_s12, 16  ;;  %s8099_s14 = smov [#allocation43]  }
 0x309   : > { %p7809_p6 = scmp.ne.s32.totalorder %s1674_s12, %s7808_s8  ;;  %s7812_s22 = sshll.u32 %s8099_s14, 4  ;;  %s7813_s22 = int_to_ptr.vmem [resolvable:$false] %s7812_s22 }
 0x30a   : > { %s7814_s20 = scalar_lea.vmem %s7813_s22, 32  ;;  %p7815_p11 = scmp.lt.s32.totalorder %s1674_s12, %s7813_s22 }
 0x30b   : > { %p7810_p4 = pnand %p7809_p6, %p9809_p13  ;;  %p7816_p9 = scmp.lt.s32.totalorder %s7814_s20, %s7808_s8 }
 0x30d   : > { %p7811_p7 = pneg %p7810_p4  ;;  %p7817_p0 = por %p7816_p9, %p7815_p11 }
 0x30f   : > { %p7818_p5 = pnand %p7817_p0, %p7811_p7 }
 0x311   : > { %7821 = shalt.err (!%p7818_p5)
}
 0x312   : > { %s9837_s13 = scalar_lea.sflag [#allocation42], %s8438_s30  ;;  %s9838_s16 = sld [smem:[#allocation103_spill]] }
 0x313   : > { %6721 = dma.hbm_to_vmem [thread:$0]  (%p9809_p13), %s1671_s5, 16, %s1674_s12, %s9837_s13  }
 0x314   : > { %s9839_s18 = sshll.u32 %s8024_s11, 9  ;;  %s9840_s2 = sshll.u32 %s8441_s9, 5 }
 0x315   : > { %s1701_s8 = scalar_lea.vmem [#allocation46], %s9840_s2 }
 0x316   : > { %s1708_s22 = sshll.u32 %s1701_s8, 4  ;;  %s1709_s22 = int_to_ptr.vmem [resolvable:$true] %s1708_s22 }
 0x318   : > { %s8880_s14 = scalar_lea.hbm %s9838_s16, %s9839_s18  ;;  %s7826_s17 = scalar_lea.hbm %s9838_s16, 1024 }
 0x319   : > { %s7822_s20 = scalar_lea.hbm %s8880_s14, 512  ;;  %p7827_p2 = scmp.lt.s32.totalorder %s8880_s14, %s9838_s16 }
 0x31a   : > { %p7823_p8 = scmp.ne.s32.totalorder %s8880_s14, %s7822_s20  ;;  %p7828_p12 = scmp.lt.s32.totalorder %s7826_s17, %s7822_s20 }
 0x31c   : > { %p7824_p1 = pnand %p7823_p8, %p9809_p13  ;;  %p7829_p10 = por %p7828_p12, %p7827_p2 }
 0x31e   : > { %p7825_p3 = pneg %p7824_p1 }
 0x320   : > { %p7830_p6 = pnand %p7829_p10, %p7825_p3 }
 0x322   : > { %7833 = shalt.err (!%p7830_p6)
}
 0x323   : > { %s7834_s11 = scalar_lea.vmem %s1709_s22, 512  ;;  %s8100_s2 = smov [#allocation46]  }
 0x324   : > { %p7835_p4 = scmp.ne.s32.totalorder %s1709_s22, %s7834_s11  ;;  %s7838_s5 = sshll.u32 %s8100_s2, 4  ;;  %s7839_s5 = int_to_ptr.vmem [resolvable:$false] %s7838_s5 }
 0x325   : > { %s7840_s12 = scalar_lea.vmem %s7839_s5, 1024  ;;  %p7841_p9 = scmp.lt.s32.totalorder %s1709_s22, %s7839_s5 }
 0x326   : > { %p7836_p7 = pnand %p7835_p4, %p9809_p13  ;;  %p7842_p0 = scmp.lt.s32.totalorder %s7840_s12, %s7834_s11 }
 0x328   : > { %p7837_p11 = pneg %p7836_p7  ;;  %p7843_p5 = por %p7842_p0, %p7841_p9 }
 0x32a   : > { %p7844_p8 = pnand %p7843_p5, %p7837_p11 }
 0x32c   : > { %7847 = shalt.err (!%p7844_p8)
}
 0x32d   : > { %s9841_s17 = scalar_lea.sflag [#allocation45], %s8438_s30  ;;  %s9842_s13 = sld [smem:[#allocation106_spill]] }
 0x32e   : > { %6723 = dma.hbm_to_vmem [thread:$0]  (%p9809_p13), %s8880_s14, 512, %s1709_s22, %s9841_s17, %s9824_s3, %s9824_s3, %s9823_s4  }
 0x32f   : > { %s1746_s8 = scalar_lea.vmem [#allocation49], %s8441_s9 }
 0x330   : > { %s1753_s20 = sshll.u32 %s1746_s8, 4  ;;  %s1754_s20 = int_to_ptr.vmem [resolvable:$true] %s1753_s20 }
 0x333   : > { %s1751_s18 = scalar_lea.hbm %s9842_s13, %s8457_s0  ;;  %s7852_s2 = scalar_lea.hbm %s9842_s13, 32 }
 0x334   : > { %s7848_s11 = scalar_lea.hbm %s1751_s18, 16  ;;  %p7853_p12 = scmp.lt.s32.totalorder %s1751_s18, %s9842_s13 }
 0x335   : > { %p7849_p1 = scmp.ne.s32.totalorder %s1751_s18, %s7848_s11  ;;  %p7854_p10 = scmp.lt.s32.totalorder %s7852_s2, %s7848_s11 }
 0x337   : > { %p7850_p3 = pnand %p7849_p1, %p9809_p13  ;;  %p7855_p6 = por %p7854_p10, %p7853_p12 }
 0x339   : > { %p7851_p2 = pneg %p7850_p3 }
 0x33b   : > { %p7856_p4 = pnand %p7855_p6, %p7851_p2 }
 0x33d   : > { %7859 = shalt.err (!%p7856_p4)
}
 0x33e   : > { %s7860_s5 = scalar_lea.vmem %s1754_s20, 16  ;;  %s8101_s9 = smov [#allocation49]  }
 0x33f   : > { %p7861_p7 = scmp.ne.s32.totalorder %s1754_s20, %s7860_s5  ;;  %s7864_s0 = sshll.u32 %s8101_s9, 4  ;;  %s7865_s0 = int_to_ptr.vmem [resolvable:$false] %s7864_s0 }
 0x340   : > { %s7866_s4 = scalar_lea.vmem %s7865_s0, 32  ;;  %p7867_p0 = scmp.lt.s32.totalorder %s1754_s20, %s7865_s0 }
 0x341   : > { %p7862_p11 = pnand %p7861_p7, %p9809_p13  ;;  %p7868_p5 = scmp.lt.s32.totalorder %s7866_s4, %s7860_s5 }
 0x343   : > { %p7863_p9 = pneg %p7862_p11  ;;  %p7869_p8 = por %p7868_p5, %p7867_p0 }
 0x345   : > { %p7870_p1 = pnand %p7869_p8, %p7863_p9 }
 0x347   : > { %7873 = shalt.err (!%p7870_p1)
}
 0x348   : > { %s9843_s3 = scalar_lea.sflag [#allocation48], %s8438_s30 }
 0x349   : > { %6725 = dma.hbm_to_vmem [thread:$0]  (%p9809_p13), %s1751_s18, 16, %s1754_s20, %s9843_s3  }
 0x34a PF: > { %p9844_p3 = scmp.ne.s32.totalorder %s9798_s1, 0 }
 0x34b   : > { %p9845_p2 = scmp.eq.s32.totalorder (!%p9844_p3), %s8348_s15, 0 }
 0x34c   : > { %1774 = sbr.rel (%p9844_p3) target bundleno = 8363 (0x20ab), region = 180 }
 0x351   : > { %7939 = dma.done.wait (%p9845_p2), [#allocation3], 256   ;;  %p9846_p12 = pmov %p9845_p2 }
 0x352   : > { %p9847_p10 = pmov %p9845_p2 }
 0x353   : > { %7941 = vsyncadd (%p9846_p12), [#allocation3], 4294967040 }
 0x354   : > { %7943 = dma.done.wait (%p9847_p10), [#allocation6], 384   ;;  %p9848_p6 = pmov %p9845_p2 }
 0x355   : > { %p9849_p4 = pmov %p9845_p2 }
 0x356   : > { %7945 = vsyncadd (%p9848_p6), [#allocation6], 4294966912 }
 0x357   : > { %7947 = dma.done.wait (%p9849_p4), [#allocation9], 144   ;;  %p9850_p13 = pmov %p9845_p2 }
 0x358   : > { %p9851_p7 = pmov %p9845_p2 }
 0x359   : > { %7949 = vsyncadd (%p9850_p13), [#allocation9], 4294967152 }
 0x35a   : > { %7951 = dma.done.wait (%p9851_p7), [#allocation12], 32   ;;  %p9852_p11 = pmov %p9845_p2 }
 0x35b   : > { %s8933_s26 = sand.u32 1, %s8348_s15   ;;  %s8936_s1 = sand.u32 1, %s8016_s7  }
 0x35c   : > { %7953 = vsyncadd (%p9852_p11), [#allocation12], 4294967264  ;;  %s8939_s30 = sshll.u32 %s8936_s1, 4  ;;  %s1805_s14 = scalar_lea.sflag [#allocation15], %s8933_s26 }
 0x35d   : > { %p9853_p9 = scmp.ne.s32.totalorder %s9797_s28, 0 }
 0x35f   : > { %7955 = dma.done.wait (%p9853_p9), %s1805_s14, 272  }
 0x360   : > { %7957 = vsyncadd (%p9853_p9), %s1805_s14, 4294967024  ;;  %s1822_s17 = scalar_lea.sflag [#allocation18], %s8933_s26 }
 0x361   : > { %7959 = dma.done.wait (%p9853_p9), %s1822_s17, 32  }
 0x362   : > { %7961 = vsyncadd (%p9853_p9), %s1822_s17, 4294967264  ;;  %s1838_s20 = scalar_lea.sflag [#allocation21], %s8933_s26 }
 0x363   : > { %7963 = dma.done.wait (%p9853_p9), %s1838_s20, 32  }
 0x364   : > { %7965 = vsyncadd (%p9853_p9), %s1838_s20, 4294967264  ;;  %s1854_s5 = scalar_lea.sflag [#allocation24], %s8933_s26 }
 0x365   : > { %7967 = dma.done.wait (%p9853_p9), %s1854_s5, 272  }
 0x366   : > { %7969 = vsyncadd (%p9853_p9), %s1854_s5, 4294967024  ;;  %s1871_s4 = scalar_lea.sflag [#allocation27], %s8933_s26 }
 0x367   : > { %7971 = dma.done.wait (%p9853_p9), %s1871_s4, 32  }
 0x368   : > { %7973 = vsyncadd (%p9853_p9), %s1871_s4, 4294967264  ;;  %s1887_s17 = scalar_lea.sflag [#allocation30], %s8933_s26 }
 0x369   : > { %7975 = dma.done.wait (%p9853_p9), %s1887_s17, 32  }
 0x36a   : > { %7977 = vsyncadd (%p9853_p9), %s1887_s17, 4294967264  ;;  %s1903_s3 = scalar_lea.sflag [#allocation33], %s8933_s26 }
 0x36b   : > { %7979 = dma.done.wait (%p9853_p9), %s1903_s3, 272  }
 0x36c   : > { %7981 = vsyncadd (%p9853_p9), %s1903_s3, 4294967024  ;;  %s1920_s20 = scalar_lea.sflag [#allocation36], %s8933_s26 }
 0x36d   : > { %7983 = dma.done.wait (%p9853_p9), %s1920_s20, 272  }
 0x36e   : > { %7985 = vsyncadd (%p9853_p9), %s1920_s20, 4294967024  ;;  %s1937_s5 = scalar_lea.sflag [#allocation39], %s8933_s26 }
 0x36f   : > { %7987 = dma.done.wait (%p9853_p9), %s1937_s5, 528  }
 0x370   : > { %7989 = vsyncadd (%p9853_p9), %s1937_s5, 4294966768  ;;  %s6111_s3 = sshll.u32 %s8936_s1, 5  ;;  %s1954_s20 = scalar_lea.sflag [#allocation42], %s8933_s26 }
 0x371   : > { %s9004_s14 = scalar_lea.vmem [#allocation40], %s6111_s3 }
 0x372   : > { %7991 = dma.done.wait (%p9853_p9), %s1954_s20, 32  }
 0x373   : > { %7993 = vsyncadd (%p9853_p9), %s1954_s20, 4294967264  ;;  %s1970_s5 = scalar_lea.sflag [#allocation45], %s8933_s26 }
 0x374   : > { %7995 = dma.done.wait (%p9853_p9), %s1970_s5, 528  }
 0x375   : > { %7997 = vsyncadd (%p9853_p9), %s1970_s5, 4294966768  ;;  %s9019_s4 = scalar_lea.vmem [#allocation46], %s6111_s3  ;;  %s1987_s2 = scalar_lea.sflag [#allocation48], %s8933_s26 }
 0x376   : > { %7999 = dma.done.wait (%p9853_p9), %s1987_s2, 32  }
 0x377   : > { %8001 = vsyncadd (%p9853_p9), %s1987_s2, 4294967264  ;;  %s9854_s20 = sld [smem:[#allocation80_spill]]  ;;  %p2224_p0 = scmp.lt.s32.totalorder %s8348_s15, 1 }
 0x378   : > { %s9855_s17 = sld [smem:[#allocation81_spill]]  ;;  %s1997_s21 = scalar_lea.vmem [#allocation49], %s8936_s1 }
 0x379   : > { %s9856_s9 = sld [smem:[#allocation83_spill]]  ;;  %p9861_p5 = scmp.ne.s32.totalorder %s8348_s15, 0 }
 0x37a   : > { %s9857_s11 = sld [smem:[#allocation89_spill]] }
 0x37b   : > { %s9858_s5 = sld [smem:[#allocation93_spill]] }
 0x37c   : > { %s9859_s8 = sld [smem:[#allocation105_spill]] }
 0x37d   : > { %s9860_s12 = sld [smem:[#allocation107_spill]] }
 0x37e   : > { %s9029_s3 = scalar_select %p2224_p0, %s8348_s15, 1 }
 0x380   : > { %s6246_s26 = sshll.u32 %s9029_s3, 5  ;;  %s2256_s28 = scalar_lea.vmem %s8312_s6, %s9029_s3 }
 0x381   : > { %s9035_s2 = scalar_lea.vmem %s9854_s20, %s6246_s26  ;;  %s9038_s0 = scalar_lea.vmem %s9855_s17, %s6246_s26 }
 0x382   : > { %s9041_s18 = scalar_lea.vmem %s9856_s9, %s6246_s26  ;;  %s9044_s22 = scalar_lea.vmem %s9857_s11, %s6246_s26 }
 0x383   : > { %s9047_s13 = scalar_lea.vmem %s9858_s5, %s6246_s26  ;;  %s9050_s16 = scalar_lea.vmem %s9859_s8, %s6246_s26 }
 0x384   : > { %s2259_s19 = scalar_lea.vmem %s9860_s12, %s9029_s3  ;;  %2264 = sbr.rel (%p9861_p5) target bundleno = 1228 (0x4cc), region = 308 }
 0x385   : > { %s9862_s12 = sld [smem:[#allocation75_spill]] (!%p9861_p5) }
 0x389   : > { %v2265_v0 = vld [vmem:[#allocation2] sm:$0xff]  ;;  %vm2272_vm0 = vcmask 261120   ;;  %v2322_v2 = vld [vmem:[#allocation5] sm:$0xff]  ;;  %v2324_v4 = vld [vmem:[#allocation8] sm:$0xff]  ;;  %vm2329_vm1 = vcmask 523264  }
 0x38a   : > { %v2267_v1 = vld [vmem:[#allocation7] sm:$0xff]  ;;  %v2266_v5 = vld [vmem:[#allocation2 + $0x8] sm:$0xff]  ;;  %v2323_v6 = vld [vmem:[#allocation5 + $0x8] sm:$0xff]  ;;  %v2325_v7 = vadd.f32 %v2324_v4, %v2322_v2 }
 0x38b   : > { %v2268_v3 = vadd.f32 %v2267_v1, %v2265_v0  ;;  %v2269_v8 = vadd.f32 %v2267_v1, %v2266_v5  ;;  %v2326_v9 = vadd.f32 %v2324_v4, %v2323_v6  ;;  %v6126_v47 = vld [vmem:[%s9862_s12] ss:$0 sm:$0xff]  ;;  %v6127_v49 = vld [vmem:[#allocation10] ss:$0 sm:$0xff]  ;;  %v6128_v55 = vld [vmem:[#allocation11] ss:$0 sm:$0xff] }
 0x38c   : > { %v2330_v11 = vsel %vm2329_vm1, %v2325_v7, 0.0  ;;  %v6129_v58 = vld [vmem:[#allocation13] ss:$0 sm:$0xff] }
 0x38d   : > { %v2273_v10 = vsel %vm2272_vm0, %v2268_v3, 0.0  ;;  %2331 = vadd.xlane.f32.xlu1 %v2330_v11  ;;  %v2276_v12 = vsel %vm2272_vm0, %v2269_v8, 0.0  ;;  %v2333_v13 = vsel %vm2329_vm1, %v2326_v9, 0.0 }
 0x38e   : > { %2274 = vadd.xlane.f32.xlu0 %v2273_v10 }
 0x391   : > { %2334 = vadd.xlane.f32.xlu1 %v2333_v13 }
 0x392   : > { %2277 = vadd.xlane.f32.xlu0 %v2276_v12 }
 0x416   : > { %v2332_v16 = vpop.xlane.xlu1 %2331 }
 0x417   : > { %v2275_v14 = vpop.xlane.xlu0 %2274  ;;  %v2337_v17 = vmul.f32 0.015625, %v2332_v16 }
 0x418   : > { %v2280_v15 = vmul.f32 0.03125, %v2275_v14 }
 0x419   : > { %v2339_v19 = vsub.f32 %v2325_v7, %v2337_v17 }
 0x41a   : > { %v2282_v18 = vsub.f32 %v2268_v3, %v2280_v15  ;;  %v2335_v22 = vpop.xlane.xlu1 %2334 }
 0x41b   : > { %v2278_v20 = vpop.xlane.xlu0 %2277  ;;  %v2338_v24 = vmul.f32 0.015625, %v2335_v22  ;;  %v2341_v25 = vmul.f32 %v2339_v19, %v2339_v19 }
 0x41c   : > { %v2281_v21 = vmul.f32 0.03125, %v2278_v20  ;;  %v2284_v23 = vmul.f32 %v2282_v18, %v2282_v18 }
 0x41d   : > { %v2340_v28 = vsub.f32 %v2326_v9, %v2338_v24  ;;  %v2343_v29 = vsel %vm2329_vm1, %v2341_v25, 0.0 }
 0x41e   : > { %v2283_v26 = vsub.f32 %v2269_v8, %v2281_v21  ;;  %v2286_v27 = vsel %vm2272_vm0, %v2284_v23, 0.0 }
 0x41f   : > { %2287 = vadd.xlane.f32.xlu0 %v2286_v27  ;;  %v2342_v31 = vmul.f32 %v2340_v28, %v2340_v28 }
 0x420   : > { %v2285_v30 = vmul.f32 %v2283_v26, %v2283_v26 }
 0x421   : > { %v2346_v33 = vsel %vm2329_vm1, %v2342_v31, 0.0 }
 0x422   : > { %v2289_v32 = vsel %vm2272_vm0, %v2285_v30, 0.0 }
 0x423   : > { %2344 = vadd.xlane.f32.xlu0 %v2343_v29  ;;  %2290 = vadd.xlane.f32.xlu1 %v2289_v32 }
 0x427   : > { %2347 = vadd.xlane.f32.xlu1 %v2346_v33 }
 0x4a8   : > { %v2288_v34 = vpop.xlane.xlu0 %2287 }
 0x4a9   : > { %v2292_v35 = vmul.f32 0.03125, %v2288_v34 }
 0x4ab   : > { %v2294_v36 = vadd.f32 1e-06, %v2292_v35 }
 0x4ac   : > { %v2291_v37 = vpop.xlane.xlu1 %2290  ;;  %v2345_v38 = vpop.xlane.xlu0 %2344 }
 0x4ad   : > { %6908 = vrsqrt.f32 %v2294_v36  ;;  %v2293_v39 = vmul.f32 0.03125, %v2291_v37  ;;  %v2349_v40 = vmul.f32 0.015625, %v2345_v38 }
 0x4af   : > { %v2295_v41 = vadd.f32 1e-06, %v2293_v39  ;;  %v2351_v42 = vadd.f32 1e-06, %v2349_v40 }
 0x4b0   : > { %v2348_v43 = vpop.xlane.xlu1 %2347 }
 0x4b1   : > { %6910 = vrsqrt.f32 %v2295_v41  ;;  %v2350_v44 = vmul.f32 0.015625, %v2348_v43 }
 0x4b2   : > { %6912 = vrsqrt.f32 %v2351_v42 }
 0x4b3   : > { %v2352_v45 = vadd.f32 1e-06, %v2350_v44 }
 0x4b5   : > { %6914 = vrsqrt.f32 %v2352_v45 }
 0x4ba   : > { %v6909_v46 = vpop.eup %6908 }
 0x4bb   : > { %v2298_v48 = vmul.f32 %v6909_v46, %v2282_v18 }
 0x4bd   : > { %v2306_v50 = vmul.f32 %v6126_v47, %v2298_v48 }
 0x4be   : > { %v6911_v51 = vpop.eup %6910 }
 0x4bf   : > { %v6913_v52 = vpop.eup %6912  ;;  %v2314_v53 = vadd.f32 %v6127_v49, %v2306_v50  ;;  %v2299_v54 = vmul.f32 %v6911_v51, %v2283_v26 }
 0x4c0   : > { %v2355_v56 = vmul.f32 %v6913_v52, %v2339_v19 }
 0x4c1   : > { %vm2316_vm2 = vcmp.ne.f32.partialorder %v2314_v53, %v2314_v53  ;;  %v2307_v57 = vmul.f32 %v6126_v47, %v2299_v54 }
 0x4c2   : > { %v6915_v59 = vpop.eup %6914  ;;  %v2318_v60 = vsel %vm2316_vm2, 0.0, %v2314_v53  ;;  %v2363_v61 = vmul.f32 %v6128_v55, %v2355_v56 }
 0x4c3   : > { %2320 = vst.msk [vmem:[#allocation50] sm:$0xff] %vm2272_vm0, %v2318_v60  ;;  %v2315_v62 = vadd.f32 %v6127_v49, %v2307_v57  ;;  %v2356_v63 = vmul.f32 %v6915_v59, %v2340_v28 }
 0x4c4   : > { %v2371_v0 = vadd.f32 %v6129_v58, %v2363_v61 }
 0x4c5   : > { %vm2317_vm3 = vcmp.ne.f32.partialorder %v2315_v62, %v2315_v62  ;;  %v2364_v1 = vmul.f32 %v6128_v55, %v2356_v63 }
 0x4c6   : > { %v2319_v2 = vsel %vm2317_vm3, 0.0, %v2315_v62  ;;  %vm2373_vm4 = vcmp.ne.f32.partialorder %v2371_v0, %v2371_v0 }
 0x4c7   : > { %2321 = vst.msk [vmem:[#allocation50 + $0x8] sm:$0xff] %vm2272_vm0, %v2319_v2  ;;  %v2375_v3 = vsel %vm2373_vm4, 0.0, %v2371_v0  ;;  %v2372_v4 = vadd.f32 %v6129_v58, %v2364_v1 }
 0x4c8   : > { %2377 = vst.msk [vmem:[#allocation51] sm:$0xff] %vm2329_vm1, %v2375_v3 }
 0x4c9   : > { %vm2374_vm5 = vcmp.ne.f32.partialorder %v2372_v4, %v2372_v4 }
 0x4ca   : > { %v2376_v5 = vsel %vm2374_vm5, 0.0, %v2372_v4 }
 0x4cb   : > { %2378 = vst.msk [vmem:[#allocation51 + $0x8] sm:$0xff] %vm2329_vm1, %v2376_v5 }
 0x4cc PF: > { %s9863_s8 = scalar_lea.vmem [#allocation14], %s8939_s30  ;;  %v8102_v7 = vmov 0.0   ;;  %vm8103_vm6 = vmmov 0   ;;  %v9078_v9 = vld [vmem:[#allocation50] sm:$0xff]  ;;  %vm2437_vm7 = vcmask 261120   ;;  %v6949_v13 = vld [vmem:[%s9035_s2 + $0x10] sm:$0xff]  }
 0x4cd   : > { %v6946_v6 = vld [vmem:[%s9863_s8 + $0x8] sm:$0xff]   ;;  %6368 = vmatprep.subr.bf16.mxu1 %v8102_v7  ;;  %s9864_s11 = smov %s9863_s8  ;;  %6388 = vmatprep.subr.bf16.mxu0 %v8102_v7  ;;  %vm2512_vm8 = vcmask 523264   ;;  %s9865_s9 = scalar_lea.vmem [#allocation17], %s8936_s1  ;;  %vm2634_vm9 = vcmask 130048   ;;  %vm2755_vm10 = vcmask 1043456   ;;  %vm2727_vm11 = vcmask 64512  }
 0x4ce   : > { %v6947_v8 = vld [vmem:[%s9864_s11] sm:$0xff]   ;;  %6369 = vmatpush3.bf16.msra.mxu1 %v6946_v6  ;;  %6372 = vmatprep.mubr.msk.bf16.mxu1 %vm8103_vm6, %v8102_v7  ;;  %v6948_v12 = vld [vmem:[%s9035_s2 + $0x18] sm:$0xff]   ;;  %v6950_v14 = vld [vmem:[%s9035_s2 + $0x8] sm:$0xff]   ;;  %s8104_s17 = smov 112   ;;  %s9867_s20 = scalar_lea.vmem [#allocation19], %s8936_s1  ;;  %vm3539_vm12 = vcmask 392192  }
 0x4cf   : > { %v9080_v10 = vld [vmem:[#allocation50 + $0x8] sm:$0xff]  ;;  %6370 = vmatprep.subr.bf16.mxu1 %v8102_v7  ;;  %6396 = vmatprep.mubr.msk.bf16.mxu0 %vm8103_vm6, %v8102_v7  ;;  %v2381_v16 = vld [vmem:[#allocation51] sm:$0xff]  ;;  %v6952_v19 = vld [vmem:[%s9038_s0 + $0x18] sm:$0xff]   ;;  %s8105_s5 = smov 96   ;;  %s8106_s26 = smov 80  }
 0x4d0   : > { %v9087_v11 = vpack.c.bf16 %v9080_v10, %v9078_v9  ;;  %v6951_v15 = vld [vmem:[%s9035_s2] sm:$0xff]   ;;  %6389 = vmatpush3.bf16.msra.mxu0 %v6952_v19  ;;  %v6953_v20 = vld [vmem:[%s9038_s0 + $0x10] sm:$0xff]   ;;  %v6954_v21 = vld [vmem:[%s9038_s0 + $0x8] sm:$0xff]   ;;  %s8107_s2 = smov 16   ;;  %s8108_s12 = smov 32  }
 0x4d1   : > { %6390 = vmatprep.subr.bf16.mxu0 %v8102_v7  ;;  %v6955_v22 = vld [vmem:[%s9038_s0] sm:$0xff]   ;;  %s9866_s0 = scalar_lea.vmem [#allocation16], %s8936_s1  ;;  %s8109_s8 = smov 48  }
 0x4d2   : > { %6371 = vmatpush3.bf16.msra.mxu1 %v6947_v8  ;;  %v2382_v17 = vld [vmem:[#allocation51 + $0x8] sm:$0xff]  ;;  %v6134_v27 = vld [vmem:[%s9865_s9] ss:$0 sm:$0xff]  ;;  %s9869_s11 = scalar_lea.vmem [#allocation25], %s8939_s30  ;;  %p6808_p8 = scmp.eq.s32.totalorder %s8348_s15, 1 }
 0x4d3   : > { %6376 = vmatprep.subr.bf16.mxu1 %v8102_v7  ;;  %v9101_v18 = vpack.c.bf16 %v2382_v17, %v2381_v16  ;;  %v6130_v32 = vld [vmem:[%s9866_s0] ss:$0 sm:$0xff]  ;;  %s9870_s9 = smov %s9869_s11  ;;  %s9871_s0 = scalar_lea.vmem [#allocation22], %s8936_s1 }
 0x4d4   : > { %6391 = vmatpush3.bf16.msra.mxu0 %v6953_v20  ;;  %v6140_v43 = vld [vmem:[%s9867_s20] ss:$0 sm:$0xff]  ;;  %s9872_s20 = scalar_lea.vmem [#allocation23], %s8936_s1 }
 0x4d5   : > { %6373 = vmatmul.mubr.msk.bf16.vlgmr.msra.gmra.mxu1 %vm2437_vm7, %v9087_v11  ;;  %6392 = vmatprep.subr.bf16.mxu0 %v8102_v7 }
 0x4d6   : > { %6377 = vmatpush3.bf16.msra.mxu1 %v6948_v12  ;;  %6384 = vmatprep.mubr.msk.bf16.mxu1 %vm8103_vm6, %v8102_v7 }
 0x4d7   : > { %6378 = vmatprep.subr.bf16.mxu1 %v8102_v7 }
 0x4d8   : > { %6393 = vmatpush3.bf16.msra.mxu0 %v6954_v21 }
 0x4d9   : > { %6394 = vmatprep.subr.bf16.mxu0 %v8102_v7 }
 0x4da   : > { %6379 = vmatpush3.bf16.msra.mxu1 %v6949_v13 }
 0x4db   : > { %6380 = vmatprep.subr.bf16.mxu1 %v8102_v7 }
 0x4dc   : > { %6395 = vmatpush3.bf16.msra.mxu0 %v6955_v22 }
 0x4dd   : > { %6406 = vmatprep.subr.bf16.mxu0 %v8102_v7 }
 0x4de   : > { %6381 = vmatpush3.bf16.msra.mxu1 %v6950_v14 }
 0x4df   : > { %6382 = vmatprep.subr.bf16.mxu1 %v8102_v7  ;;  %6397 = vmatmul.mubr.msk.bf16.vlgmr.msra.gmra.mxu0 %vm2512_vm8, %v9101_v18 }
 0x4e0   : > { %6408 = vmatprep.mubr.msk.bf16.mxu0 %vm8103_vm6, %v8102_v7 }
 0x4e2   : > { %6383 = vmatpush3.bf16.msra.mxu1 %v6951_v15 }
 0x4e3   : > { %6400 = vmatprep.subr.bf16.mxu1 %v8102_v7 }
 0x4e5   : > { %6385 = vmatmul.mubr.msk.bf16.vlgmr.msra.gmra.mxu1 %vm2512_vm8, %v9101_v18 }
 0x4e6   : > { %6402 = vmatprep.mubr.msk.bf16.mxu1 %vm8103_vm6, %v8102_v7 }
 0x595   : > { %v2475_v23 = vpop.f32.mrf.mxu1 }
 0x596   : > { %v2476_v37 = vadd.f32 %v6130_v32, %v2475_v23 }
 0x597   : > { %v6374_v24 = vpop.f32.mrf.mxu1 }
 0x598   : > { %v9135_v40 = vpack.c.bf16 %v2476_v37, %v2476_v37 }
 0x599   : > { %v2478_v25 = vpop.f32.mrf.mxu1 }
 0x59a   : > { %v2479_v41 = vadd.f32 %v6130_v32, %v2478_v25 }
 0x59b   : > { %v6375_v26 = vpop.f32.mrf.mxu1 }
 0x59c   : > { %v9142_v42 = vpack.c.bf16 %v2479_v41, %v2479_v41 }
 0x59f   : > { %v2621_v44 = vpop.f32.mrf.mxu0 }
 0x5a0   : > { %v2622_v46 = vadd.f32 %v6140_v43, %v2621_v44 }
 0x5a1   : > { %v6398_v45 = vpop.f32.mrf.mxu0 }
 0x5a2   : > { %v9150_v50 = vpack.c.bf16 %v2622_v46, %v2622_v46 }
 0x5a3   : > { %v2624_v47 = vpop.f32.mrf.mxu0 }
 0x5a4   : > { %v2625_v48 = vadd.f32 %v6140_v43, %v2624_v47  ;;  %v2757_v52 = vsel %vm2755_vm10, %v9150_v50, 0 }
 0x5a5   : > { %v2550_v28 = vpop.f32.mrf.mxu1  ;;  %v6399_v49 = vpop.f32.mrf.mxu0 }
 0x5a6   : > { %v2551_v29 = vadd.f32 %v6134_v27, %v2550_v28  ;;  %v9152_v51 = vpack.c.bf16 %v2625_v48, %v2625_v48 }
 0x5a7   : > { %v6386_v30 = vpop.f32.mrf.mxu1 }
 0x5a8   : > { %v9122_v31 = vpack.c.bf16 %v2551_v29, %v2551_v29  ;;  %v2803_v53 = vsel %vm2755_vm10, %v9152_v51, 0 }
 0x5a9   : > { %v2553_v33 = vpop.f32.mrf.mxu1 }
 0x5aa   : > { %v2554_v34 = vadd.f32 %v6134_v27, %v2553_v33  ;;  %v2639_v35 = vsel %vm2634_vm9, %v9122_v31, 0 }
 0x5ab   : > { %v6387_v36 = vpop.f32.mrf.mxu1  ;;  %6401 = vmatpush3.bf16.xpose.msra.mxu1 %v2639_v35 }
 0x5ac   : > { %v9128_v38 = vpack.c.bf16 %v2554_v34, %v2554_v34  ;;  %6412 = vmatprep.subr.bf16.mxu1 %v8102_v7 }
 0x5ae   : > { %2901 = vrot.lane.b32.xlu1 %v9128_v38, %s8104_s17  ;;  %v2685_v39 = vsel %vm2634_vm9, %v9128_v38, 0 }
 0x5af   : > { %6407 = vmatpush3.bf16.xpose.msra.mxu0 %v2685_v39 }
 0x5b0   : > { %6418 = vmatprep.subr.bf16.mxu0 %v8102_v7 }
 0x5b2   : > { %6403 = vmatmul.mubr.msk.bf16.vlgmr.msra.gmra.mxu1 %vm2634_vm9, %v9135_v40 }
 0x5b3   : > { %6414 = vmatprep.mubr.msk.bf16.mxu1 %vm8103_vm6, %v8102_v7  ;;  %6413 = vmatpush3.bf16.msra.mxu1 %v2757_v52 }
 0x5b4   : > { %6424 = vmatprep.subr.bf16.mxu1 %v8102_v7 }
 0x5b6   : > { %6409 = vmatmul.mubr.msk.bf16.vlgmr.msra.gmra.mxu0 %vm2634_vm9, %v9142_v42 }
 0x5b7   : > { %6420 = vmatprep.mubr.msk.bf16.mxu0 %vm8103_vm6, %v8102_v7  ;;  %6419 = vmatpush3.bf16.msra.mxu0 %v2803_v53 }
 0x5b8   : > { %6430 = vmatprep.subr.bf16.mxu0 %v8102_v7 }
 0x620   : > { %v2902_v14 = vpop.permute.xlu1 %2901 }
 0x621   : > { %v2907_v26 = vsel %vm2634_vm9, %v2902_v14, 0 }
 0x672   : > { %v2675_v54 = vpop.f32.mrf.mxu1 }
 0x673   : > { %v2728_v55 = vsel %vm2727_vm11, %v2675_v54, -inf }
 0x674   : > { %2729 = vmax.xlane.f32.xlu0 %v2728_v55  ;;  %v6404_v56 = vpop.f32.mrf.mxu1 }
 0x676   : > { %v2678_v57 = vpop.f32.mrf.mxu1  ;;  %v2721_v58 = vpop.f32.mrf.mxu0 }
 0x677   : > { %v2731_v59 = vsel %vm2727_vm11, %v2721_v58, -inf }
 0x678   : > { %v6410_v60 = vpop.f32.mrf.mxu0  ;;  %2732 = vmax.xlane.f32.xlu0 %v2731_v59  ;;  %v6405_v61 = vpop.f32.mrf.mxu1 }
 0x67a   : > { %v2724_v62 = vpop.f32.mrf.mxu0 }
 0x67c   : > { %v6411_v63 = vpop.f32.mrf.mxu0 }
 0x68e   : > { %2849 = vrot.lane.b32.xlu0 %v9122_v31, %s8104_s17 }
 0x6fd   : > { %v2730_v0 = vpop.xlane.xlu0 %2729 }
 0x6fe   : > { %v2734_v1 = vsub.f32 %v2675_v54, %v2730_v0 }
 0x700   : > { %v2736_v2 = vmul.f32 1.442695, %v2734_v1 }
 0x701   : > { %v2733_v3 = vpop.xlane.xlu0 %2732 }
 0x702   : > { %6986 = vpow2.f32 %v2736_v2  ;;  %v2735_v4 = vsub.f32 %v2721_v58, %v2733_v3 }
 0x704   : > { %v2738_v5 = vmul.f32 1.442695, %v2735_v4 }
 0x705   : > { %v2850_v20 = vpop.permute.xlu0 %2849 }
 0x706   : > { %6988 = vpow2.f32 %v2738_v5  ;;  %v2855_v23 = vsel %vm2634_vm9, %v2850_v20, 0 }
 0x70f   : > { %v6987_v6 = vpop.eup %6986 }
 0x710   : > { %v2740_v8 = vsel %vm2727_vm11, %v6987_v6, 0.0 }
 0x711   : > { %2741 = vadd.xlane.f32.xlu1 %v2740_v8 }
 0x713   : > { %v6989_v12 = vpop.eup %6988 }
 0x714   : > { %v2743_v13 = vsel %vm2727_vm11, %v6989_v12, 0.0 }
 0x715   : > { %2744 = vadd.xlane.f32.xlu1 %v2743_v13 }
 0x726   : > { %2846 = vrot.lane.b32.xlu1 %v9135_v40, %s8104_s17 }
 0x72a   : > { %2898 = vrot.lane.b32.xlu1 %v9142_v42, %s8104_s17 }
 0x79a   : > { %v2742_v15 = vpop.xlane.xlu1 %2741 }
 0x79b   : > { %6990 = vrcp.f32 %v2742_v15 }
 0x79e   : > { %v2745_v16 = vpop.xlane.xlu1 %2744 }
 0x79f   : > { %6992 = vrcp.f32 %v2745_v16 }
 0x7a2   : > { %v2847_v27 = vpop.permute.xlu1 %2846 }
 0x7a6   : > { %v2899_v28 = vpop.permute.xlu1 %2898 }
 0x7a8   : > { %v6991_v17 = vpop.eup %6990 }
 0x7a9   : > { %v2747_v19 = vmul.f32 %v6991_v17, %v6987_v6 }
 0x7ab   : > { %v2750_v21 = vpack.c.bf16 %v2747_v19, %v2747_v19 }
 0x7ac   : > { %v6993_v22 = vpop.eup %6992 }
 0x7ad   : > { %6415 = vmatmul.mubr.msk.bf16.vlgmr.msra.gmra.mxu1 %vm2727_vm11, %v2750_v21  ;;  %v2749_v24 = vmul.f32 %v6993_v22, %v6989_v12 }
 0x7ae   : > { %6425 = vmatpush3.bf16.xpose.msra.mxu1 %v2855_v23  ;;  %6426 = vmatprep.mubr.msk.bf16.mxu1 %vm8103_vm6, %v8102_v7 }
 0x7af   : > { %v2751_v25 = vpack.c.bf16 %v2749_v24, %v2749_v24  ;;  %6436 = vmatprep.subr.bf16.mxu1 %v8102_v7 }
 0x7b1   : > { %6421 = vmatmul.mubr.msk.bf16.vlgmr.msra.gmra.mxu0 %vm2727_vm11, %v2751_v25 }
 0x7b2   : > { %6431 = vmatpush3.bf16.xpose.msra.mxu0 %v2907_v26  ;;  %6432 = vmatprep.mubr.msk.bf16.mxu0 %vm8103_vm6, %v8102_v7 }
 0x7b3   : > { %6442 = vmatprep.subr.bf16.mxu0 %v8102_v7 }
 0x7b5   : > { %6427 = vmatmul.mubr.msk.bf16.vlgmr.msra.gmra.mxu1 %vm2634_vm9, %v2847_v27 }
 0x7b6   : > { %6438 = vmatprep.mubr.msk.bf16.mxu1 %vm8103_vm6, %v8102_v7 }
 0x7b9   : > { %6433 = vmatmul.mubr.msk.bf16.vlgmr.msra.gmra.mxu0 %vm2634_vm9, %v2899_v28 }
 0x7ba   : > { %6444 = vmatprep.mubr.msk.bf16.mxu0 %vm8103_vm6, %v8102_v7 }
 0x86d   : > { %v9186_v29 = vpop.f32.mrf.mxu1 }
 0x86f   : > { %v6416_v30 = vpop.f32.mrf.mxu1 }
 0x871   : > { %v2796_v32 = vpop.f32.mrf.mxu1  ;;  %v9188_v33 = vpop.f32.mrf.mxu0 }
 0x873   : > { %v6417_v34 = vpop.f32.mrf.mxu1  ;;  %v6422_v35 = vpop.f32.mrf.mxu0 }
 0x875   : > { %v2842_v36 = vpop.f32.mrf.mxu0  ;;  %v2891_v37 = vpop.f32.mrf.mxu1 }
 0x876   : > { %v2949_v39 = vsel %vm2727_vm11, %v2891_v37, -inf }
 0x877   : > { %v6423_v41 = vpop.f32.mrf.mxu0  ;;  %2950 = vmax.xlane.f32.xlu0 %v2949_v39  ;;  %v6428_v43 = vpop.f32.mrf.mxu1 }
 0x879   : > { %v2894_v44 = vpop.f32.mrf.mxu1  ;;  %v2943_v45 = vpop.f32.mrf.mxu0 }
 0x87a   : > { %v2952_v46 = vsel %vm2727_vm11, %v2943_v45, -inf }
 0x87b   : > { %2953 = vmax.xlane.f32.xlu1 %v2952_v46  ;;  %v6429_v47 = vpop.f32.mrf.mxu1  ;;  %v6434_v48 = vpop.f32.mrf.mxu0 }
 0x87d   : > { %v2946_v49 = vpop.f32.mrf.mxu0 }
 0x87f   : > { %v6435_v52 = vpop.f32.mrf.mxu0 }
 0x88c   : > { %3023 = vrot.lane.b32.xlu1 %v9152_v51, %s8104_s17 }
 0x890   : > { %3073 = vrot.lane.b32.xlu1 %v9122_v31, %s8105_s5 }
 0x894   : > { %3123 = vrot.lane.b32.xlu1 %v9128_v38, %s8105_s5 }
 0x898   : > { %3121 = vrot.lane.b32.xlu1 %v9142_v42, %s8105_s5 }
 0x900   : > { %v2951_v53 = vpop.xlane.xlu0 %2950 }
 0x901   : > { %v2955_v54 = vsub.f32 %v2891_v37, %v2951_v53 }
 0x903   : > { %v2957_v55 = vmul.f32 1.442695, %v2955_v54 }
 0x904   : > { %v2954_v56 = vpop.xlane.xlu1 %2953 }
 0x905   : > { %6994 = vpow2.f32 %v2957_v55  ;;  %v2956_v57 = vsub.f32 %v2943_v45, %v2954_v56 }
 0x907   : > { %v2959_v58 = vmul.f32 1.442695, %v2956_v57 }
 0x908   : > { %v3024_v59 = vpop.permute.xlu1 %3023 }
 0x909   : > { %6996 = vpow2.f32 %v2959_v58  ;;  %v3029_v60 = vsel %vm2755_vm10, %v3024_v59, 0 }
 0x90a   : > { %6443 = vmatpush3.bf16.msra.mxu0 %v3029_v60 }
 0x90b   : > { %6454 = vmatprep.subr.bf16.mxu0 %v8102_v7 }
 0x90c   : > { %v3074_v6 = vpop.permute.xlu1 %3073 }
 0x90d   : > { %v3079_v14 = vsel %vm2634_vm9, %v3074_v6, 0 }
 0x910   : > { %v3124_v16 = vpop.permute.xlu1 %3123 }
 0x911   : > { %v3129_v19 = vsel %vm2634_vm9, %v3124_v16, 0 }
 0x912   : > { %v6995_v61 = vpop.eup %6994 }
 0x913   : > { %v2961_v62 = vsel %vm2727_vm11, %v6995_v61, 0.0 }
 0x914   : > { %2962 = vadd.xlane.f32.xlu0 %v2961_v62  ;;  %v3122_v21 = vpop.permute.xlu1 %3121 }
 0x916   : > { %v6997_v63 = vpop.eup %6996 }
 0x917   : > { %v2964_v0 = vsel %vm2727_vm11, %v6997_v63, 0.0 }
 0x918   : > { %2965 = vadd.xlane.f32.xlu0 %v2964_v0 }
 0x92e   : > { %2974 = vrot.lane.b32.xlu0 %v9150_v50, %s8104_s17 }
 0x932   : > { %3071 = vrot.lane.b32.xlu0 %v9135_v40, %s8105_s5 }
 0x99d   : > { %v2963_v1 = vpop.xlane.xlu0 %2962 }
 0x99e   : > { %6998 = vrcp.f32 %v2963_v1 }
 0x9a1   : > { %v2966_v2 = vpop.xlane.xlu0 %2965 }
 0x9a2   : > { %7000 = vrcp.f32 %v2966_v2 }
 0x9a5   : > { %v2975_v3 = vpop.permute.xlu0 %2974 }
 0x9a6   : > { %v2980_v4 = vsel %vm2755_vm10, %v2975_v3, 0 }
 0x9a7   : > { %6437 = vmatpush3.bf16.msra.mxu1 %v2980_v4 }
 0x9a8   : > { %6448 = vmatprep.subr.bf16.mxu1 %v8102_v7 }
 0x9a9   : > { %v3072_v20 = vpop.permute.xlu0 %3071 }
 0x9ab   : > { %v6999_v5 = vpop.eup %6998 }
 0x9ac   : > { %v2968_v8 = vmul.f32 %v6999_v5, %v6995_v61 }
 0x9ae   : > { %v2971_v12 = vpack.c.bf16 %v2968_v8, %v2968_v8 }
 0x9af   : > { %v7001_v13 = vpop.eup %7000 }
 0x9b0   : > { %6439 = vmatmul.mubr.msk.bf16.vlgmr.msra.gmra.mxu1 %vm2727_vm11, %v2971_v12  ;;  %v2970_v15 = vmul.f32 %v7001_v13, %v6997_v63 }
 0x9b1   : > { %6449 = vmatpush3.bf16.xpose.msra.mxu1 %v3079_v14  ;;  %6450 = vmatprep.mubr.msk.bf16.mxu1 %vm8103_vm6, %v8102_v7 }
 0x9b2   : > { %v2972_v17 = vpack.c.bf16 %v2970_v15, %v2970_v15  ;;  %6460 = vmatprep.subr.bf16.mxu1 %v8102_v7 }
 0x9b4   : > { %6445 = vmatmul.mubr.msk.bf16.vlgmr.msra.gmra.mxu0 %vm2727_vm11, %v2972_v17 }
 0x9b5   : > { %6455 = vmatpush3.bf16.xpose.msra.mxu0 %v3129_v19  ;;  %6456 = vmatprep.mubr.msk.bf16.mxu0 %vm8103_vm6, %v8102_v7 }
 0x9b6   : > { %6466 = vmatprep.subr.bf16.mxu0 %v8102_v7 }
 0x9b8   : > { %6451 = vmatmul.mubr.msk.bf16.vlgmr.msra.gmra.mxu1 %vm2634_vm9, %v3072_v20 }
 0x9b9   : > { %6462 = vmatprep.mubr.msk.bf16.mxu1 %vm8103_vm6, %v8102_v7 }
 0x9bc   : > { %6457 = vmatmul.mubr.msk.bf16.vlgmr.msra.gmra.mxu0 %vm2634_vm9, %v3122_v21 }
 0x9bd   : > { %6468 = vmatprep.mubr.msk.bf16.mxu0 %vm8103_vm6, %v8102_v7 }
 0xa70   : > { %v9226_v22 = vpop.f32.mrf.mxu1 }
 0xa72   : > { %v6440_v23 = vpop.f32.mrf.mxu1 }
 0xa74   : > { %v3019_v24 = vpop.f32.mrf.mxu1  ;;  %v9228_v25 = vpop.f32.mrf.mxu0 }
 0xa75   : > { %v6916_v26 = vpack.i.bf16 %v9228_v25, %v9226_v22 }
 0xa76   : > { %v6441_v27 = vpop.f32.mrf.mxu1  ;;  %v6446_v28 = vpop.f32.mrf.mxu0 }
 0xa78   : > { %v3068_v30 = vpop.f32.mrf.mxu0  ;;  %v3115_v32 = vpop.f32.mrf.mxu1 }
 0xa79   : > { %v3171_v34 = vsel %vm2727_vm11, %v3115_v32, -inf }
 0xa7a   : > { %v6447_v35 = vpop.f32.mrf.mxu0  ;;  %3172 = vmax.xlane.f32.xlu0 %v3171_v34  ;;  %v6452_v36 = vpop.f32.mrf.mxu1 }
 0xa7c   : > { %v3118_v37 = vpop.f32.mrf.mxu1  ;;  %v3165_v39 = vpop.f32.mrf.mxu0 }
 0xa7d   : > { %v3174_v41 = vsel %vm2727_vm11, %v3165_v39, -inf }
 0xa7e   : > { %3175 = vmax.xlane.f32.xlu1 %v3174_v41  ;;  %v6453_v43 = vpop.f32.mrf.mxu1  ;;  %v6458_v44 = vpop.f32.mrf.mxu0 }
 0xa80   : > { %v3168_v45 = vpop.f32.mrf.mxu0 }
 0xa82   : > { %v6459_v46 = vpop.f32.mrf.mxu0 }
 0xa8f   : > { %3243 = vrot.lane.b32.xlu1 %v9152_v51, %s8105_s5 }
 0xa93   : > { %3293 = vrot.lane.b32.xlu1 %v9122_v31, %s8106_s26 }
 0xa97   : > { %3343 = vrot.lane.b32.xlu1 %v9128_v38, %s8106_s26 }
 0xa9b   : > { %3341 = vrot.lane.b32.xlu1 %v9142_v42, %s8106_s26 }
 0xb03   : > { %v3173_v47 = vpop.xlane.xlu0 %3172 }
 0xb04   : > { %v3177_v48 = vsub.f32 %v3115_v32, %v3173_v47 }
 0xb06   : > { %v3179_v49 = vmul.f32 1.442695, %v3177_v48 }
 0xb07   : > { %v3176_v52 = vpop.xlane.xlu1 %3175 }
 0xb08   : > { %7002 = vpow2.f32 %v3179_v49  ;;  %v3178_v53 = vsub.f32 %v3165_v39, %v3176_v52 }
 0xb0a   : > { %v3181_v54 = vmul.f32 1.442695, %v3178_v53 }
 0xb0b   : > { %v3244_v55 = vpop.permute.xlu1 %3243 }
 0xb0c   : > { %7004 = vpow2.f32 %v3181_v54  ;;  %v3249_v56 = vsel %vm2755_vm10, %v3244_v55, 0 }
 0xb0d   : > { %6467 = vmatpush3.bf16.msra.mxu0 %v3249_v56 }
 0xb0e   : > { %6478 = vmatprep.subr.bf16.mxu0 %v8102_v7 }
 0xb0f   : > { %v3294_v63 = vpop.permute.xlu1 %3293 }
 0xb10   : > { %v3299_v3 = vsel %vm2634_vm9, %v3294_v63, 0 }
 0xb13   : > { %v3344_v4 = vpop.permute.xlu1 %3343 }
 0xb14   : > { %v3349_v6 = vsel %vm2634_vm9, %v3344_v4, 0 }
 0xb15   : > { %v7003_v31 = vpop.eup %7002 }
 0xb16   : > { %v3183_v38 = vsel %vm2727_vm11, %v7003_v31, 0.0 }
 0xb17   : > { %3184 = vadd.xlane.f32.xlu0 %v3183_v38  ;;  %v3342_v12 = vpop.permute.xlu1 %3341 }
 0xb19   : > { %v7005_v57 = vpop.eup %7004 }
 0xb1a   : > { %v3186_v42 = vsel %vm2727_vm11, %v7005_v57, 0.0 }
 0xb1b   : > { %3187 = vadd.xlane.f32.xlu0 %v3186_v42 }
 0xb31   : > { %3195 = vrot.lane.b32.xlu0 %v9150_v50, %s8105_s5 }
 0xb35   : > { %3291 = vrot.lane.b32.xlu0 %v9135_v40, %s8106_s26 }
 0xba0   : > { %v3185_v58 = vpop.xlane.xlu0 %3184 }
 0xba1   : > { %7006 = vrcp.f32 %v3185_v58  ;;  %v6956_v58 = vld [vmem:[%s9041_s18 + $0x18] sm:$0xff]  }
 0xba4   : > { %v3188_v59 = vpop.xlane.xlu0 %3187 }
 0xba5   : > { %7008 = vrcp.f32 %v3188_v59  ;;  %v6957_v59 = vld [vmem:[%s9041_s18 + $0x10] sm:$0xff]  }
 0xba8   : > { %v3196_v60 = vpop.permute.xlu0 %3195 }
 0xba9   : > { %v3201_v61 = vsel %vm2755_vm10, %v3196_v60, 0  ;;  %v6958_v60 = vld [vmem:[%s9041_s18 + $0x8] sm:$0xff]  }
 0xbaa   : > { %6461 = vmatpush3.bf16.msra.mxu1 %v3201_v61  ;;  %v6959_v61 = vld [vmem:[%s9041_s18] sm:$0xff]   ;;  %s9868_s18 = scalar_lea.vmem [#allocation20], %s8936_s1 }
 0xbab   : > { %6472 = vmatprep.subr.bf16.mxu1 %v8102_v7 }
 0xbac   : > { %v3292_v8 = vpop.permute.xlu0 %3291 }
 0xbae   : > { %v7007_v62 = vpop.eup %7006 }
 0xbaf   : > { %v3190_v0 = vmul.f32 %v7007_v62, %v7003_v31 }
 0xbb1   : > { %v3193_v1 = vpack.c.bf16 %v3190_v0, %v3190_v0 }
 0xbb2   : > { %v7009_v2 = vpop.eup %7008 }
 0xbb3   : > { %6463 = vmatmul.mubr.msk.bf16.vlgmr.msra.gmra.mxu1 %vm2727_vm11, %v3193_v1  ;;  %v3192_v40 = vmul.f32 %v7009_v2, %v7005_v57 }
 0xbb4   : > { %6473 = vmatpush3.bf16.xpose.msra.mxu1 %v3299_v3  ;;  %6474 = vmatprep.mubr.msk.bf16.mxu1 %vm8103_vm6, %v8102_v7 }
 0xbb5   : > { %v3194_v5 = vpack.c.bf16 %v3192_v40, %v3192_v40  ;;  %6484 = vmatprep.subr.bf16.mxu1 %v8102_v7 }
 0xbb7   : > { %6469 = vmatmul.mubr.msk.bf16.vlgmr.msra.gmra.mxu0 %vm2727_vm11, %v3194_v5 }
 0xbb8   : > { %6479 = vmatpush3.bf16.xpose.msra.mxu0 %v3349_v6  ;;  %6480 = vmatprep.mubr.msk.bf16.mxu0 %vm8103_vm6, %v8102_v7 }
 0xbb9   : > { %6490 = vmatprep.subr.bf16.mxu0 %v8102_v7 }
 0xbbb   : > { %6475 = vmatmul.mubr.msk.bf16.vlgmr.msra.gmra.mxu1 %vm2634_vm9, %v3292_v8 }
 0xbbc   : > { %6486 = vmatprep.mubr.msk.bf16.mxu1 %vm8103_vm6, %v8102_v7 }
 0xbbf   : > { %6481 = vmatmul.mubr.msk.bf16.vlgmr.msra.gmra.mxu0 %vm2634_vm9, %v3342_v12 }
 0xbc0   : > { %6492 = vmatprep.mubr.msk.bf16.mxu0 %vm8103_vm6, %v8102_v7 }
 0xc73   : > { %v3237_v13 = vpop.f32.mrf.mxu1 }
 0xc75   : > { %v6464_v14 = vpop.f32.mrf.mxu1 }
 0xc77   : > { %v3240_v15 = vpop.f32.mrf.mxu1  ;;  %v3285_v16 = vpop.f32.mrf.mxu0 }
 0xc78   : > { %v6921_v39 = vpack.i.bf16 %v3285_v16, %v3237_v13 }
 0xc79   : > { %v6465_v17 = vpop.f32.mrf.mxu1  ;;  %v6470_v19 = vpop.f32.mrf.mxu0 }
 0xc7b   : > { %v3288_v20 = vpop.f32.mrf.mxu0  ;;  %v3335_v21 = vpop.f32.mrf.mxu1 }
 0xc7c   : > { %v3391_v23 = vsel %vm2727_vm11, %v3335_v21, -inf }
 0xc7d   : > { %v6471_v24 = vpop.f32.mrf.mxu0  ;;  %3392 = vmax.xlane.f32.xlu0 %v3391_v23  ;;  %v6476_v27 = vpop.f32.mrf.mxu1 }
 0xc7f   : > { %v3338_v28 = vpop.f32.mrf.mxu1  ;;  %v3385_v30 = vpop.f32.mrf.mxu0 }
 0xc80   : > { %v3394_v32 = vsel %vm2727_vm11, %v3385_v30, -inf }
 0xc81   : > { %3395 = vmax.xlane.f32.xlu1 %v3394_v32  ;;  %v6477_v34 = vpop.f32.mrf.mxu1  ;;  %v6482_v35 = vpop.f32.mrf.mxu0 }
 0xc83   : > { %v3388_v36 = vpop.f32.mrf.mxu0 }
 0xc85   : > { %v6483_v37 = vpop.f32.mrf.mxu0 }
 0xc92   : > { %3463 = vrot.lane.b32.xlu1 %v9152_v51, %s8106_s26 }
 0xc96   : > { %6917 = vrot.lane.b32.xlu1 %v6916_v26, %s8107_s2 }
 0xc9a   : > { %6922 = vrot.lane.b32.xlu1 %v6921_v39, %s8108_s12 }
 0xd06   : > { %v3393_v41 = vpop.xlane.xlu0 %3392 }
 0xd07   : > { %v3397_v43 = vsub.f32 %v3335_v21, %v3393_v41 }
 0xd09   : > { %v3399_v44 = vmul.f32 1.442695, %v3397_v43 }
 0xd0a   : > { %v3396_v45 = vpop.xlane.xlu1 %3395 }
 0xd0b   : > { %7010 = vpow2.f32 %v3399_v44  ;;  %v3398_v46 = vsub.f32 %v3385_v30, %v3396_v45 }
 0xd0d   : > { %v3401_v47 = vmul.f32 1.442695, %v3398_v46 }
 0xd0e   : > { %v3464_v48 = vpop.permute.xlu1 %3463 }
 0xd0f   : > { %7012 = vpow2.f32 %v3401_v47  ;;  %v3469_v51 = vsel %vm2755_vm10, %v3464_v48, 0 }
 0xd10   : > { %6491 = vmatpush3.bf16.msra.mxu0 %v3469_v51 }
 0xd11   : > { %6508 = vmatprep.subr.bf16.mxu0 %v8102_v7 }
 0xd12   : > { %v6918_v6 = vpop.permute.xlu1 %6917 }
 0xd13   : > { %v6920_v12 = vunpack.i.h.bf16 %v6918_v6  ;;  %v6919_v13 = vunpack.i.l.bf16 %v6918_v6  ;;  %v6967_v6 = vld [vmem:[%s9047_s13 + $0x10] sm:$0xff]  }
 0xd15   : > { %v3536_v17 = vsel %vm2634_vm9, %v9188_v33, %v6920_v12  ;;  %v3535_v19 = vsel %vm2634_vm9, %v9186_v29, %v6919_v13  ;;  %v6162_v33 = vld [vmem:[%s9868_s18] ss:$0 sm:$0xff] }
 0xd16   : > { %v6923_v8 = vpop.permute.xlu1 %6922  ;;  %v6971_v12 = vld [vmem:[%s9047_s13] sm:$0xff]  }
 0xd17   : > { %v6925_v14 = vunpack.i.h.bf16 %v6923_v8  ;;  %v6924_v15 = vunpack.i.l.bf16 %v6923_v8  ;;  %v6969_v8 = vld [vmem:[%s9047_s13 + $0x8] sm:$0xff]  }
 0xd18   : > { %v7011_v22 = vpop.eup %7010 }
 0xd19   : > { %v3403_v25 = vsel %vm2727_vm11, %v7011_v22, 0.0  ;;  %v3538_v23 = vsel %vm2437_vm7, %v3536_v17, %v6925_v14  ;;  %v3537_v24 = vsel %vm2437_vm7, %v3535_v19, %v6924_v15 }
 0xd1a   : > { %3404 = vadd.xlane.f32.xlu0 %v3403_v25 }
 0xd1c   : > { %v7013_v26 = vpop.eup %7012 }
 0xd1d   : > { %v3406_v49 = vsel %vm2727_vm11, %v7013_v26, 0.0 }
 0xd1e   : > { %3407 = vadd.xlane.f32.xlu0 %v3406_v49 }
 0xd34   : > { %3415 = vrot.lane.b32.xlu0 %v9150_v50, %s8106_s26 }
 0xda3   : > { %v3405_v52 = vpop.xlane.xlu0 %3404 }
 0xda4   : > { %7014 = vrcp.f32 %v3405_v52  ;;  %v6961_v52 = vld [vmem:[%s9870_s9] sm:$0xff]  }
 0xda7   : > { %v3408_v53 = vpop.xlane.xlu0 %3407 }
 0xda8   : > { %7016 = vrcp.f32 %v3408_v53 }
 0xdab   : > { %v3416_v54 = vpop.permute.xlu0 %3415 }
 0xdac   : > { %v3421_v55 = vsel %vm2755_vm10, %v3416_v54, 0 }
 0xdad   : > { %6485 = vmatpush3.bf16.msra.mxu1 %v3421_v55 }
 0xdae   : > { %6496 = vmatprep.subr.bf16.mxu1 %v8102_v7 }
 0xdb1   : > { %v7015_v56 = vpop.eup %7014 }
 0xdb2   : > { %v3410_v31 = vmul.f32 %v7015_v56, %v7011_v22 }
 0xdb4   : > { %v3413_v38 = vpack.c.bf16 %v3410_v31, %v3410_v31 }
 0xdb5   : > { %v7017_v57 = vpop.eup %7016 }
 0xdb6   : > { %6487 = vmatmul.mubr.msk.bf16.vlgmr.msra.gmra.mxu1 %vm2727_vm11, %v3413_v38  ;;  %v3412_v50 = vmul.f32 %v7017_v57, %v7013_v26 }
 0xdb7   : > { %6504 = vmatprep.mubr.msk.bf16.mxu1 %vm8103_vm6, %v8102_v7  ;;  %6497 = vmatpush3.bf16.msra.mxu1 %v6956_v58 }
 0xdb8   : > { %v3414_v42 = vpack.c.bf16 %v3412_v50, %v3412_v50  ;;  %6498 = vmatprep.subr.bf16.mxu1 %v8102_v7 }
 0xdba   : > { %6493 = vmatmul.mubr.msk.bf16.vlgmr.msra.gmra.mxu0 %vm2727_vm11, %v3414_v42  ;;  %v6168_v42 = vld [vmem:[%s9871_s0] ss:$0 sm:$0xff]  ;;  %s9878_s0 = scalar_lea.vmem [#allocation28], %s8936_s1 }
 0xdbb   : > { %6512 = vmatprep.mubr.msk.bf16.mxu0 %vm8103_vm6, %v8102_v7  ;;  %6499 = vmatpush3.bf16.msra.mxu1 %v6957_v59 }
 0xdbc   : > { %6500 = vmatprep.subr.bf16.mxu1 %v8102_v7 }
 0xdbf   : > { %6501 = vmatpush3.bf16.msra.mxu1 %v6958_v60 }
 0xdc0   : > { %6502 = vmatprep.subr.bf16.mxu1 %v8102_v7 }
 0xdc3   : > { %6503 = vmatpush3.bf16.msra.mxu1 %v6959_v61  ;;  %v6169_v61 = vld [vmem:[%s9872_s20] ss:$0 sm:$0xff]  ;;  %s9880_s20 = scalar_lea.vmem [#allocation32], %s8936_s1 }
 0xdc4   : > { %6528 = vmatprep.subr.bf16.mxu1 %v8102_v7 }
 0xe76   : > { %v3457_v62 = vpop.f32.mrf.mxu1 }
 0xe78   : > { %v6488_v63 = vpop.f32.mrf.mxu1 }
 0xe7a   : > { %v3460_v0 = vpop.f32.mrf.mxu1  ;;  %v3505_v1 = vpop.f32.mrf.mxu0 }
 0xe7b   : > { %v6926_v2 = vpack.i.bf16 %v3505_v1, %v3457_v62  ;;  %v6962_v1 = vld [vmem:[%s9044_s22 + $0x18] sm:$0xff]  }
 0xe7c   : > { %v6489_v3 = vpop.f32.mrf.mxu1  ;;  %v6494_v40 = vpop.f32.mrf.mxu0 }
 0xe7d   : > { %6927 = vrot.lane.b32.xlu0 %v6926_v2, %s8109_s8  ;;  %v6963_v3 = vld [vmem:[%s9044_s22 + $0x10] sm:$0xff]   ;;  %v6964_v40 = vld [vmem:[%s9044_s22 + $0x8] sm:$0xff]  }
 0xe7e   : > { %v3508_v4 = vpop.f32.mrf.mxu0 }
 0xe7f   : > { %v6965_v4 = vld [vmem:[%s9047_s13 + $0x18] sm:$0xff]   ;;  %s9874_s13 = scalar_lea.vmem [#allocation34], %s8939_s30 }
 0xe80   : > { %v6495_v5 = vpop.f32.mrf.mxu0  ;;  %s9875_s18 = smov %s9874_s13 }
 0xe81   : > { %v6966_v5 = vld [vmem:[%s9044_s22] sm:$0xff]   ;;  %s9873_s22 = scalar_lea.vmem [#allocation26], %s8936_s1 }
 0xe82   : > { %v6170_v13 = vld [vmem:[%s9873_s22] ss:$0 sm:$0xff]  ;;  %s9881_s22 = scalar_lea.vmem [#allocation38], %s8936_s1 }
 0xeef   : > { %v6928_v16 = vpop.permute.xlu0 %6927 }
 0xef0   : > { %v6930_v20 = vunpack.i.h.bf16 %v6928_v16  ;;  %v6929_v21 = vunpack.i.l.bf16 %v6928_v16 }
 0xef2   : > { %v3541_v27 = vsel %vm3539_vm12, %v3538_v23, %v6930_v20  ;;  %v3540_v28 = vsel %vm3539_vm12, %v3537_v24, %v6929_v21  ;;  %v6968_v24 = vld [vmem:[%s9874_s13 + $0x8] sm:$0xff]  }
 0xef3   : > { %v3542_v30 = vpack.c.bf16 %v3541_v27, %v3540_v28 }
 0xef5   : > { %6505 = vmatmul.mubr.msk.bf16.vlgmr.msra.gmra.mxu1 %vm2512_vm8, %v3542_v30 }
 0xef6   : > { %6536 = vmatprep.mubr.msk.bf16.mxu1 %vm8103_vm6, %v8102_v7  ;;  %6529 = vmatpush3.bf16.msra.mxu1 %v6965_v4 }
 0xef7   : > { %6530 = vmatprep.subr.bf16.mxu1 %v8102_v7 }
 0xefa   : > { %6531 = vmatpush3.bf16.msra.mxu1 %v6967_v6 }
 0xefb   : > { %6532 = vmatprep.subr.bf16.mxu1 %v8102_v7 }
 0xefe   : > { %6533 = vmatpush3.bf16.msra.mxu1 %v6969_v8 }
 0xeff   : > { %6534 = vmatprep.subr.bf16.mxu1 %v8102_v7 }
 0xf02   : > { %6535 = vmatpush3.bf16.msra.mxu1 %v6971_v12 }
 0xf03   : > { %6548 = vmatprep.subr.bf16.mxu1 %v8102_v7 }
 0xf05   : > { %6537 = vmatmul.mubr.msk.bf16.vlgmr.msra.gmra.mxu1 %vm2512_vm8, %v9101_v18  ;;  %v6970_v18 = vld [vmem:[%s9875_s18] sm:$0xff]  }
 0xf06   : > { %6552 = vmatprep.mubr.msk.bf16.mxu1 %vm8103_vm6, %v8102_v7 }
 0xfb5   : > { %v3610_v32 = vpop.f32.mrf.mxu1 }
 0xfb6   : > { %v3611_v29 = vadd.f32 %v6162_v33, %v3610_v32 }
 0xfb7   : > { %v6506_v34 = vpop.f32.mrf.mxu1 }
 0xfb8   : > { %v3617_v35 = vadd.f32 %v3611_v29, %v9078_v9 }
 0xfb9   : > { %v3613_v36 = vpop.f32.mrf.mxu1 }
 0xfba   : > { %v3614_v37 = vadd.f32 %v6162_v33, %v3613_v36  ;;  %v3619_v39 = vsel %vm2437_vm7, %v3617_v35, 0.0 }
 0xfbb   : > { %3620 = vadd.xlane.f32.xlu1 %v3619_v39  ;;  %v6507_v41 = vpop.f32.mrf.mxu1 }
 0xfbc   : > { %v3618_v43 = vadd.f32 %v3614_v37, %v9080_v10  ;;  %v6960_v10 = vld [vmem:[%s9869_s11 + $0x8] sm:$0xff]   ;;  %s9876_s11 = scalar_lea.vmem [#allocation37], %s8939_s30  ;;  %s9879_s30 = scalar_lea.vmem [#allocation35], %s8936_s1 }
 0xfbd   : > { %6509 = vmatpush3.bf16.msra.mxu0 %v6960_v10  ;;  %v6972_v28 = vld [vmem:[%s9876_s11 + $0x8] sm:$0xff]   ;;  %s9877_s9 = smov %s9876_s11 }
 0xfbe   : > { %v3622_v44 = vsel %vm2437_vm7, %v3618_v43, 0.0  ;;  %6510 = vmatprep.subr.bf16.mxu0 %v8102_v7  ;;  %6549 = vmatpush3.bf16.msra.mxu1 %v6972_v28  ;;  %v6973_v30 = vld [vmem:[%s9877_s9] sm:$0xff]  }
 0xfbf   : > { %3623 = vadd.xlane.f32.xlu0 %v3622_v44  ;;  %6550 = vmatprep.subr.bf16.mxu1 %v8102_v7  ;;  %v6188_v44 = vld [vmem:[%s9879_s30] ss:$0 sm:$0xff] }
 0xfc1   : > { %6511 = vmatpush3.bf16.msra.mxu0 %v6961_v52 }
 0xfc2   : > { %6516 = vmatprep.subr.bf16.mxu0 %v8102_v7  ;;  %6551 = vmatpush3.bf16.msra.mxu1 %v6973_v30 }
 0xfc3   : > { %6562 = vmatprep.subr.bf16.mxu1 %v8102_v7 }
 0xfc5   : > { %v3956_v33 = vpop.f32.mrf.mxu1  ;;  %6553 = vmatmul.mubr.msk.bf16.vlgmr.msra.gmra.mxu1 %vm2437_vm7, %v9087_v11 }
 0xfc6   : > { %6564 = vmatprep.mubr.msk.bf16.mxu1 %vm8103_vm6, %v8102_v7 }
 0xfc7   : > { %v6538_v32 = vpop.f32.mrf.mxu1 }
 0xfc9   : > { %v3959_v29 = vpop.f32.mrf.mxu1 }
 0xfcb   : > { %v6539_v34 = vpop.f32.mrf.mxu1 }
0x1044   : > { %v3621_v45 = vpop.xlane.xlu1 %3620 }
0x1045   : > { %v3626_v46 = vmul.f32 0.03125, %v3621_v45 }
0x1047   : > { %v3628_v47 = vsub.f32 %v3617_v35, %v3626_v46  ;;  %v9385_v35 = vld [vmem:[%s9878_s0] ss:$0 sm:$0xff] }
0x1048   : > { %v3624_v48 = vpop.xlane.xlu0 %3623 }
0x1049   : > { %v3627_v51 = vmul.f32 0.03125, %v3624_v48  ;;  %v3630_v22 = vmul.f32 %v3628_v47, %v3628_v47 }
0x104b   : > { %v3629_v9 = vsub.f32 %v3618_v43, %v3627_v51  ;;  %v3632_v25 = vsel %vm2437_vm7, %v3630_v22, 0.0 }
0x104c   : > { %3633 = vadd.xlane.f32.xlu0 %v3632_v25 }
0x104d   : > { %v3631_v26 = vmul.f32 %v3629_v9, %v3629_v9 }
0x104f   : > { %v3635_v49 = vsel %vm2437_vm7, %v3631_v26, 0.0 }
0x1050   : > { %3636 = vadd.xlane.f32.xlu0 %v3635_v49 }
0x10d5   : > { %v3634_v53 = vpop.xlane.xlu0 %3633 }
0x10d6   : > { %v3638_v54 = vmul.f32 0.03125, %v3634_v53 }
0x10d8   : > { %v3640_v55 = vadd.f32 1e-06, %v3638_v54 }
0x10d9   : > { %v3637_v56 = vpop.xlane.xlu0 %3636 }
0x10da   : > { %7018 = vrsqrt.f32 %v3640_v55  ;;  %v3639_v31 = vmul.f32 0.03125, %v3637_v56  ;;  %v6192_v55 = vld [vmem:[%s9881_s22] ss:$0 sm:$0xff]  ;;  %v4074_v56 = vpop.f32.mrf.mxu1 }
0x10dc   : > { %v3641_v38 = vadd.f32 1e-06, %v3639_v31  ;;  %v6554_v31 = vpop.f32.mrf.mxu1 }
0x10de   : > { %7020 = vrsqrt.f32 %v3641_v38  ;;  %v4075_v38 = vadd.f32 %v6192_v55, %v4074_v56 }
0x10e7   : > { %v7019_v57 = vpop.eup %7018 }
0x10e8   : > { %v3644_v50 = vmul.f32 %v7019_v57, %v3628_v47  ;;  %v6182_v47 = vld [vmem:[%s9880_s20] ss:$0 sm:$0xff]  ;;  %v4077_v57 = vpop.f32.mrf.mxu1 }
0x10e9   : > { %v3957_v22 = vadd.f32 %v6182_v47, %v3956_v33  ;;  %v3960_v53 = vadd.f32 %v6182_v47, %v3959_v29 }
0x10ea   : > { %v3652_v60 = vmul.f32 %v6168_v42, %v3644_v50  ;;  %v4078_v50 = vadd.f32 %v6192_v55, %v4077_v57 }
0x10eb   : > { %v7021_v58 = vpop.eup %7020  ;;  %v9403_v10 = vpack.c.bf16 %v3957_v22, %v3957_v22  ;;  %v9412_v54 = vpack.c.bf16 %v3960_v53, %v3960_v53 }
0x10ec   : > { %v3645_v59 = vmul.f32 %v7021_v58, %v3629_v9  ;;  %v9329_v63 = vadd.f32 %v6169_v61, %v3652_v60  ;;  %v9420_v58 = vpack.c.bf16 %v4075_v38, %v4075_v38 }
0x10ee   : > { %v3653_v62 = vmul.f32 %v6168_v42, %v3645_v59  ;;  %v6555_v42 = vpop.f32.mrf.mxu1  ;;  %v9422_v59 = vpack.c.bf16 %v4078_v50, %v4078_v50  ;;  %v4207_v60 = vsel %vm2755_vm10, %v9420_v58, 0 }
0x10f0   : > { %v9331_v0 = vadd.f32 %v6169_v61, %v3653_v62  ;;  %v4253_v61 = vsel %vm2755_vm10, %v9422_v59, 0 }
0x10f2   : > { %v3678_v2 = vpack.c.bf16 %v9331_v0, %v9329_v63 }
0x10f4   : > { %6513 = vmatmul.mubr.msk.bf16.vlgmr.msra.gmra.mxu0 %vm2437_vm7, %v3678_v2 }
0x10f5   : > { %6517 = vmatpush3.bf16.msra.mxu0 %v6962_v1  ;;  %6524 = vmatprep.mubr.msk.bf16.mxu0 %vm8103_vm6, %v8102_v7 }
0x10f6   : > { %6518 = vmatprep.subr.bf16.mxu0 %v8102_v7 }
0x10f9   : > { %6519 = vmatpush3.bf16.msra.mxu0 %v6963_v3 }
0x10fa   : > { %6520 = vmatprep.subr.bf16.mxu0 %v8102_v7 }
0x10fd   : > { %6521 = vmatpush3.bf16.msra.mxu0 %v6964_v40 }
0x10fe   : > { %6522 = vmatprep.subr.bf16.mxu0 %v8102_v7 }
0x1101   : > { %6523 = vmatpush3.bf16.msra.mxu0 %v6966_v5 }
0x1102   : > { %6540 = vmatprep.subr.bf16.mxu0 %v8102_v7 }
0x11b4   : > { %v3734_v14 = vpop.f32.mrf.mxu0 }
0x11b5   : > { %v3735_v16 = vadd.f32 %v6170_v13, %v3734_v14 }
0x11b6   : > { %v6514_v15 = vpop.f32.mrf.mxu0 }
0x11b7   : > { %v3741_v21 = vmax.f32 %v3735_v16, 0.0 }
0x11b8   : > { %v3737_v17 = vpop.f32.mrf.mxu0 }
0x11b9   : > { %v3738_v19 = vadd.f32 %v6170_v13, %v3737_v17 }
0x11ba   : > { %v6515_v20 = vpop.f32.mrf.mxu0 }
0x11bb   : > { %v3742_v23 = vmax.f32 %v3738_v19, 0.0 }
0x11bd   : > { %v3743_v27 = vpack.c.bf16 %v3742_v23, %v3741_v21 }
0x11bf   : > { %6525 = vmatmul.mubr.msk.bf16.vlgmr.msra.gmra.mxu0 %vm2512_vm8, %v3743_v27 }
0x11c0   : > { %6541 = vmatpush3.bf16.msra.mxu0 %v6968_v24  ;;  %6544 = vmatprep.mubr.msk.bf16.mxu0 %vm8103_vm6, %v8102_v7 }
0x11c1   : > { %6542 = vmatprep.subr.bf16.mxu0 %v8102_v7 }
0x11c4   : > { %6543 = vmatpush3.bf16.msra.mxu0 %v6970_v18 }
0x11c5   : > { %6556 = vmatprep.subr.bf16.mxu0 %v8102_v7 }
0x11c7   : > { %6545 = vmatmul.mubr.msk.bf16.vlgmr.msra.gmra.mxu0 %vm2437_vm7, %v9087_v11 }
0x11c8   : > { %6558 = vmatprep.mubr.msk.bf16.mxu0 %vm8103_vm6, %v8102_v7 }
0x127f   : > { %v3811_v36 = vpop.f32.mrf.mxu0 }
0x1280   : > { %v9388_v37 = vadd.f32 %v9385_v35, %v3811_v36 }
0x1281   : > { %v6526_v39 = vpop.f32.mrf.mxu0 }
0x1283   : > { %v9390_v41 = vpop.f32.mrf.mxu0 }
0x1285   : > { %v6527_v43 = vpop.f32.mrf.mxu0 }
0x1287   : > { %v4015_v11 = vpop.f32.mrf.mxu0 }
0x1288   : > { %v4016_v45 = vadd.f32 %v6188_v44, %v4015_v11 }
0x1289   : > { %v6546_v46 = vpop.f32.mrf.mxu0 }
0x128a   : > { %v9396_v48 = vpack.c.bf16 %v4016_v45, %v4016_v45 }
0x128b   : > { %v4018_v51 = vpop.f32.mrf.mxu0 }
0x128c   : > { %v4019_v9 = vadd.f32 %v6188_v44, %v4018_v51  ;;  %v4091_v25 = vsel %vm2634_vm9, %v9396_v48, 0 }
0x128d   : > { %v6547_v26 = vpop.f32.mrf.mxu0  ;;  %6557 = vmatpush3.bf16.xpose.msra.mxu0 %v4091_v25 }
0x128e   : > { %v9400_v49 = vpack.c.bf16 %v4019_v9, %v4019_v9  ;;  %6568 = vmatprep.subr.bf16.mxu0 %v8102_v7 }
0x1290   : > { %v4137_v52 = vsel %vm2634_vm9, %v9400_v49, 0 }
0x1291   : > { %6563 = vmatpush3.bf16.xpose.msra.mxu1 %v4137_v52 }
0x1292   : > { %6574 = vmatprep.subr.bf16.mxu1 %v8102_v7 }
0x1294   : > { %6559 = vmatmul.mubr.msk.bf16.vlgmr.msra.gmra.mxu0 %vm2634_vm9, %v9403_v10 }
0x1295   : > { %6570 = vmatprep.mubr.msk.bf16.mxu0 %vm8103_vm6, %v8102_v7  ;;  %6569 = vmatpush3.bf16.msra.mxu0 %v4207_v60 }
0x1296   : > { %6580 = vmatprep.subr.bf16.mxu0 %v8102_v7 }
0x1298   : > { %6565 = vmatmul.mubr.msk.bf16.vlgmr.msra.gmra.mxu1 %vm2634_vm9, %v9412_v54 }
0x1299   : > { %6576 = vmatprep.mubr.msk.bf16.mxu1 %vm8103_vm6, %v8102_v7  ;;  %6575 = vmatpush3.bf16.msra.mxu1 %v4253_v61 }
0x129a   : > { %6586 = vmatprep.subr.bf16.mxu1 %v8102_v7 }
0x1354   : > { %v4127_v62 = vpop.f32.mrf.mxu0 }
0x1355   : > { %v4179_v1 = vsel %vm2727_vm11, %v4127_v62, -inf }
0x1356   : > { %4180 = vmax.xlane.f32.xlu1 %v4179_v1  ;;  %v6560_v2 = vpop.f32.mrf.mxu0 }
0x1358   : > { %v4130_v3 = vpop.f32.mrf.mxu0  ;;  %v4173_v40 = vpop.f32.mrf.mxu1 }
0x1359   : > { %v4182_v4 = vsel %vm2727_vm11, %v4173_v40, -inf }
0x135a   : > { %v6561_v5 = vpop.f32.mrf.mxu0  ;;  %4183 = vmax.xlane.f32.xlu0 %v4182_v4  ;;  %v6566_v6 = vpop.f32.mrf.mxu1 }
0x135c   : > { %v4176_v8 = vpop.f32.mrf.mxu1 }
0x135e   : > { %v6567_v12 = vpop.f32.mrf.mxu1 }
0x1367   : > { %4299 = vrot.lane.b32.xlu1 %v9396_v48, %s8104_s17 }
0x13df   : > { %v4181_v13 = vpop.xlane.xlu1 %4180 }
0x13e0   : > { %v4185_v14 = vsub.f32 %v4127_v62, %v4181_v13 }
0x13e2   : > { %v4187_v15 = vmul.f32 1.442695, %v4185_v14 }
0x13e3   : > { %v4184_v16 = vpop.xlane.xlu0 %4183  ;;  %v4300_v27 = vpop.permute.xlu1 %4299 }
0x13e4   : > { %7022 = vpow2.f32 %v4187_v15  ;;  %v4186_v17 = vsub.f32 %v4173_v40, %v4184_v16  ;;  %v4305_v34 = vsel %vm2634_vm9, %v4300_v27, 0 }
0x13e6   : > { %v4189_v19 = vmul.f32 1.442695, %v4186_v17 }
0x13e8   : > { %7024 = vpow2.f32 %v4189_v19 }
0x13f1   : > { %v7023_v20 = vpop.eup %7022 }
0x13f2   : > { %v4191_v21 = vsel %vm2727_vm11, %v7023_v20, 0.0 }
0x13f3   : > { %4192 = vadd.xlane.f32.xlu1 %v4191_v21 }
0x13f5   : > { %v7025_v23 = vpop.eup %7024 }
0x13f6   : > { %v4194_v24 = vsel %vm2727_vm11, %v7025_v23, 0.0 }
0x13f7   : > { %4195 = vadd.xlane.f32.xlu0 %v4194_v24 }
0x1404   : > { %4296 = vrot.lane.b32.xlu1 %v9403_v10, %s8104_s17 }
0x1408   : > { %4348 = vrot.lane.b32.xlu1 %v9412_v54, %s8104_s17 }
0x140d   : > { %4351 = vrot.lane.b32.xlu0 %v9400_v49, %s8104_s17 }
0x147c   : > { %v4193_v18 = vpop.xlane.xlu1 %4192 }
0x147d   : > { %7026 = vrcp.f32 %v4193_v18 }
0x1480   : > { %v4196_v28 = vpop.xlane.xlu0 %4195  ;;  %v4297_v11 = vpop.permute.xlu1 %4296 }
0x1481   : > { %7028 = vrcp.f32 %v4196_v28 }
0x1484   : > { %v4352_v39 = vpop.permute.xlu0 %4351  ;;  %v4349_v45 = vpop.permute.xlu1 %4348 }
0x1485   : > { %v4357_v44 = vsel %vm2634_vm9, %v4352_v39, 0 }
0x148a   : > { %v7027_v30 = vpop.eup %7026 }
0x148b   : > { %v4198_v33 = vmul.f32 %v7027_v30, %v7023_v20 }
0x148d   : > { %v4201_v32 = vpack.c.bf16 %v4198_v33, %v4198_v33 }
0x148e   : > { %v7029_v29 = vpop.eup %7028 }
0x148f   : > { %6571 = vmatmul.mubr.msk.bf16.vlgmr.msra.gmra.mxu0 %vm2727_vm11, %v4201_v32  ;;  %v4200_v36 = vmul.f32 %v7029_v29, %v7025_v23 }
0x1490   : > { %6581 = vmatpush3.bf16.xpose.msra.mxu0 %v4305_v34  ;;  %6582 = vmatprep.mubr.msk.bf16.mxu0 %vm8103_vm6, %v8102_v7 }
0x1491   : > { %v4202_v43 = vpack.c.bf16 %v4200_v36, %v4200_v36  ;;  %6592 = vmatprep.subr.bf16.mxu0 %v8102_v7 }
0x1493   : > { %6577 = vmatmul.mubr.msk.bf16.vlgmr.msra.gmra.mxu1 %vm2727_vm11, %v4202_v43 }
0x1494   : > { %6587 = vmatpush3.bf16.xpose.msra.mxu1 %v4357_v44  ;;  %6588 = vmatprep.mubr.msk.bf16.mxu1 %vm8103_vm6, %v8102_v7 }
0x1495   : > { %6598 = vmatprep.subr.bf16.mxu1 %v8102_v7 }
0x1497   : > { %6583 = vmatmul.mubr.msk.bf16.vlgmr.msra.gmra.mxu0 %vm2634_vm9, %v4297_v11 }
0x1498   : > { %6594 = vmatprep.mubr.msk.bf16.mxu0 %vm8103_vm6, %v8102_v7 }
0x149b   : > { %6589 = vmatmul.mubr.msk.bf16.vlgmr.msra.gmra.mxu1 %vm2634_vm9, %v4349_v45 }
0x149c   : > { %6600 = vmatprep.mubr.msk.bf16.mxu1 %vm8103_vm6, %v8102_v7 }
0x154f   : > { %v9458_v46 = vpop.f32.mrf.mxu0 }
0x1551   : > { %v6572_v47 = vpop.f32.mrf.mxu0 }
0x1553   : > { %v4246_v51 = vpop.f32.mrf.mxu0  ;;  %v9460_v22 = vpop.f32.mrf.mxu1 }
0x1555   : > { %v6573_v9 = vpop.f32.mrf.mxu0  ;;  %v6578_v25 = vpop.f32.mrf.mxu1 }
0x1557   : > { %v4292_v26 = vpop.f32.mrf.mxu1  ;;  %v4341_v52 = vpop.f32.mrf.mxu0 }
0x1558   : > { %v4399_v53 = vsel %vm2727_vm11, %v4341_v52, -inf }
0x1559   : > { %4400 = vmax.xlane.f32.xlu1 %v4399_v53  ;;  %v6579_v55 = vpop.f32.mrf.mxu1  ;;  %v6584_v56 = vpop.f32.mrf.mxu0 }
0x155b   : > { %v4344_v31 = vpop.f32.mrf.mxu0  ;;  %v4393_v38 = vpop.f32.mrf.mxu1 }
0x155c   : > { %v4402_v57 = vsel %vm2727_vm11, %v4393_v38, -inf }
0x155d   : > { %v6585_v50 = vpop.f32.mrf.mxu0  ;;  %4403 = vmax.xlane.f32.xlu0 %v4402_v57  ;;  %v6590_v42 = vpop.f32.mrf.mxu1 }
0x155f   : > { %v4396_v60 = vpop.f32.mrf.mxu1 }
0x1561   : > { %v6591_v61 = vpop.f32.mrf.mxu1 }
0x156a   : > { %4424 = vrot.lane.b32.xlu1 %v9420_v58, %s8104_s17 }
0x156e   : > { %4523 = vrot.lane.b32.xlu1 %v9396_v48, %s8105_s5 }
0x1572   : > { %4573 = vrot.lane.b32.xlu1 %v9400_v49, %s8105_s5 }
0x1576   : > { %4521 = vrot.lane.b32.xlu1 %v9403_v10, %s8105_s5 }
0x15e2   : > { %v4401_v62 = vpop.xlane.xlu1 %4400 }
0x15e3   : > { %v4405_v1 = vsub.f32 %v4341_v52, %v4401_v62 }
0x15e5   : > { %v4407_v2 = vmul.f32 1.442695, %v4405_v1 }
0x15e6   : > { %v4425_v3 = vpop.permute.xlu1 %4424  ;;  %v4404_v40 = vpop.xlane.xlu0 %4403 }
0x15e7   : > { %7030 = vpow2.f32 %v4407_v2  ;;  %v4430_v4 = vsel %vm2755_vm10, %v4425_v3, 0  ;;  %v4406_v5 = vsub.f32 %v4393_v38, %v4404_v40 }
0x15e8   : > { %6593 = vmatpush3.bf16.msra.mxu0 %v4430_v4 }
0x15e9   : > { %v4409_v6 = vmul.f32 1.442695, %v4406_v5  ;;  %6604 = vmatprep.subr.bf16.mxu0 %v8102_v7 }
0x15ea   : > { %v4524_v21 = vpop.permute.xlu1 %4523 }
0x15eb   : > { %7032 = vpow2.f32 %v4409_v6  ;;  %v4529_v18 = vsel %vm2634_vm9, %v4524_v21, 0 }
0x15ee   : > { %v4574_v30 = vpop.permute.xlu1 %4573 }
0x15ef   : > { %v4579_v32 = vsel %vm2634_vm9, %v4574_v30, 0 }
0x15f2   : > { %v4522_v29 = vpop.permute.xlu1 %4521 }
0x15f4   : > { %v7031_v8 = vpop.eup %7030 }
0x15f5   : > { %v4411_v12 = vsel %vm2727_vm11, %v7031_v8, 0.0 }
0x15f6   : > { %4412 = vadd.xlane.f32.xlu0 %v4411_v12 }
0x15f8   : > { %v7033_v13 = vpop.eup %7032 }
0x15f9   : > { %v4414_v14 = vsel %vm2727_vm11, %v7033_v13, 0.0 }
0x15fa   : > { %4415 = vadd.xlane.f32.xlu0 %v4414_v14 }
0x1610   : > { %4473 = vrot.lane.b32.xlu0 %v9422_v59, %s8104_s17  ;;  %s9884_s17 = scalar_lea.vmem [#allocation44], %s8936_s1 }
0x1614   : > { %4571 = vrot.lane.b32.xlu0 %v9412_v54, %s8105_s5 }
0x167f   : > { %v4413_v15 = vpop.xlane.xlu0 %4412 }
0x1680   : > { %7034 = vrcp.f32 %v4413_v15 }
0x1683   : > { %v4416_v16 = vpop.xlane.xlu0 %4415 }
0x1684   : > { %7036 = vrcp.f32 %v4416_v16 }
0x1687   : > { %v4474_v17 = vpop.permute.xlu0 %4473 }
0x1688   : > { %v4479_v19 = vsel %vm2755_vm10, %v4474_v17, 0 }
0x1689   : > { %6599 = vmatpush3.bf16.msra.mxu1 %v4479_v19 }
0x168a   : > { %6610 = vmatprep.subr.bf16.mxu1 %v8102_v7 }
0x168b   : > { %v4572_v34 = vpop.permute.xlu0 %4571 }
0x168d   : > { %v7035_v20 = vpop.eup %7034 }
0x168e   : > { %v4418_v23 = vmul.f32 %v7035_v20, %v7031_v8 }
0x1690   : > { %v4421_v24 = vpack.c.bf16 %v4418_v23, %v4418_v23 }
0x1691   : > { %v7037_v27 = vpop.eup %7036 }
0x1692   : > { %6595 = vmatmul.mubr.msk.bf16.vlgmr.msra.gmra.mxu0 %vm2727_vm11, %v4421_v24  ;;  %v4420_v28 = vmul.f32 %v7037_v27, %v7033_v13 }
0x1693   : > { %6605 = vmatpush3.bf16.xpose.msra.mxu0 %v4529_v18  ;;  %6606 = vmatprep.mubr.msk.bf16.mxu0 %vm8103_vm6, %v8102_v7 }
0x1694   : > { %v4422_v33 = vpack.c.bf16 %v4420_v28, %v4420_v28  ;;  %6616 = vmatprep.subr.bf16.mxu0 %v8102_v7 }
0x1696   : > { %6601 = vmatmul.mubr.msk.bf16.vlgmr.msra.gmra.mxu1 %vm2727_vm11, %v4422_v33 }
0x1697   : > { %6611 = vmatpush3.bf16.xpose.msra.mxu1 %v4579_v32  ;;  %6612 = vmatprep.mubr.msk.bf16.mxu1 %vm8103_vm6, %v8102_v7 }
0x1698   : > { %6622 = vmatprep.subr.bf16.mxu1 %v8102_v7 }
0x169a   : > { %6607 = vmatmul.mubr.msk.bf16.vlgmr.msra.gmra.mxu0 %vm2634_vm9, %v4522_v29 }
0x169b   : > { %6618 = vmatprep.mubr.msk.bf16.mxu0 %vm8103_vm6, %v8102_v7 }
0x169e   : > { %6613 = vmatmul.mubr.msk.bf16.vlgmr.msra.gmra.mxu1 %vm2634_vm9, %v4572_v34 }
0x169f   : > { %6624 = vmatprep.mubr.msk.bf16.mxu1 %vm8103_vm6, %v8102_v7 }
0x1752   : > { %v9498_v36 = vpop.f32.mrf.mxu0 }
0x1754   : > { %v6596_v39 = vpop.f32.mrf.mxu0 }
0x1756   : > { %v4469_v43 = vpop.f32.mrf.mxu0  ;;  %v9500_v44 = vpop.f32.mrf.mxu1 }
0x1757   : > { %v6931_v11 = vpack.i.bf16 %v9500_v44, %v9498_v36 }
0x1758   : > { %v6597_v45 = vpop.f32.mrf.mxu0  ;;  %v6602_v47 = vpop.f32.mrf.mxu1 }
0x175a   : > { %v4518_v51 = vpop.f32.mrf.mxu1  ;;  %v4565_v9 = vpop.f32.mrf.mxu0 }
0x175b   : > { %v4621_v25 = vsel %vm2727_vm11, %v4565_v9, -inf }
0x175c   : > { %4622 = vmax.xlane.f32.xlu1 %v4621_v25  ;;  %v6603_v26 = vpop.f32.mrf.mxu1  ;;  %v6608_v52 = vpop.f32.mrf.mxu0 }
0x175e   : > { %v4568_v53 = vpop.f32.mrf.mxu0  ;;  %v4615_v55 = vpop.f32.mrf.mxu1 }
0x175f   : > { %v4624_v56 = vsel %vm2727_vm11, %v4615_v55, -inf }
0x1760   : > { %v6609_v31 = vpop.f32.mrf.mxu0  ;;  %4625 = vmax.xlane.f32.xlu0 %v4624_v56  ;;  %v6614_v38 = vpop.f32.mrf.mxu1 }
0x1762   : > { %v4618_v57 = vpop.f32.mrf.mxu1 }
0x1764   : > { %v6615_v50 = vpop.f32.mrf.mxu1 }
0x176d   : > { %4645 = vrot.lane.b32.xlu1 %v9420_v58, %s8105_s5 }
0x1771   : > { %4743 = vrot.lane.b32.xlu1 %v9396_v48, %s8106_s26 }
0x1775   : > { %4793 = vrot.lane.b32.xlu1 %v9400_v49, %s8106_s26 }
0x1779   : > { %4741 = vrot.lane.b32.xlu1 %v9403_v10, %s8106_s26 }
0x17e5   : > { %v4623_v42 = vpop.xlane.xlu1 %4622 }
0x17e6   : > { %v4627_v60 = vsub.f32 %v4565_v9, %v4623_v42 }
0x17e8   : > { %v4629_v61 = vmul.f32 1.442695, %v4627_v60 }
0x17e9   : > { %v4646_v62 = vpop.permute.xlu1 %4645  ;;  %v4626_v1 = vpop.xlane.xlu0 %4625 }
0x17ea   : > { %7038 = vpow2.f32 %v4629_v61  ;;  %v4651_v2 = vsel %vm2755_vm10, %v4646_v62, 0  ;;  %v4628_v3 = vsub.f32 %v4615_v55, %v4626_v1 }
0x17eb   : > { %6617 = vmatpush3.bf16.msra.mxu0 %v4651_v2 }
0x17ec   : > { %v4631_v40 = vmul.f32 1.442695, %v4628_v3  ;;  %6628 = vmatprep.subr.bf16.mxu0 %v8102_v7 }
0x17ed   : > { %v4744_v14 = vpop.permute.xlu1 %4743 }
0x17ee   : > { %7040 = vpow2.f32 %v4631_v40  ;;  %v4749_v19 = vsel %vm2634_vm9, %v4744_v14, 0 }
0x17f1   : > { %v4794_v20 = vpop.permute.xlu1 %4793 }
0x17f2   : > { %v4799_v23 = vsel %vm2634_vm9, %v4794_v20, 0 }
0x17f5   : > { %v4742_v24 = vpop.permute.xlu1 %4741 }
0x17f7   : > { %v7039_v48 = vpop.eup %7038 }
0x17f8   : > { %v4633_v49 = vsel %vm2727_vm11, %v7039_v48, 0.0 }
0x17f9   : > { %4634 = vadd.xlane.f32.xlu0 %v4633_v49 }
0x17fb   : > { %v7041_v4 = vpop.eup %7040 }
0x17fc   : > { %v4636_v10 = vsel %vm2727_vm11, %v7041_v4, 0.0 }
0x17fd   : > { %4637 = vadd.xlane.f32.xlu0 %v4636_v10 }
0x1813   : > { %4693 = vrot.lane.b32.xlu0 %v9422_v59, %s8105_s5  ;;  %s9885_s5 = scalar_lea.vmem [#allocation47], %s8936_s1 }
0x1817   : > { %4791 = vrot.lane.b32.xlu0 %v9412_v54, %s8106_s26 }
0x1882   : > { %v4635_v5 = vpop.xlane.xlu0 %4634 }
0x1883   : > { %7042 = vrcp.f32 %v4635_v5 }
0x1886   : > { %v4638_v6 = vpop.xlane.xlu0 %4637 }
0x1887   : > { %7044 = vrcp.f32 %v4638_v6  ;;  %v6974_v6 = vld [vmem:[%s9004_s14 + $0x18] sm:$0xff]  }
0x188a   : > { %v4694_v8 = vpop.permute.xlu0 %4693 }
0x188b   : > { %v4699_v12 = vsel %vm2755_vm10, %v4694_v8, 0  ;;  %v6975_v8 = vld [vmem:[%s9004_s14 + $0x10] sm:$0xff]  }
0x188c   : > { %6623 = vmatpush3.bf16.msra.mxu1 %v4699_v12  ;;  %v6976_v12 = vld [vmem:[%s9004_s14 + $0x8] sm:$0xff]  }
0x188d   : > { %6634 = vmatprep.subr.bf16.mxu1 %v8102_v7 }
0x188e   : > { %v4792_v27 = vpop.permute.xlu0 %4791 }
0x1890   : > { %v7043_v13 = vpop.eup %7042 }
0x1891   : > { %v4640_v15 = vmul.f32 %v7043_v13, %v7039_v48  ;;  %v6977_v13 = vld [vmem:[%s9004_s14] sm:$0xff]   ;;  %s9882_s14 = scalar_lea.vmem [#allocation41], %s8936_s1 }
0x1893   : > { %v4643_v16 = vpack.c.bf16 %v4640_v15, %v4640_v15 }
0x1894   : > { %v7045_v17 = vpop.eup %7044 }
0x1895   : > { %6619 = vmatmul.mubr.msk.bf16.vlgmr.msra.gmra.mxu0 %vm2727_vm11, %v4643_v16  ;;  %v4642_v54 = vmul.f32 %v7045_v17, %v7041_v4 }
0x1896   : > { %6629 = vmatpush3.bf16.xpose.msra.mxu0 %v4749_v19  ;;  %6630 = vmatprep.mubr.msk.bf16.mxu0 %vm8103_vm6, %v8102_v7 }
0x1897   : > { %v4644_v21 = vpack.c.bf16 %v4642_v54, %v4642_v54  ;;  %6640 = vmatprep.subr.bf16.mxu0 %v8102_v7 }
0x1899   : > { %6625 = vmatmul.mubr.msk.bf16.vlgmr.msra.gmra.mxu1 %vm2727_vm11, %v4644_v21 }
0x189a   : > { %6635 = vmatpush3.bf16.xpose.msra.mxu1 %v4799_v23  ;;  %6636 = vmatprep.mubr.msk.bf16.mxu1 %vm8103_vm6, %v8102_v7 }
0x189b   : > { %6646 = vmatprep.subr.bf16.mxu1 %v8102_v7 }
0x189d   : > { %6631 = vmatmul.mubr.msk.bf16.vlgmr.msra.gmra.mxu0 %vm2634_vm9, %v4742_v24 }
0x189e   : > { %6642 = vmatprep.mubr.msk.bf16.mxu0 %vm8103_vm6, %v8102_v7 }
0x18a1   : > { %6637 = vmatmul.mubr.msk.bf16.vlgmr.msra.gmra.mxu1 %vm2634_vm9, %v4792_v27 }
0x18a2   : > { %6648 = vmatprep.mubr.msk.bf16.mxu1 %vm8103_vm6, %v8102_v7 }
0x1955   : > { %v4687_v18 = vpop.f32.mrf.mxu0 }
0x1957   : > { %v6620_v28 = vpop.f32.mrf.mxu0 }
0x1959   : > { %v4690_v30 = vpop.f32.mrf.mxu0  ;;  %v4735_v33 = vpop.f32.mrf.mxu1 }
0x195a   : > { %v6936_v56 = vpack.i.bf16 %v4735_v33, %v4687_v18 }
0x195b   : > { %v6621_v32 = vpop.f32.mrf.mxu0  ;;  %v6626_v29 = vpop.f32.mrf.mxu1 }
0x195d   : > { %v4738_v34 = vpop.f32.mrf.mxu1  ;;  %v4785_v39 = vpop.f32.mrf.mxu0 }
0x195e   : > { %v4841_v43 = vsel %vm2727_vm11, %v4785_v39, -inf }
0x195f   : > { %4842 = vmax.xlane.f32.xlu1 %v4841_v43  ;;  %v6627_v45 = vpop.f32.mrf.mxu1  ;;  %v6632_v47 = vpop.f32.mrf.mxu0 }
0x1961   : > { %v4788_v51 = vpop.f32.mrf.mxu0  ;;  %v4835_v9 = vpop.f32.mrf.mxu1 }
0x1962   : > { %v4844_v25 = vsel %vm2727_vm11, %v4835_v9, -inf }
0x1963   : > { %v6633_v26 = vpop.f32.mrf.mxu0  ;;  %4845 = vmax.xlane.f32.xlu0 %v4844_v25  ;;  %v6638_v52 = vpop.f32.mrf.mxu1 }
0x1965   : > { %v4838_v53 = vpop.f32.mrf.mxu1 }
0x1966   : > { %v7066_v53 = vld [vmem:[#allocation51] sm:$0xff] }
0x1967   : > { %v6639_v55 = vpop.f32.mrf.mxu1 }
0x1970   : > { %4865 = vrot.lane.b32.xlu1 %v9420_v58, %s8106_s26 }
0x1974   : > { %6932 = vrot.lane.b32.xlu1 %v6931_v11, %s8107_s2 }
0x1978   : > { %6937 = vrot.lane.b32.xlu1 %v6936_v56, %s8108_s12 }
0x19e8   : > { %v4843_v31 = vpop.xlane.xlu1 %4842 }
0x19e9   : > { %v4847_v38 = vsub.f32 %v4785_v39, %v4843_v31  ;;  %v3815_v31 = vadd.f32 %v9385_v35, %v9390_v41 }
0x19eb   : > { %v4849_v57 = vmul.f32 1.442695, %v4847_v38 }
0x19ec   : > { %v4866_v50 = vpop.permute.xlu1 %4865  ;;  %v4846_v42 = vpop.xlane.xlu0 %4845 }
0x19ed   : > { %7046 = vpow2.f32 %v4849_v57  ;;  %v4871_v60 = vsel %vm2755_vm10, %v4866_v50, 0  ;;  %v4848_v61 = vsub.f32 %v4835_v9, %v4846_v42  ;;  %v7067_v42 = vld [vmem:[#allocation51 + $0x8] sm:$0xff] }
0x19ee   : > { %6641 = vmatpush3.bf16.msra.mxu0 %v4871_v60 }
0x19ef   : > { %v4851_v62 = vmul.f32 1.442695, %v4848_v61  ;;  %6652 = vmatprep.subr.bf16.mxu0 %v8102_v7 }
0x19f0   : > { %v6933_v24 = vpop.permute.xlu1 %6932 }
0x19f1   : > { %7048 = vpow2.f32 %v4851_v62  ;;  %v6935_v18 = vunpack.i.h.bf16 %v6933_v24  ;;  %v6934_v28 = vunpack.i.l.bf16 %v6933_v24  ;;  %v9590_v62 = vadd.f32 %v3815_v31, %v9331_v0 }
0x19f3   : > { %v4986_v29 = vsel %vm2634_vm9, %v9460_v22, %v6935_v18  ;;  %v4985_v34 = vsel %vm2634_vm9, %v9458_v46, %v6934_v28  ;;  %v6212_v22 = vld [vmem:[%s9882_s14] ss:$0 sm:$0xff]  ;;  %v6983_v28 = vld [vmem:[%s9050_s16 + $0x10] sm:$0xff]  }
0x19f4   : > { %v6938_v27 = vpop.permute.xlu1 %6937 }
0x19f5   : > { %v6940_v30 = vunpack.i.h.bf16 %v6938_v27  ;;  %v6939_v33 = vunpack.i.l.bf16 %v6938_v27 }
0x19f7   : > { %v4988_v45 = vsel %vm2437_vm7, %v4986_v29, %v6940_v30  ;;  %v4987_v47 = vsel %vm2437_vm7, %v4985_v34, %v6939_v33  ;;  %v6984_v30 = vld [vmem:[%s9050_s16 + $0x8] sm:$0xff]   ;;  %v6985_v33 = vld [vmem:[%s9050_s16] sm:$0xff]  }
0x19fa   : > { %v7047_v58 = vpop.eup %7046 }
0x19fb   : > { %v4853_v36 = vsel %vm2727_vm11, %v7047_v58, 0.0 }
0x19fc   : > { %4854 = vadd.xlane.f32.xlu0 %v4853_v36 }
0x19fe   : > { %v7049_v44 = vpop.eup %7048 }
0x19ff   : > { %v4856_v11 = vsel %vm2727_vm11, %v7049_v44, 0.0 }
0x1a00   : > { %4857 = vadd.xlane.f32.xlu0 %v4856_v11 }
0x1a16   : > { %4913 = vrot.lane.b32.xlu0 %v9422_v59, %s8106_s26  ;;  %s8110_s26 = smov [#allocation50]  }
0x1a17   : > { %s5337_s2 = sshll.u32 %s8110_s26, 4  ;;  %s5338_s2 = int_to_ptr.vmem [resolvable:$true] %s5337_s2 }
0x1a18   : > { %s7874_s12 = scalar_lea.vmem %s5338_s2, 256  ;;  %p7881_p12 = scmp.lt.s32.totalorder %s5338_s2, %s5338_s2 }
0x1a19   : > { %p7875_p1 = scmp.ne.s32.totalorder %s5338_s2, %s7874_s12  ;;  %p7882_p10 = scmp.lt.s32.totalorder %s7874_s12, %s7874_s12 }
0x1a1b   : > { %p7876_p3 = pnand %p7875_p1, %p6808_p8  ;;  %p7883_p6 = por %p7882_p10, %p7881_p12 }
0x1a1d   : > { %p7877_p2 = pneg %p7876_p3 }
0x1a1f   : > { %p7884_p4 = pnand %p7883_p6, %p7877_p2 }
0x1a85   : > { %v4855_v1 = vpop.xlane.xlu0 %4854 }
0x1a86   : > { %7050 = vrcp.f32 %v4855_v1 }
0x1a89   : > { %v4858_v2 = vpop.xlane.xlu0 %4857 }
0x1a8a   : > { %7052 = vrcp.f32 %v4858_v2 }
0x1a8d   : > { %v4914_v3 = vpop.permute.xlu0 %4913 }
0x1a8e   : > { %v4919_v40 = vsel %vm2755_vm10, %v4914_v3, 0 }
0x1a8f   : > { %6647 = vmatpush3.bf16.msra.mxu1 %v4919_v40 }
0x1a90   : > { %6664 = vmatprep.subr.bf16.mxu1 %v8102_v7 }
0x1a93   : > { %v7051_v48 = vpop.eup %7050 }
0x1a94   : > { %v4860_v49 = vmul.f32 %v7051_v48, %v7047_v58  ;;  %v3823_v58 = vsel %vm2437_vm7, %v9590_v62, 0.0  ;;  %v9598_v48 = vadd.f32 %v9388_v37, %v9329_v63  ;;  %v6982_v63 = vld [vmem:[%s9050_s16 + $0x18] sm:$0xff]   ;;  %s9887_s16 = scalar_lea.vmem [#allocation31], %s8936_s1 }
0x1a96   : > { %v4863_v4 = vpack.c.bf16 %v4860_v49, %v4860_v49  ;;  %v3820_v49 = vsel %vm2437_vm7, %v9598_v48, 0.0 }
0x1a97   : > { %v7053_v10 = vpop.eup %7052 }
0x1a98   : > { %6643 = vmatmul.mubr.msk.bf16.vlgmr.msra.gmra.mxu0 %vm2727_vm11, %v4863_v4  ;;  %v4862_v59 = vmul.f32 %v7053_v10, %v7049_v44  ;;  %v6978_v4 = vld [vmem:[%s9019_s4 + $0x18] sm:$0xff]   ;;  %v6979_v10 = vld [vmem:[%s9019_s4 + $0x10] sm:$0xff]  }
0x1a99   : > { %6660 = vmatprep.mubr.msk.bf16.mxu0 %vm8103_vm6, %v8102_v7  ;;  %6653 = vmatpush3.bf16.msra.mxu0 %v6974_v6 }
0x1a9a   : > { %v4864_v5 = vpack.c.bf16 %v4862_v59, %v4862_v59  ;;  %6654 = vmatprep.subr.bf16.mxu0 %v8102_v7  ;;  %v6980_v59 = vld [vmem:[%s9019_s4 + $0x8] sm:$0xff]  }
0x1a9c   : > { %6649 = vmatmul.mubr.msk.bf16.vlgmr.msra.gmra.mxu1 %vm2727_vm11, %v4864_v5  ;;  %v6981_v5 = vld [vmem:[%s9019_s4] sm:$0xff]   ;;  %s9883_s4 = scalar_lea.vmem [#allocation43], %s8936_s1 }
0x1a9d   : > { %6672 = vmatprep.mubr.msk.bf16.mxu1 %vm8103_vm6, %v8102_v7  ;;  %6655 = vmatpush3.bf16.msra.mxu0 %v6975_v8 }
0x1a9e   : > { %6656 = vmatprep.subr.bf16.mxu0 %v8102_v7  ;;  %6665 = vmatpush3.bf16.msra.mxu1 %v6978_v4 }
0x1a9f   : > { %6666 = vmatprep.subr.bf16.mxu1 %v8102_v7 }
0x1aa1   : > { %6657 = vmatpush3.bf16.msra.mxu0 %v6976_v12 }
0x1aa2   : > { %6658 = vmatprep.subr.bf16.mxu0 %v8102_v7  ;;  %6667 = vmatpush3.bf16.msra.mxu1 %v6979_v10 }
0x1aa3   : > { %6668 = vmatprep.subr.bf16.mxu1 %v8102_v7 }
0x1aa5   : > { %6659 = vmatpush3.bf16.msra.mxu0 %v6977_v13 }
0x1aa6   : > { %6676 = vmatprep.subr.bf16.mxu0 %v8102_v7  ;;  %6669 = vmatpush3.bf16.msra.mxu1 %v6980_v59 }
0x1aa7   : > { %6670 = vmatprep.subr.bf16.mxu1 %v8102_v7 }
0x1aaa   : > { %6671 = vmatpush3.bf16.msra.mxu1 %v6981_v5 }
0x1b58   : > { %v4907_v14 = vpop.f32.mrf.mxu0 }
0x1b5a   : > { %v6644_v15 = vpop.f32.mrf.mxu0 }
0x1b5c   : > { %v4910_v16 = vpop.f32.mrf.mxu0  ;;  %v4955_v17 = vpop.f32.mrf.mxu1 }
0x1b5d   : > { %v6941_v19 = vpack.i.bf16 %v4955_v17, %v4907_v14  ;;  %v6218_v17 = vld [vmem:[%s9883_s4] ss:$0 sm:$0xff] }
0x1b5e   : > { %v6645_v54 = vpop.f32.mrf.mxu0  ;;  %v6650_v20 = vpop.f32.mrf.mxu1 }
0x1b5f   : > { %6942 = vrot.lane.b32.xlu1 %v6941_v19, %s8109_s8 }
0x1b60   : > { %v4958_v21 = vpop.f32.mrf.mxu1 }
0x1b61   : > { %v6219_v21 = vld [vmem:[%s9884_s17] ss:$0 sm:$0xff] }
0x1b62   : > { %v6651_v23 = vpop.f32.mrf.mxu1 }
0x1bd1   : > { %v6943_v32 = vpop.permute.xlu1 %6942 }
0x1bd2   : > { %v6945_v39 = vunpack.i.h.bf16 %v6943_v32  ;;  %v6944_v43 = vunpack.i.l.bf16 %v6943_v32  ;;  %v6220_v32 = vld [vmem:[%s9885_s5] ss:$0 sm:$0xff] }
0x1bd4   : > { %v4990_v51 = vsel %vm3539_vm12, %v4988_v45, %v6945_v39  ;;  %v4989_v9 = vsel %vm3539_vm12, %v4987_v47, %v6944_v43 }
0x1bd5   : > { %v4991_v25 = vpack.c.bf16 %v4990_v51, %v4989_v9 }
0x1bd7   : > { %6661 = vmatmul.mubr.msk.bf16.vlgmr.msra.gmra.mxu0 %vm2512_vm8, %v4991_v25 }
0x1bd8   : > { %6684 = vmatprep.mubr.msk.bf16.mxu0 %vm8103_vm6, %v8102_v7  ;;  %6677 = vmatpush3.bf16.msra.mxu0 %v6982_v63 }
0x1bd9   : > { %6678 = vmatprep.subr.bf16.mxu0 %v8102_v7 }
0x1bdc   : > { %6679 = vmatpush3.bf16.msra.mxu0 %v6983_v28 }
0x1bdd   : > { %6680 = vmatprep.subr.bf16.mxu0 %v8102_v7 }
0x1be0   : > { %6681 = vmatpush3.bf16.msra.mxu0 %v6984_v30 }
0x1be1   : > { %6682 = vmatprep.subr.bf16.mxu0 %v8102_v7  ;;  %v6226_v7 = vld [vmem:[%s1997_s21] ss:$0 sm:$0xff]  ;;  %s9886_s21 = scalar_lea.vmem [#allocation29], %s8936_s1 }
0x1be4   : > { %6683 = vmatpush3.bf16.msra.mxu0 %v6985_v33 }
0x1c97   : > { %v5059_v26 = vpop.f32.mrf.mxu0 }
0x1c98   : > { %v5060_v46 = vadd.f32 %v6212_v22, %v5059_v26 }
0x1c99   : > { %v6662_v52 = vpop.f32.mrf.mxu0 }
0x1c9a   : > { %v5066_v55 = vadd.f32 %v7066_v53, %v5060_v46 }
0x1c9b   : > { %v5062_v56 = vpop.f32.mrf.mxu0 }
0x1c9c   : > { %v5063_v38 = vadd.f32 %v6212_v22, %v5062_v56  ;;  %v5068_v57 = vsel %vm2512_vm8, %v5066_v55, 0.0 }
0x1c9d   : > { %5069 = vadd.xlane.f32.xlu0 %v5068_v57  ;;  %v6663_v50 = vpop.f32.mrf.mxu0 }
0x1c9e   : > { %v5067_v60 = vadd.f32 %v7067_v42, %v5063_v38 }
0x1ca0   : > { %v5071_v61 = vsel %vm2512_vm8, %v5067_v60, 0.0 }
0x1ca1   : > { %5072 = vadd.xlane.f32.xlu1 %v5071_v61 }
0x1ca5   : > { %3824 = vadd.xlane.f32.xlu1 %v3823_v58 }
0x1d26   : > { %v5070_v36 = vpop.xlane.xlu0 %5069 }
0x1d27   : > { %v5075_v35 = vmul.f32 0.015625, %v5070_v36 }
0x1d29   : > { %v5077_v41 = vsub.f32 %v5066_v55, %v5075_v35 }
0x1d2a   : > { %v5073_v44 = vpop.xlane.xlu1 %5072 }
0x1d2b   : > { %v5076_v11 = vmul.f32 0.015625, %v5073_v44  ;;  %v5079_v1 = vmul.f32 %v5077_v41, %v5077_v41 }
0x1d2d   : > { %v5078_v2 = vsub.f32 %v5067_v60, %v5076_v11  ;;  %v5081_v3 = vsel %vm2512_vm8, %v5079_v1, 0.0 }
0x1d2e   : > { %5082 = vadd.xlane.f32.xlu0 %v5081_v3  ;;  %v3825_v46 = vpop.xlane.xlu1 %3824 }
0x1d2f   : > { %v5080_v0 = vmul.f32 %v5078_v2, %v5078_v2  ;;  %v3827_v53 = vmul.f32 0.03125, %v3825_v46 }
0x1d31   : > { %v5084_v40 = vsel %vm2512_vm8, %v5080_v0, 0.0  ;;  %v3829_v50 = vsub.f32 %v9590_v62, %v3827_v53 }
0x1d32   : > { %5085 = vadd.xlane.f32.xlu0 %v5084_v40 }
0x1d33   : > { %v3831_v44 = vmul.f32 %v3829_v50, %v3829_v50 }
0x1d35   : > { %v3835_v11 = vsel %vm2437_vm7, %v3831_v44, 0.0 }
0x1d36   : > { %3821 = vadd.xlane.f32.xlu0 %v3820_v49 }
0x1db7   : > { %v5083_v37 = vpop.xlane.xlu0 %5082 }
0x1db8   : > { %v5087_v6 = vmul.f32 0.015625, %v5083_v37 }
0x1dba   : > { %v5089_v8 = vadd.f32 1e-06, %v5087_v6 }
0x1dbb   : > { %v5086_v12 = vpop.xlane.xlu0 %5085 }
0x1dbc   : > { %7054 = vrsqrt.f32 %v5089_v8  ;;  %v5088_v13 = vmul.f32 0.015625, %v5086_v12 }
0x1dbe   : > { %v5090_v14 = vadd.f32 1e-06, %v5088_v13  ;;  %v6180_v13 = vld [vmem:[%s9886_s21] ss:$0 sm:$0xff] }
0x1dbf   : > { %v3822_v22 = vpop.xlane.xlu0 %3821 }
0x1dc0   : > { %7056 = vrsqrt.f32 %v5090_v14  ;;  %v3826_v26 = vmul.f32 0.03125, %v3822_v22 }
0x1dc2   : > { %v3828_v55 = vsub.f32 %v9598_v48, %v3826_v26 }
0x1dc4   : > { %v3830_v61 = vmul.f32 %v3828_v55, %v3828_v55 }
0x1dc6   : > { %v3832_v35 = vsel %vm2437_vm7, %v3830_v61, 0.0 }
0x1dc9   : > { %v7055_v15 = vpop.eup %7054 }
0x1dca   : > { %v5093_v16 = vmul.f32 %v7055_v15, %v5077_v41  ;;  %v6181_v15 = vld [vmem:[%s9887_s16] ss:$0 sm:$0xff] }
0x1dcc   : > { %v5101_v20 = vmul.f32 %v6218_v17, %v5093_v16 }
0x1dcd   : > { %v7057_v19 = vpop.eup %7056 }
0x1dce   : > { %v5094_v54 = vmul.f32 %v7057_v19, %v5078_v2  ;;  %v5109_v24 = vadd.f32 %v6219_v21, %v5101_v20 }
0x1dd0   : > { %v5102_v23 = vmul.f32 %v6218_v17, %v5094_v54 }
0x1dd2   : > { %v5110_v27 = vadd.f32 %v6219_v21, %v5102_v23 }
0x1dd4   : > { %v5131_v18 = vpack.c.bf16 %v5110_v27, %v5109_v24 }
0x1dd6   : > { %6673 = vmatmul.mubr.msk.bf16.vlgmr.msra.gmra.mxu1 %vm2512_vm8, %v5131_v18 }
0x1e96   : > { %v5199_v29 = vpop.f32.mrf.mxu1 }
0x1e97   : > { %v5200_v39 = vadd.f32 %v6220_v32, %v5199_v29 }
0x1e98   : > { %v6674_v34 = vpop.f32.mrf.mxu1 }
0x1e99   : > { %v5206_v51 = vmax.f32 %v5200_v39, 0.0 }
0x1e9a   : > { %v5202_v43 = vpop.f32.mrf.mxu1 }
0x1e9b   : > { %v5203_v45 = vadd.f32 %v6220_v32, %v5202_v43 }
0x1e9c   : > { %v6675_v47 = vpop.f32.mrf.mxu1 }
0x1e9d   : > { %v5207_v9 = vmax.f32 %v5203_v45, 0.0 }
0x1e9f   : > { %v5208_v25 = vpack.c.bf16 %v5207_v9, %v5206_v51 }
0x1ea1   : > { %6685 = vmatmul.mubr.msk.bf16.vlgmr.msra.gmra.mxu0 %vm2512_vm8, %v5208_v25 }
0x1f61   : > { %v5276_v52 = vpop.f32.mrf.mxu0 }
0x1f62   : > { %v5277_v56 = vadd.f32 %v6226_v7, %v5276_v52 }
0x1f63   : > { %v6686_v31 = vpop.f32.mrf.mxu0 }
0x1f64   : > { %v5283_v38 = vadd.f32 %v5277_v56, %v5109_v24 }
0x1f65   : > { %v5279_v57 = vpop.f32.mrf.mxu0 }
0x1f66   : > { %v5280_v42 = vadd.f32 %v6226_v7, %v5279_v57  ;;  %v5285_v60 = vsel %vm2512_vm8, %v5283_v38, 0.0 }
0x1f67   : > { %5286 = vadd.xlane.f32.xlu0 %v5285_v60  ;;  %v6687_v58 = vpop.f32.mrf.mxu0 }
0x1f68   : > { %v5284_v36 = vadd.f32 %v5280_v42, %v5110_v27 }
0x1f6a   : > { %v5288_v41 = vsel %vm2512_vm8, %v5284_v36, 0.0 }
0x1f6b   : > { %3833 = vadd.xlane.f32.xlu0 %v3832_v35  ;;  %5289 = vadd.xlane.f32.xlu1 %v5288_v41 }
0x1f6f   : > { %3836 = vadd.xlane.f32.xlu1 %v3835_v11 }
0x1ff0   : > { %v5287_v1 = vpop.xlane.xlu0 %5286 }
0x1ff1   : > { %v5291_v2 = vmul.f32 0.015625, %v5287_v1 }
0x1ff3   : > { %v5293_v62 = vsub.f32 %v5283_v38, %v5291_v2 }
0x1ff4   : > { %v3834_v3 = vpop.xlane.xlu0 %3833  ;;  %v5290_v0 = vpop.xlane.xlu1 %5289 }
0x1ff5   : > { %v3838_v40 = vmul.f32 0.03125, %v3834_v3  ;;  %v5292_v48 = vmul.f32 0.015625, %v5290_v0  ;;  %v5295_v49 = vmul.f32 %v5293_v62, %v5293_v62 }
0x1ff7   : > { %v3840_v4 = vadd.f32 1e-06, %v3838_v40  ;;  %v5294_v10 = vsub.f32 %v5284_v36, %v5292_v48  ;;  %v5297_v59 = vsel %vm2512_vm8, %v5295_v49, 0.0 }
0x1ff8   : > { %5298 = vadd.xlane.f32.xlu0 %v5297_v59  ;;  %v3837_v5 = vpop.xlane.xlu1 %3836 }
0x1ff9   : > { %7058 = vrsqrt.f32 %v3840_v4  ;;  %v3839_v63 = vmul.f32 0.03125, %v3837_v5  ;;  %v5296_v37 = vmul.f32 %v5294_v10, %v5294_v10 }
0x1ffb   : > { %v3841_v6 = vadd.f32 1e-06, %v3839_v63  ;;  %v5300_v8 = vsel %vm2512_vm8, %v5296_v37, 0.0 }
0x1ffc   : > { %5301 = vadd.xlane.f32.xlu1 %v5300_v8 }
0x1ffd   : > { %7060 = vrsqrt.f32 %v3841_v6 }
0x2006   : > { %v7059_v12 = vpop.eup %7058 }
0x2007   : > { %v3844_v14 = vmul.f32 %v7059_v12, %v3828_v55 }
0x2009   : > { %v3852_v16 = vmul.f32 %v6180_v13, %v3844_v14 }
0x200a   : > { %v7061_v17 = vpop.eup %7060 }
0x200b   : > { %v3845_v19 = vmul.f32 %v7061_v17, %v3829_v50  ;;  %v3860_v54 = vadd.f32 %v6181_v15, %v3852_v16 }
0x200d   : > { %v3853_v20 = vmul.f32 %v6180_v13, %v3845_v19  ;;  %5327 = vst.msk [vmem:[#allocation50] sm:$0xff] %vm2437_vm7, %v3860_v54 }
0x200f   : > { %v3861_v21 = vadd.f32 %v6181_v15, %v3853_v20 }
0x2011   : > { %5328 = vst.msk [vmem:[#allocation50 + $0x8] sm:$0xff] %vm2437_vm7, %v3861_v21 }
0x2012   : > { %7887 = shalt.err (!%p7884_p4)
}
0x2013   : > { %s8111_s1 = smov 128   ;;  %s9888_s8 = sld [smem:[#allocation108_spill]]  ;;  %v6232_v32 = vld [vmem:[%s2256_s28] ss:$0 sm:$0xff] }
0x2014   : > { %s8112_s18 = smov 8   ;;  %v6233_v34 = vld [vmem:[%s2259_s19] ss:$0 sm:$0xff]  ;;  %s8113_s11 = smov [#allocation51]  }
0x2015   : > { %s5350_s9 = sshll.u32 %s8113_s11, 4  ;;  %s5351_s9 = int_to_ptr.vmem [resolvable:$true] %s5350_s9 }
0x2016   : > { %s7898_s0 = scalar_lea.vmem %s5351_s9, 256  ;;  %p7905_p9 = scmp.lt.s32.totalorder %s5351_s9, %s5351_s9 }
0x2017   : > { %p7899_p13 = scmp.ne.s32.totalorder %s5351_s9, %s7898_s0  ;;  %p7906_p0 = scmp.lt.s32.totalorder %s7898_s0, %s7898_s0 }
0x2019   : > { %6765 = dma.vmem_to_hbm [thread:$0]  (%p6808_p8), %s5338_s2, 256, %s9888_s8, [#allocation4], %s8111_s1, %s8111_s1, %s8112_s18  }
0x201a   : > { %p7900_p7 = pnand %p7899_p13, %p6808_p8  ;;  %p7907_p5 = por %p7906_p0, %p7905_p9 }
0x201c   : > { %p7901_p11 = pneg %p7900_p7 }
0x201e   : > { %p7908_p1 = pnand %p7907_p5, %p7901_p11 }
0x2081   : > { %v5299_v23 = vpop.xlane.xlu0 %5298 }
0x2082   : > { %v5303_v24 = vmul.f32 0.015625, %v5299_v23 }
0x2084   : > { %v5305_v27 = vadd.f32 1e-06, %v5303_v24 }
0x2085   : > { %v5302_v18 = vpop.xlane.xlu1 %5301 }
0x2086   : > { %7062 = vrsqrt.f32 %v5305_v27  ;;  %v5304_v28 = vmul.f32 0.015625, %v5302_v18 }
0x2088   : > { %v5306_v30 = vadd.f32 1e-06, %v5304_v28 }
0x208a   : > { %7064 = vrsqrt.f32 %v5306_v30 }
0x2093   : > { %v7063_v33 = vpop.eup %7062 }
0x2094   : > { %v5309_v29 = vmul.f32 %v7063_v33, %v5293_v62 }
0x2096   : > { %v5317_v39 = vmul.f32 %v6232_v32, %v5309_v29 }
0x2097   : > { %v7065_v43 = vpop.eup %7064 }
0x2098   : > { %v5310_v45 = vmul.f32 %v7065_v43, %v5294_v10  ;;  %v5325_v47 = vadd.f32 %v6233_v34, %v5317_v39 }
0x209a   : > { %v5318_v51 = vmul.f32 %v6232_v32, %v5310_v45  ;;  %5329 = vst.msk [vmem:[#allocation51] sm:$0xff] %vm2512_vm8, %v5325_v47 }
0x209c   : > { %v5326_v9 = vadd.f32 %v6233_v34, %v5318_v51 }
0x209e   : > { %5330 = vst.msk [vmem:[#allocation51 + $0x8] sm:$0xff] %vm2512_vm8, %v5326_v9 }
0x209f   : > { %7911 = shalt.err (!%p7908_p1)
}
0x20a0   : > { %s9890_s19 = sld [smem:[#allocation109_spill]] }
0x20a6   : > { %6767 = dma.vmem_to_hbm [thread:$0]  (%p6808_p8), %s5351_s9, 256, %s9890_s19, [#allocation52], %s8111_s1, %s8111_s1, %s8112_s18  }
0x20a7   : > { %8003 = dma.done.wait (%p6808_p8), [#allocation4], 256  }
0x20a8   : > { %8005 = vsyncadd (%p6808_p8), [#allocation4], 4294967040 }
0x20a9   : > { %8007 = dma.done.wait (%p6808_p8), [#allocation52], 256  }
0x20aa   : > { %8009 = vsyncadd (%p6808_p8), [#allocation52], 4294967040 }
0x20ab PF: > { %s9891_s11 = sld [smem:[#allocation110_spill]]  ;;  %s9893_s0 = smov %s8016_s7 }
0x20ac   : > { %s9892_s3 = sld [smem:[#allocation111_spill]]  ;;  %s9894_s7 = smov %s8020_s10 }
0x20b1   : > { %p133_p3 = scmp.ge.s32.totalorder %s9891_s11, 4  }
0x20b2   : > { %s9895_s10 = smov %s9892_s3 }
0x20b3   :  { %135 = sbr.rel (!%p133_p3) target bundleno = 118 (0x76), region = 598 }
0x20b8   :  { %5370 = vsyncpa [#allocation3], 1 }
0x20b9   :  { %5372 = vsyncpa [#allocation3 + $0x1], 1 }
0x20ba   :  { %5373 = vsyncpa [#allocation6], 1 }
0x20bb   :  { %5374 = vsyncpa [#allocation9], 1 }
0x20bc   :  { %5375 = vsyncpa [#allocation12], 1 }
0x20bd   :  { %5376 = vsyncpa [#allocation15], 1 }
0x20be   :  { %5378 = vsyncpa [#allocation15 + $0x1], 1 }
0x20bf   :  { %5379 = vsyncpa [#allocation18], 1 }
0x20c0   :  { %5381 = vsyncpa [#allocation18 + $0x1], 1 }
0x20c1   :  { %5382 = vsyncpa [#allocation21], 1 }
0x20c2   :  { %5384 = vsyncpa [#allocation21 + $0x1], 1 }
0x20c3   :  { %5385 = vsyncpa [#allocation24], 1 }
0x20c4   :  { %5387 = vsyncpa [#allocation24 + $0x1], 1 }
0x20c5   :  { %5388 = vsyncpa [#allocation27], 1 }
0x20c6   :  { %5390 = vsyncpa [#allocation27 + $0x1], 1 }
0x20c7   :  { %5391 = vsyncpa [#allocation30], 1 }
0x20c8   :  { %5393 = vsyncpa [#allocation30 + $0x1], 1 }
0x20c9   :  { %5394 = vsyncpa [#allocation33], 1 }
0x20ca   :  { %5396 = vsyncpa [#allocation33 + $0x1], 1 }
0x20cb   :  { %5397 = vsyncpa [#allocation36], 1 }
0x20cc   :  { %5399 = vsyncpa [#allocation36 + $0x1], 1 }
0x20cd   :  { %5400 = vsyncpa [#allocation39], 1 }
0x20ce   :  { %5402 = vsyncpa [#allocation39 + $0x1], 1 }
0x20cf   :  { %5403 = vsyncpa [#allocation42], 1 }
0x20d0   :  { %5405 = vsyncpa [#allocation42 + $0x1], 1 }
0x20d1   :  { %5406 = vsyncpa [#allocation45], 1 }
0x20d2   :  { %5408 = vsyncpa [#allocation45 + $0x1], 1 }
0x20d3   :  { %5409 = vsyncpa [#allocation48], 1 }
0x20d4   :  { %5411 = vsyncpa [#allocation48 + $0x1], 1 }
0x20d5   :  { %5412 = vsyncpa [#allocation4], 1 }
0x20d6   :  { %5414 = vsyncpa [#allocation4 + $0x1], 1 }
0x20d7   :  { %5415 = vsyncpa [#allocation52], 1 }

</bundles_post_ra>
